<compile_context>
chip_gen: v5e
topology: v5e:2x2
jax: 0.10.0
libtpu: 0.0.40
codegen_flags: <defaults>
</compile_context>

<pallas_src>
import functools

import jax
import jax.numpy as jnp
from jax.experimental import pallas as pl
from jax.experimental.pallas import tpu as pltpu

# Pin matmul precision so the in-kernel dot and the plain-JAX reference use the
# same MXU algorithm (avoids bf16-pass drift between Mosaic and XLA defaults).
jax.config.update("jax_default_matmul_precision", "highest")

BN_EPS = 1e-5


def gnn_kernel(a_ref, x_ref, gamma_ref, beta_ref, o_ref, *, n_real, inv_n):
    """One (column-tile, layer) grid step: o <- BN(ReLU(A @ o)), o seeded from x."""
    layer = pl.program_id(1)

    @pl.when(layer == 0)
    def _():
        o_ref[...] = x_ref[...]                        # seed the layer carry

    z = o_ref[...]                                     # f32 carry, (N_pad, TILE_D)

    # GConv_wo_param (message = w_e * x_src, aggr='add')  ==  A_hat @ z  (MXU).
    agg = jnp.dot(a_ref[...], z, preferred_element_type=jnp.float32)

    act = jnp.maximum(agg, 0.0)                        # ReLU

    # BatchNorm1d (training-mode biased batch statistics), two-pass.
    # Padded rows of `act` are exactly zero (their A_hat rows are zero), so the
    # plain sum over N_pad rows equals the sum over real rows; only the centered
    # square needs a row mask.
    mean = jnp.sum(act, axis=0, keepdims=True) * inv_n
    centered = act - mean
    if n_real != act.shape[0]:
        row_valid = jax.lax.broadcasted_iota(jnp.int32, act.shape, 0) < n_real
        cen_masked = jnp.where(row_valid, centered, 0.0)
    else:
        cen_masked = centered
    var = jnp.sum(cen_masked * cen_masked, axis=0, keepdims=True) * inv_n
    # NOTE: the two sublane reductions could be fused (or moved to the MXU as
    # ones(1,N) @ [act | act^2]) if the XLU vex slot ever becomes the bottleneck;
    # at realistic N they hide under the matmul.

    gamma = gamma_ref[pl.ds(layer, 1), :]              # (1, TILE_D), this layer
    beta = beta_ref[pl.ds(layer, 1), :]
    scale = gamma * jax.lax.rsqrt(var + BN_EPS)        # EUP rsqrt
    o_ref[...] = centered * scale + beta               # carry for the next layer


def build_normalized_adjacency(edge_index, num_nodes, edge_weight=None):
    """aggr_norm(..., norm_type='gcn') materialized as a dense [N, N] f32 matrix."""
    # TODO(synk): densification is O(N^2); for large graphs switch to a
    # segment-sum / sparse-panel formulation before the Pallas call.
    row, col = edge_index[0], edge_index[1]            # row = source, col = target
    if edge_weight is None:
        edge_weight = jnp.ones((edge_index.shape[1],), jnp.float32)
    # A[target, source] += w   (scatter-add merges duplicate edges)
    a = jnp.zeros((num_nodes, num_nodes), jnp.float32).at[col, row].add(edge_weight)
    # add_remaining_self_loops(fill_value=1.0): only for nodes with no self-loop
    # edge present (presence, not summed weight).
    present = jnp.zeros((num_nodes, num_nodes), jnp.bool_).at[col, row].set(True)
    has_self_loop = jnp.diagonal(present)
    a = a + jnp.diag(jnp.where(has_self_loop, 0.0, 1.0))
    # degree = scatter_add of edge weights over the target index == row-sum of A
    deg = jnp.sum(a, axis=1)
    deg_inv_sqrt = jnp.where(deg > 0.0, deg ** -0.5, 0.0)
    return deg_inv_sqrt[:, None] * a * deg_inv_sqrt[None, :]


def _build_gnn_call(n_pad, dim, num_layers, tile_d, n_real, use_buffered):
    kernel = functools.partial(gnn_kernel, n_real=n_real, inv_n=1.0 / n_real)
    buf1 = dict(pipeline_mode=pl.Buffered(1)) if use_buffered else {}
    d_spec = lambda d, l: (0, d)    # block index depends only on the feature tile

    # VMEM budget (upper bound assumes double-buffering everywhere + headroom).
    # Default scoped limits (16 MiB v5e / 32 MiB v6e,v7x) are too small once the
    # resident A_hat reaches a few thousand nodes, so size the limit explicitly.
    est = (2 * 4 * n_pad * n_pad            # resident A_hat
           + 4 * 4 * n_pad * tile_d         # x + out blocks
           + 4 * 4 * num_layers * tile_d    # gamma + beta blocks
           + (4 << 20))                     # headroom
    vmem_limit = int(min(max(est, 16 << 20), 96 << 20))

    cost = pl.CostEstimate(
        flops=int(num_layers * (2 * n_pad * n_pad * dim + 10 * n_pad * dim)),
        transcendentals=int(num_layers * dim),
        bytes_accessed=int(4 * (n_pad * n_pad + 2 * n_pad * dim
                                + 2 * num_layers * dim)),
    )

    return pl.pallas_call(
        kernel,
        out_shape=jax.ShapeDtypeStruct((n_pad, dim), jnp.float32),
        grid_spec=pltpu.PrefetchScalarGridSpec(
            num_scalar_prefetch=0,
            grid=(dim // tile_d, num_layers),          # (feature tiles, layers)
            in_specs=[
                # A_hat: constant block index -> fetched once per core, resident,
                # single-buffered (no per-tile re-DMA, no exposed wait).
                pl.BlockSpec((n_pad, n_pad), lambda d, l: (0, 0), **buf1),
                pl.BlockSpec((n_pad, tile_d), d_spec, **buf1),        # x column tile
                pl.BlockSpec((num_layers, tile_d), d_spec, **buf1),   # gamma, all layers
                pl.BlockSpec((num_layers, tile_d), d_spec, **buf1),   # beta, all layers
            ],
            out_specs=pl.BlockSpec((n_pad, tile_d), d_spec),
        ),
        compiler_params=pltpu.CompilerParams(
            # Feature tiles are independent.  On v7x prefer pltpu.CORE_PARALLEL
            # on axis 0 and keep dim // tile_d a multiple of 2 so both
            # TensorCores stay busy.
            dimension_semantics=("parallel", "arbitrary"),
            vmem_limit_bytes=vmem_limit,
        ),
        cost_estimate=cost,
    )


def gnn_forward(x, edge_index, gamma, beta, *, tile_d=None):
    """GNN.forward (aggr_norm='gcn', activation=ReLU, norm='batch', eval-mode dropout).

    x:     [N, D] float32 node features (input_dim == hidden_dim == output_dim,
           required since GConv_wo_param has no weights)
    gamma: [num_layers, D] BatchNorm weights
    beta:  [num_layers, D] BatchNorm biases
    """
    num_nodes, dim = x.shape
    num_layers = gamma.shape[0]

    if tile_d is None:
        # Prefer 256-wide tiles (full MXU output width on v6e/v7x); on v5e,
        # tile_d=128 costs no MXU utilization and halves activation VMEM.
        if dim % 256 == 0:
            tile_d = 256
        elif dim % 128 == 0:
            tile_d = 128
        else:
            tile_d = dim
    assert dim % tile_d == 0

    # Pad the node dimension to a multiple of 128: lane-dense A / x blocks,
    # unmasked DMAs, full-width MXU contraction.  Zero rows/cols are a no-op for
    # the aggregation; BN statistics mask them out in-kernel.
    n_pad = max(128, ((num_nodes + 127) // 128) * 128)
    a_hat = build_normalized_adjacency(edge_index, num_nodes)
    a_hat = jnp.pad(a_hat, ((0, n_pad - num_nodes), (0, n_pad - num_nodes)))
    x_pad = jnp.pad(x.astype(jnp.float32), ((0, n_pad - num_nodes), (0, 0)))

    args = (a_hat, x_pad, gamma.astype(jnp.float32), beta.astype(jnp.float32))
    try:
        out = _build_gnn_call(n_pad, dim, num_layers, tile_d, num_nodes, True)(*args)
    except Exception:
        # Fallback if pipeline_mode=pl.Buffered(1) is unsupported on this
        # jax/libtpu version: identical semantics, default double-buffering.
        out = _build_gnn_call(n_pad, dim, num_layers, tile_d, num_nodes, False)(*args)
    return out[:num_nodes, :]


def gnn_reference(x, edge_index, gamma, beta):
    """Plain-JAX reference mirroring the kernel's f32 math (two-pass BatchNorm)."""
    a = build_normalized_adjacency(edge_index, x.shape[0])
    n = x.shape[0]
    z = x.astype(jnp.float32)
    for l in range(gamma.shape[0]):
        z = jnp.maximum(jnp.dot(a, z, preferred_element_type=jnp.float32), 0.0)
        mean = jnp.sum(z, axis=0, keepdims=True) * (1.0 / n)
        centered = z - mean
        var = jnp.sum(centered * centered, axis=0, keepdims=True) * (1.0 / n)
        z = centered * (gamma[l] * jax.lax.rsqrt(var + BN_EPS)) + beta[l]
    return z


if __name__ == "__main__":
    N, D, E, NUM_LAYERS = 64, 512, 256, 3   # D=512, TILE_D=256 -> 2 parallel tiles

    key = jax.random.PRNGKey(0)
    kx, ksrc, ktgt, kg, kb = jax.random.split(key, 5)

    x = jax.random.normal(kx, (N, D), dtype=jnp.float32)
    edge_index = jnp.stack([
        jax.random.randint(ksrc, (E,), 0, N),
        jax.random.randint(ktgt, (E,), 0, N),
    ]).astype(jnp.int32)

    # BatchNorm affine params (perturbed from the default weight=1 / bias=0 so the
    # per-layer gamma/beta indexing path is actually exercised).
    gamma = 1.0 + 0.1 * jax.random.normal(kg, (NUM_LAYERS, D), dtype=jnp.float32)
    beta = 0.1 * jax.random.normal(kb, (NUM_LAYERS, D), dtype=jnp.float32)

    out = gnn_forward(x, edge_index, gamma, beta)
    out = jax.block_until_ready(out)

    ref = gnn_reference(x, edge_index, gamma, beta)
    assert out.shape == (N, D)
    assert out.dtype == jnp.float32
    max_err = float(jnp.max(jnp.abs(out - ref)))
    assert jnp.allclose(out, ref, atol=2e-3, rtol=2e-3), max_err

    print("KERNEL_OK")
</pallas_src>

<mosaic_0001>
module attributes {stable_mosaic.version = 11 : i64} {
  func.func @gnn_kernel(%arg0: i32, %arg1: i32, %arg2: memref<128x128xf32, #tpu.memory_space<vmem>>, %arg3: memref<128x256xf32, #tpu.memory_space<vmem>>, %arg4: memref<3x256xf32, #tpu.memory_space<vmem>>, %arg5: memref<3x256xf32, #tpu.memory_space<vmem>>, %arg6: memref<128x256xf32, #tpu.memory_space<vmem>>) attributes {dimension_semantics = [#tpu.dimension_semantics<parallel>, #tpu.dimension_semantics<arbitrary>], iteration_bounds = array<i64: 2, 3>, scalar_prefetch = 0 : i64, scratch_operands = 0 : i64, tpu.core_type = #tpu.core_type<tc>, window_params = [{pipeline_mode = #tpu.pipeline_mode<synchronous>, transform_indices = @transform_0, window_bounds = array<i64: 128, 128>}, {pipeline_mode = #tpu.pipeline_mode<synchronous>, transform_indices = @transform_1, window_bounds = array<i64: 128, 256>}, {pipeline_mode = #tpu.pipeline_mode<synchronous>, transform_indices = @transform_2, window_bounds = array<i64: 3, 256>}, {pipeline_mode = #tpu.pipeline_mode<synchronous>, transform_indices = @transform_3, window_bounds = array<i64: 3, 256>}, {transform_indices = @transform_4, window_bounds = array<i64: 128, 256>}]} {
    %c0_i32 = arith.constant 0 : i32
    %0 = arith.cmpi eq, %arg1, %c0_i32 : i32
    %1 = arith.extui %0 : i1 to i32
    %c0_i32_0 = arith.constant 0 : i32
    %2 = arith.cmpi ne, %1, %c0_i32_0 : i32
    scf.if %2 {
      %c0_15 = arith.constant 0 : index
      %c0_16 = arith.constant 0 : index
      %37 = vector.load %arg3[%c0_15, %c0_16] : memref<128x256xf32, #tpu.memory_space<vmem>>, vector<128x256xf32>
      %c0_17 = arith.constant 0 : index
      %c0_18 = arith.constant 0 : index
      %38 = vector.load %arg6[%c0_17, %c0_18] : memref<128x256xf32, #tpu.memory_space<vmem>>, vector<128x256xf32>
      tpu.vector_store %arg6[%c0_17, %c0_18], %37 {strides = array<i32>} : memref<128x256xf32, #tpu.memory_space<vmem>>, vector<128x256xf32>,
    } else {
    }
    %c0 = arith.constant 0 : index
    %c0_1 = arith.constant 0 : index
    %3 = vector.load %arg6[%c0, %c0_1] : memref<128x256xf32, #tpu.memory_space<vmem>>, vector<128x256xf32>
    %c0_2 = arith.constant 0 : index
    %c0_3 = arith.constant 0 : index
    %4 = vector.load %arg2[%c0_2, %c0_3] : memref<128x128xf32, #tpu.memory_space<vmem>>, vector<128x128xf32>
    %cst = arith.constant dense<0.000000e+00> : vector<128x256xf32>
    %5 = tpu.matmul %4, %3, %cst {dimension_numbers = #tpu.dot_dimension_numbers<[1], [0], [0], [1], [0, 0, 1, 1], [], []>, precision = #tpu.contract_precision<fp32>} : vector<128x128xf32>, vector<128x256xf32>, vector<128x256xf32> -> vector<128x256xf32>
    %cst_4 = arith.constant 0.000000e+00 : f32
    %6 = vector.broadcast %cst_4 : f32 to vector<128x256xf32>
    %7 = arith.maximumf %5, %6 : vector<128x256xf32>
    %cst_5 = arith.constant dense<0.000000e+00> : vector<256xf32>
    %8 = vector.multi_reduction <add>, %7, %cst_5 [0] : vector<128x256xf32> to vector<256xf32>
    %9 = vector.shape_cast %8 : vector<256xf32> to vector<1x256xf32>
    %cst_6 = arith.constant 1.562500e-02 : f32
    %10 = vector.broadcast %cst_6 : f32 to vector<1x256xf32>
    %11 = arith.mulf %9, %10 : vector<1x256xf32>
    %12 = vector.broadcast %11 : vector<1x256xf32> to vector<128x256xf32>
    %13 = arith.subf %7, %12 : vector<128x256xf32>
    %14 = tpu.iota {dimensions = array<i32: 0>} : vector<128x256xi32>
    %c64_i32 = arith.constant 64 : i32
    %15 = vector.broadcast %c64_i32 : i32 to vector<128x256xi32>
    %16 = arith.cmpi slt, %14, %15 : vector<128x256xi32>
    %cst_7 = arith.constant 0.000000e+00 : f32
    %17 = vector.broadcast %cst_7 : f32 to vector<128x256xf32>
    %18 = arith.select %16, %13, %17 : vector<128x256xi1>, vector<128x256xf32>
    %19 = arith.mulf %18, %18 : vector<128x256xf32>
    %cst_8 = arith.constant dense<0.000000e+00> : vector<256xf32>
    %20 = vector.multi_reduction <add>, %19, %cst_8 [0] : vector<128x256xf32> to vector<256xf32>
    %21 = vector.shape_cast %20 : vector<256xf32> to vector<1x256xf32>
    %cst_9 = arith.constant 1.562500e-02 : f32
    %22 = vector.broadcast %cst_9 : f32 to vector<1x256xf32>
    %23 = arith.mulf %21, %22 : vector<1x256xf32>
    %24 = arith.index_cast %arg1 : i32 to index
    %c0_10 = arith.constant 0 : index
    %25 = vector.load %arg4[%24, %c0_10] : memref<3x256xf32, #tpu.memory_space<vmem>>, vector<1x256xf32>
    %26 = arith.index_cast %arg1 : i32 to index
    %c0_11 = arith.constant 0 : index
    %27 = vector.load %arg5[%26, %c0_11] : memref<3x256xf32, #tpu.memory_space<vmem>>, vector<1x256xf32>
    %cst_12 = arith.constant 9.99999974E-6 : f32
    %28 = vector.broadcast %cst_12 : f32 to vector<1x256xf32>
    %29 = arith.addf %23, %28 : vector<1x256xf32>
    %30 = math.rsqrt %29 : vector<1x256xf32>
    %31 = arith.mulf %25, %30 : vector<1x256xf32>
    %32 = vector.broadcast %31 : vector<1x256xf32> to vector<128x256xf32>
    %33 = arith.mulf %13, %32 : vector<128x256xf32>
    %34 = vector.broadcast %27 : vector<1x256xf32> to vector<128x256xf32>
    %35 = arith.addf %33, %34 : vector<128x256xf32>
    %c0_13 = arith.constant 0 : index
    %c0_14 = arith.constant 0 : index
    %36 = vector.load %arg6[%c0_13, %c0_14] : memref<128x256xf32, #tpu.memory_space<vmem>>, vector<128x256xf32>
    tpu.vector_store %arg6[%c0_13, %c0_14], %35 {strides = array<i32>} : memref<128x256xf32, #tpu.memory_space<vmem>>, vector<128x256xf32>,
    return
  }
  func.func @transform_0(%arg0: i32, %arg1: i32) -> (i32, i32) {
    %c0_i32 = arith.constant 0 : i32
    %c0_i32_0 = arith.constant 0 : i32
    %c0_i32_1 = arith.constant 0 : i32
    return %c0_i32, %c0_i32_0 : i32, i32
  }
  func.func @transform_1(%arg0: i32, %arg1: i32) -> (i32, i32) {
    %c0_i32 = arith.constant 0 : i32
    %c0_i32_0 = arith.constant 0 : i32
    return %c0_i32, %arg0 : i32, i32
  }
  func.func @transform_2(%arg0: i32, %arg1: i32) -> (i32, i32) {
    %c0_i32 = arith.constant 0 : i32
    %c0_i32_0 = arith.constant 0 : i32
    return %c0_i32, %arg0 : i32, i32
  }
  func.func @transform_3(%arg0: i32, %arg1: i32) -> (i32, i32) {
    %c0_i32 = arith.constant 0 : i32
    %c0_i32_0 = arith.constant 0 : i32
    return %c0_i32, %arg0 : i32, i32
  }
  func.func @transform_4(%arg0: i32, %arg1: i32) -> (i32, i32) {
    %c0_i32 = arith.constant 0 : i32
    %c0_i32_0 = arith.constant 0 : i32
    return %c0_i32, %arg0 : i32, i32
  }
}

module attributes {stable_mosaic.version = 11 : i64} {
  func.func @gnn_kernel(%arg0: i32, %arg1: i32, %arg2: memref<128x128xf32, #tpu.memory_space<vmem>>, %arg3: memref<128x256xf32, #tpu.memory_space<vmem>>, %arg4: memref<3x256xf32, #tpu.memory_space<vmem>>, %arg5: memref<3x256xf32, #tpu.memory_space<vmem>>, %arg6: memref<128x256xf32, #tpu.memory_space<vmem>>) attributes {dimension_semantics = [#tpu.dimension_semantics<parallel>, #tpu.dimension_semantics<arbitrary>], iteration_bounds = array<i64: 2, 3>, scalar_prefetch = 0 : i64, scratch_operands = 0 : i64, tpu.core_type = #tpu.core_type<tc>, window_params = [{pipeline_mode = #tpu.pipeline_mode<synchronous>, transform_indices = @transform_0, window_bounds = array<i64: 128, 128>}, {transform_indices = @transform_1, window_bounds = array<i64: 128, 256>}, {transform_indices = @transform_2, window_bounds = array<i64: 3, 256>}, {transform_indices = @transform_3, window_bounds = array<i64: 3, 256>}, {transform_indices = @transform_4, window_bounds = array<i64: 128, 256>}]} {
    %c0_i32 = arith.constant 0 : i32
    %0 = arith.cmpi eq, %arg1, %c0_i32 : i32
    %1 = arith.extui %0 : i1 to i32
    %c0_i32_0 = arith.constant 0 : i32
    %2 = arith.cmpi ne, %1, %c0_i32_0 : i32
    scf.if %2 {
      %c0_15 = arith.constant 0 : index
      %c0_16 = arith.constant 0 : index
      %37 = vector.load %arg3[%c0_15, %c0_16] : memref<128x256xf32, #tpu.memory_space<vmem>>, vector<128x256xf32>
      %c0_17 = arith.constant 0 : index
      %c0_18 = arith.constant 0 : index
      %38 = vector.load %arg6[%c0_17, %c0_18] : memref<128x256xf32, #tpu.memory_space<vmem>>, vector<128x256xf32>
      tpu.vector_store %arg6[%c0_17, %c0_18], %37 {strides = array<i32>} : memref<128x256xf32, #tpu.memory_space<vmem>>, vector<128x256xf32>,
    } else {
    }
    %c0 = arith.constant 0 : index
    %c0_1 = arith.constant 0 : index
    %3 = vector.load %arg6[%c0, %c0_1] : memref<128x256xf32, #tpu.memory_space<vmem>>, vector<128x256xf32>
    %c0_2 = arith.constant 0 : index
    %c0_3 = arith.constant 0 : index
    %4 = vector.load %arg2[%c0_2, %c0_3] : memref<128x128xf32, #tpu.memory_space<vmem>>, vector<128x128xf32>
    %cst = arith.constant dense<0.000000e+00> : vector<128x256xf32>
    %5 = tpu.matmul %4, %3, %cst {dimension_numbers = #tpu.dot_dimension_numbers<[1], [0], [0], [1], [0, 0, 1, 1], [], []>, precision = #tpu.contract_precision<fp32>} : vector<128x128xf32>, vector<128x256xf32>, vector<128x256xf32> -> vector<128x256xf32>
    %cst_4 = arith.constant 0.000000e+00 : f32
    %6 = vector.broadcast %cst_4 : f32 to vector<128x256xf32>
    %7 = arith.maximumf %5, %6 : vector<128x256xf32>
    %cst_5 = arith.constant dense<0.000000e+00> : vector<256xf32>
    %8 = vector.multi_reduction <add>, %7, %cst_5 [0] : vector<128x256xf32> to vector<256xf32>
    %9 = vector.shape_cast %8 : vector<256xf32> to vector<1x256xf32>
    %cst_6 = arith.constant 1.562500e-02 : f32
    %10 = vector.broadcast %cst_6 : f32 to vector<1x256xf32>
    %11 = arith.mulf %9, %10 : vector<1x256xf32>
    %12 = vector.broadcast %11 : vector<1x256xf32> to vector<128x256xf32>
    %13 = arith.subf %7, %12 : vector<128x256xf32>
    %14 = tpu.iota {dimensions = array<i32: 0>} : vector<128x256xi32>
    %c64_i32 = arith.constant 64 : i32
    %15 = vector.broadcast %c64_i32 : i32 to vector<128x256xi32>
    %16 = arith.cmpi slt, %14, %15 : vector<128x256xi32>
    %cst_7 = arith.constant 0.000000e+00 : f32
    %17 = vector.broadcast %cst_7 : f32 to vector<128x256xf32>
    %18 = arith.select %16, %13, %17 : vector<128x256xi1>, vector<128x256xf32>
    %19 = arith.mulf %18, %18 : vector<128x256xf32>
    %cst_8 = arith.constant dense<0.000000e+00> : vector<256xf32>
    %20 = vector.multi_reduction <add>, %19, %cst_8 [0] : vector<128x256xf32> to vector<256xf32>
    %21 = vector.shape_cast %20 : vector<256xf32> to vector<1x256xf32>
    %cst_9 = arith.constant 1.562500e-02 : f32
    %22 = vector.broadcast %cst_9 : f32 to vector<1x256xf32>
    %23 = arith.mulf %21, %22 : vector<1x256xf32>
    %24 = arith.index_cast %arg1 : i32 to index
    %c0_10 = arith.constant 0 : index
    %25 = vector.load %arg4[%24, %c0_10] : memref<3x256xf32, #tpu.memory_space<vmem>>, vector<1x256xf32>
    %26 = arith.index_cast %arg1 : i32 to index
    %c0_11 = arith.constant 0 : index
    %27 = vector.load %arg5[%26, %c0_11] : memref<3x256xf32, #tpu.memory_space<vmem>>, vector<1x256xf32>
    %cst_12 = arith.constant 9.99999974E-6 : f32
    %28 = vector.broadcast %cst_12 : f32 to vector<1x256xf32>
    %29 = arith.addf %23, %28 : vector<1x256xf32>
    %30 = math.rsqrt %29 : vector<1x256xf32>
    %31 = arith.mulf %25, %30 : vector<1x256xf32>
    %32 = vector.broadcast %31 : vector<1x256xf32> to vector<128x256xf32>
    %33 = arith.mulf %13, %32 : vector<128x256xf32>
    %34 = vector.broadcast %27 : vector<1x256xf32> to vector<128x256xf32>
    %35 = arith.addf %33, %34 : vector<128x256xf32>
    %c0_13 = arith.constant 0 : index
    %c0_14 = arith.constant 0 : index
    %36 = vector.load %arg6[%c0_13, %c0_14] : memref<128x256xf32, #tpu.memory_space<vmem>>, vector<128x256xf32>
    tpu.vector_store %arg6[%c0_13, %c0_14], %35 {strides = array<i32>} : memref<128x256xf32, #tpu.memory_space<vmem>>, vector<128x256xf32>,
    return
  }
  func.func @transform_0(%arg0: i32, %arg1: i32) -> (i32, i32) {
    %c0_i32 = arith.constant 0 : i32
    %c0_i32_0 = arith.constant 0 : i32
    %c0_i32_1 = arith.constant 0 : i32
    return %c0_i32, %c0_i32_0 : i32, i32
  }
  func.func @transform_1(%arg0: i32, %arg1: i32) -> (i32, i32) {
    %c0_i32 = arith.constant 0 : i32
    %c0_i32_0 = arith.constant 0 : i32
    return %c0_i32, %arg0 : i32, i32
  }
  func.func @transform_2(%arg0: i32, %arg1: i32) -> (i32, i32) {
    %c0_i32 = arith.constant 0 : i32
    %c0_i32_0 = arith.constant 0 : i32
    return %c0_i32, %arg0 : i32, i32
  }
  func.func @transform_3(%arg0: i32, %arg1: i32) -> (i32, i32) {
    %c0_i32 = arith.constant 0 : i32
    %c0_i32_0 = arith.constant 0 : i32
    return %c0_i32, %arg0 : i32, i32
  }
  func.func @transform_4(%arg0: i32, %arg1: i32) -> (i32, i32) {
    %c0_i32 = arith.constant 0 : i32
    %c0_i32_0 = arith.constant 0 : i32
    return %c0_i32, %arg0 : i32, i32
  }
}

</mosaic_0001>

<bundles_post_ra>
// kernel: tpu_custom_call.1
= control target key start
LH: loop header
LB: loop body
LE: loop exit
PB: predicated region body
PF: predicated region fallthrough
CT: control target
= control target key end

     0   :  { %s4572_s0 = inlined_call_operand.hbm [shape: f32[128,128], index: 0, kind: input, shape index: {}]   ;;  %s4573_s1 = inlined_call_operand.hbm [shape: f32[128,512], index: 1, kind: input, shape index: {}]   ;;  %s4574_s2 = inlined_call_operand.hbm [shape: f32[3,512], index: 2, kind: input, shape index: {}]   ;;  %s4575_s3 = inlined_call_operand.hbm [shape: f32[3,512], index: 3, kind: input, shape index: {}]   ;;  %s4576_s4 = inlined_call_operand.hbm [shape: f32[128,512], index: 4, kind: output, shape index: {}]  }
   0x1   :  { %4652 = sst [smem:[#allocation52_spill]] %s4573_s1 }
   0x2   :  { %9 = vsyncpa [#allocation3], 0 }
   0x3   :  { %10 = vsyncpa [#allocation6], 0 }
   0x4   :  { %11 = vsyncpa [#allocation9], 0 }
   0x5   :  { %12 = vsyncpa [#allocation4], 0 }
   0x6   :  { %14 = vsyncpa [#allocation4 + $0x1], 0  ;;  %s2935_s15 = smov 0   ;;  %s2937_s16 = smov 0  }
   0x7   :  { %s2939_s17 = smov 0   ;;  %s2941_s18 = smov 0  }
   0x8   :  { %s2943_s19 = smov 0   ;;  %s2945_s20 = smov 0  }
   0x9   :  { %s2947_s21 = smov 0   ;;  %s2949_s22 = smov 0  }
   0xa LB: > { %4653 = sst [smem:[#allocation15_spill]] %s2888_s20  ;;  %s2532_s23 = sadd.s32 4294967295, %s2896_s22   ;;  %s2896_s22 = sphi %s2949_s22, %s20_s22   ;;  %s2892_s21 = sphi %s2947_s21, %s4774_s21   ;;  %s2888_s20 = sphi %s2945_s20, %s4773_s20   ;;  %s2884_s19 = sphi %s2943_s19, %s4772_s19   ;;  %s2880_s18 = sphi %s2941_s18, %s4771_s18   ;;  %s2876_s17 = sphi %s2939_s17, %s4777_s17   ;;  %s2872_s16 = sphi %s2937_s16, %s4776_s16   ;;  %s2868_s15 = sphi %s2935_s15, %s4775_s15  }
   0xb   : > { %4654 = sst [smem:[#allocation16_spill]] %s2892_s21  ;;  %s2533_s24 = sadd.s32 4294967294, %s2896_s22  }
   0xc   : > { %s29_s25 = sadd.s32 1, %s2888_s20  ;;  %s32_s26 = sadd.s32 1, %s2892_s21 }
   0xd   : > { %p30_p0 = scmp.ge.s32.totalorder %s29_s25, 3  ;;  %s60_s27 = sadd.s32 1, %s2876_s17 }
   0xe   : > { %p73_p1 = scmp.ne.s32.totalorder %s2872_s16, %s2868_s15  ;;  %p2982_p2 = scmp.eq.s32.totalorder %s2532_s23, 0 }
   0xf   : > { %s4779_s25 = smov (%p30_p0, %s29_s25), 0  ;;  %s4781_s26 = smov (!%p30_p0, %s32_s26), %s2892_s21 }
  0x10   : > { %4656 = sst [smem:[#allocation17_spill]] %s4779_s25  ;;  %p2991_p3 = por %p2982_p2, %p73_p1 }
  0x11   : > { %p148_p4 = scmp.ne.s32.totalorder %s2876_s17, %s2872_s16  ;;  %p34_p5 = scmp.ge.s32.totalorder %s4781_s26, 2 }
  0x12   : > { %p149_p6 = scmp.eq.s32.totalorder %s2532_s23, 5  ;;  %p155_p7 = scmp.eq.s32.totalorder %s2533_s24, 5 }
  0x13   : > { %p2534_p8 = scmp.ge.s32.totalorder %s2896_s22, 1  ;;  %s4783_s26 = smov (%p34_p5, %s4781_s26), 0 }
  0x14   : > { %4658 = sst [smem:[#allocation18_spill]] %s4783_s26  ;;  %p3000_p9 = por %p149_p6, %p148_p4 }
  0x15   : > { %p3004_p10 = por %p155_p7, %p73_p1  ;;  %s57_s6 = ssub.s32 %s2892_s21, %s4783_s26 }
  0x16   : > { %p162_p11 = scmp.lt.s32.totalorder %s2896_s22, 7  ;;  %p58_p12 = scmp.eq.s32.totalorder %s57_s6, 0 }
  0x17   : > { %s4577_s8 = sshll.u32 %s2884_s19, 4  ;;  %s4663_s1 = sld [smem:[#allocation52_spill]] }
  0x18   : > { %p3011_p13 = pnand %p2534_p8, %p162_p11  ;;  %s2898_s14 = smov [#allocation5]  }
  0x19   : > { %s3017_s9 = scalar_select %p58_p12, %s2876_s17, %s60_s27  }
  0x1a   : > { %p4578_p0 = pneg %p3011_p13  ;;  %s192_s23 = sshll.u32 %s2898_s14, 4  ;;  %s193_s23 = int_to_ptr.vmem [resolvable:$true] %s192_s23 }
  0x1b   : > { %4662 = sst [smem:[#allocation19_spill]] %s3017_s9 }
  0x1c   : > { %p3031_p1 = pnand %p4578_p0, %p2991_p3 }
  0x1d   : > { %s189_s12 = scalar_lea.hbm %s4663_s1, %s4577_s8 }
  0x1e   : > { %s190_s13 = sshll.u32 %s189_s12, 4  ;;  %p2674_p5 = pneg %p3031_p1  ;;  %s191_s13 = int_to_ptr.hbm [resolvable:$true] %s190_s13 }
  0x1f   : > { %s2670_s27 = sshra.s32 %s191_s13, 4  ;;  %s2677_s12 = scalar_lea.hbm %s4663_s1, 512  ;;  %s2671_s27 = int_to_ptr.hbm [resolvable:$true] %s2670_s27 }
  0x20   : > { %s2672_s6 = scalar_lea.hbm %s2671_s27, 256  ;;  %p2678_p8 = scmp.lt.s32.totalorder %s2671_s27, %s4663_s1 }
  0x21   : > { %p2673_p4 = scmp.ne.s32.totalorder %s2671_s27, %s2672_s6  ;;  %p2679_p11 = scmp.lt.s32.totalorder %s2677_s12, %s2672_s6 }
  0x23   : > { %p2675_p6 = pnand %p2674_p5, %p2673_p4  ;;  %p2680_p12 = por %p2679_p11, %p2678_p8 }
  0x25   : > { %p2676_p7 = pneg %p2675_p6 }
  0x27   : > { %p2681_p0 = pnand %p2680_p12, %p2676_p7 }
  0x29   : > { %2684 = shalt.err (!%p2681_p0)
}
  0x2a   : > { %s2899_s26 = smov 512   ;;  %s2900_s25 = smov 256  }
  0x2b   : > { %s2901_s21 = smov 16   ;;  %s173_s11 = sshll.u32 %s4572_s0, 4  ;;  %s174_s11 = int_to_ptr.hbm [resolvable:$true] %s173_s11 }
  0x2c   : > { %2576 = dma.hbm_to_vmem [thread:$0]  (!%p3031_p1), %s191_s13, 4096, %s193_s23, [#allocation6], %s2899_s26, %s2900_s25, %s2901_s21  }
  0x2d   : > { %p4665_p4 = pneg %p3011_p13  ;;  %s2902_s8 = smov [#allocation2]  }
  0x2e   : > { %s175_s27 = sshll.u32 %s2902_s8, 4  ;;  %s2554_s6 = sshll.u32 %s2884_s19, 3  ;;  %s176_s27 = int_to_ptr.vmem [resolvable:$true] %s175_s27 }
  0x2f   : > { %p2571_p6 = pnand %p4665_p4, %p2982_p2  ;;  %s2903_s12 = smov 128  }
  0x30   : > { %s2904_s14 = smov 8   ;;  %s206_s21 = scalar_lea.hbm %s4574_s2, %s2554_s6 }
  0x31   : > { %2573 = dma.hbm_to_vmem [thread:$0]  (!%p2571_p6), %s174_s11, 2048, %s176_s27, [#allocation3], %s2903_s12, %s2903_s12, %s2904_s14  }
  0x32   : > { %s208_s25 = sshll.u32 %s206_s21, 4  ;;  %s2905_s20 = smov [#allocation7]   ;;  %s209_s25 = int_to_ptr.hbm [resolvable:$true] %s208_s25 }
  0x33   : > { %s210_s26 = sshll.u32 %s2905_s20, 4  ;;  %s2730_s13 = sshra.s32 %s209_s25, 4  ;;  %s211_s26 = int_to_ptr.vmem [resolvable:$true] %s210_s26  ;;  %s2731_s13 = int_to_ptr.hbm [resolvable:$true] %s2730_s13 }
  0x34   : > { %s2732_s23 = scalar_lea.hbm %s2731_s13, 8  ;;  %s2737_s11 = scalar_lea.hbm %s4574_s2, 16 }
  0x35   : > { %p2733_p0 = scmp.ne.s32.totalorder %s2731_s13, %s2732_s23  ;;  %p2738_p11 = scmp.lt.s32.totalorder %s2731_s13, %s4574_s2 }
  0x36   : > { %p2739_p12 = scmp.lt.s32.totalorder %s2737_s11, %s2732_s23 }
  0x37   : > { %p2735_p7 = pnand %p2733_p0, %p2674_p5 }
  0x38   : > { %p2740_p4 = por %p2739_p12, %p2738_p11 }
  0x39   : > { %p2736_p8 = pneg %p2735_p7 }
  0x3b   : > { %p2741_p6 = pnand %p2740_p4, %p2736_p8 }
  0x3d   : > { %2744 = shalt.err (!%p2741_p6)
}
  0x3e   : > { %2579 = dma.hbm_to_vmem [thread:$0]  (!%p3031_p1), %s209_s25, 128, %s211_s26, [#allocation6]  }
  0x3f   : > { %s221_s14 = scalar_lea.hbm %s4575_s3, %s2554_s6  ;;  %s2906_s20 = smov [#allocation8]  }
  0x40   : > { %s223_s21 = sshll.u32 %s221_s14, 4  ;;  %s225_s10 = sshll.u32 %s2906_s20, 4  ;;  %s224_s21 = int_to_ptr.hbm [resolvable:$true] %s223_s21  ;;  %s226_s10 = int_to_ptr.vmem [resolvable:$true] %s225_s10 }
  0x41   : > { %s2760_s8 = sshra.s32 %s224_s21, 4  ;;  %s2767_s25 = scalar_lea.hbm %s4575_s3, 16  ;;  %s2761_s8 = int_to_ptr.hbm [resolvable:$true] %s2760_s8 }
  0x42   : > { %s2762_s13 = scalar_lea.hbm %s2761_s8, 8  ;;  %p2768_p11 = scmp.lt.s32.totalorder %s2761_s8, %s4575_s3 }
  0x43   : > { %p2763_p0 = scmp.ne.s32.totalorder %s2761_s8, %s2762_s13  ;;  %p2769_p12 = scmp.lt.s32.totalorder %s2767_s25, %s2762_s13 }
  0x45   : > { %p2765_p7 = pnand %p2763_p0, %p2674_p5  ;;  %p2770_p4 = por %p2769_p12, %p2768_p11 }
  0x47   : > { %p2766_p8 = pneg %p2765_p7 }
  0x49   : > { %p2771_p6 = pnand %p2770_p4, %p2766_p8 }
  0x4b   : > { %2774 = shalt.err (!%p2771_p6)
}
  0x4c   : > { %2582 = dma.hbm_to_vmem [thread:$0]  (!%p3031_p1), %s224_s21, 128, %s226_s10, [#allocation9]  }
  0x4d   : > { %238 = sbr.rel (%p3011_p13) target bundleno = 807 (0x327), region = 36 }
  0x52   : > { %2851 = dma.done.wait (%p2982_p2), [#allocation3], 2048  }
  0x53   : > { %2853 = vsyncadd (%p2982_p2), [#allocation3], 4294965248 }
  0x54   : > { %2855 = dma.done.wait (%p2991_p3), [#allocation6], 4224  }
  0x55   : > { %2857 = vsyncadd (%p2991_p3), [#allocation6], 4294963072 }
  0x56   : > { %2859 = dma.done.wait (%p2991_p3), [#allocation9], 128  }
  0x57   : > { %2861 = vsyncadd (%p2991_p3), [#allocation9], 4294967168  ;;  %s272_s7 = sand.u32 1, %s2872_s16   ;;  %p2545_p2 = scmp.ne.s32.totalorder %s2880_s18, 0 }
  0x58   : > { %s2544_s24 = sshll.u32 %s272_s7, 8 }
  0x59   : > { %s3102_s6 = scalar_lea.vmem [#allocation10], %s2544_s24  ;;  %282 = sbr.rel (%p2545_p2) target bundleno = 127 (0x7f), region = 56 }
  0x5e   : > { %v283_v0 = vld [vmem:[#allocation5] sm:$0xff]  ;;  %v284_v1 = vld [vmem:[#allocation5 + $0x8] sm:$0xff]  ;;  %v285_v2 = vld [vmem:[#allocation5 + $0x10] sm:$0xff] }
  0x5f   : > { %315 = vst [vmem:[%s3102_s6] sm:$0xff] %v283_v0  ;;  %v286_v3 = vld [vmem:[#allocation5 + $0x18] sm:$0xff]  ;;  %v287_v4 = vld [vmem:[#allocation5 + $0x20] sm:$0xff]  ;;  %v288_v5 = vld [vmem:[#allocation5 + $0x28] sm:$0xff] }
  0x60   : > { %316 = vst [vmem:[%s3102_s6 + $0x8] sm:$0xff] %v284_v1  ;;  %v289_v6 = vld [vmem:[#allocation5 + $0x30] sm:$0xff]  ;;  %v290_v7 = vld [vmem:[#allocation5 + $0x38] sm:$0xff]  ;;  %v291_v8 = vld [vmem:[#allocation5 + $0x40] sm:$0xff] }
  0x61   : > { %317 = vst [vmem:[%s3102_s6 + $0x10] sm:$0xff] %v285_v2  ;;  %v292_v9 = vld [vmem:[#allocation5 + $0x48] sm:$0xff]  ;;  %v293_v10 = vld [vmem:[#allocation5 + $0x50] sm:$0xff]  ;;  %v294_v11 = vld [vmem:[#allocation5 + $0x58] sm:$0xff] }
  0x62   : > { %318 = vst [vmem:[%s3102_s6 + $0x18] sm:$0xff] %v286_v3  ;;  %v295_v12 = vld [vmem:[#allocation5 + $0x60] sm:$0xff]  ;;  %v296_v13 = vld [vmem:[#allocation5 + $0x68] sm:$0xff]  ;;  %v297_v14 = vld [vmem:[#allocation5 + $0x70] sm:$0xff] }
  0x63   : > { %319 = vst [vmem:[%s3102_s6 + $0x20] sm:$0xff] %v287_v4  ;;  %v298_v15 = vld [vmem:[#allocation5 + $0x78] sm:$0xff]  ;;  %v299_v16 = vld [vmem:[#allocation5 + $0x80] sm:$0xff]  ;;  %v300_v17 = vld [vmem:[#allocation5 + $0x88] sm:$0xff] }
  0x64   : > { %320 = vst [vmem:[%s3102_s6 + $0x28] sm:$0xff] %v288_v5  ;;  %v301_v18 = vld [vmem:[#allocation5 + $0x90] sm:$0xff]  ;;  %v302_v19 = vld [vmem:[#allocation5 + $0x98] sm:$0xff]  ;;  %v303_v20 = vld [vmem:[#allocation5 + $0xa0] sm:$0xff] }
  0x65   : > { %321 = vst [vmem:[%s3102_s6 + $0x30] sm:$0xff] %v289_v6  ;;  %v304_v21 = vld [vmem:[#allocation5 + $0xa8] sm:$0xff]  ;;  %v305_v22 = vld [vmem:[#allocation5 + $0xb0] sm:$0xff]  ;;  %v306_v23 = vld [vmem:[#allocation5 + $0xb8] sm:$0xff] }
  0x66   : > { %322 = vst [vmem:[%s3102_s6 + $0x38] sm:$0xff] %v290_v7  ;;  %v307_v24 = vld [vmem:[#allocation5 + $0xc0] sm:$0xff]  ;;  %v308_v25 = vld [vmem:[#allocation5 + $0xc8] sm:$0xff]  ;;  %v309_v26 = vld [vmem:[#allocation5 + $0xd0] sm:$0xff] }
  0x67   : > { %323 = vst [vmem:[%s3102_s6 + $0x40] sm:$0xff] %v291_v8  ;;  %v310_v27 = vld [vmem:[#allocation5 + $0xd8] sm:$0xff]  ;;  %v311_v28 = vld [vmem:[#allocation5 + $0xe0] sm:$0xff]  ;;  %v312_v29 = vld [vmem:[#allocation5 + $0xe8] sm:$0xff] }
  0x68   : > { %324 = vst [vmem:[%s3102_s6 + $0x48] sm:$0xff] %v292_v9  ;;  %v313_v30 = vld [vmem:[#allocation5 + $0xf0] sm:$0xff]  ;;  %v314_v31 = vld [vmem:[#allocation5 + $0xf8] sm:$0xff] }
  0x69   : > { %325 = vst [vmem:[%s3102_s6 + $0x50] sm:$0xff] %v293_v10 }
  0x6a   : > { %326 = vst [vmem:[%s3102_s6 + $0x58] sm:$0xff] %v294_v11 }
  0x6b   : > { %327 = vst [vmem:[%s3102_s6 + $0x60] sm:$0xff] %v295_v12 }
  0x6c   : > { %328 = vst [vmem:[%s3102_s6 + $0x68] sm:$0xff] %v296_v13 }
  0x6d   : > { %329 = vst [vmem:[%s3102_s6 + $0x70] sm:$0xff] %v297_v14 }
  0x6e   : > { %330 = vst [vmem:[%s3102_s6 + $0x78] sm:$0xff] %v298_v15 }
  0x6f   : > { %331 = vst [vmem:[%s3102_s6 + $0x80] sm:$0xff] %v299_v16 }
  0x70   : > { %332 = vst [vmem:[%s3102_s6 + $0x88] sm:$0xff] %v300_v17 }
  0x71   : > { %333 = vst [vmem:[%s3102_s6 + $0x90] sm:$0xff] %v301_v18 }
  0x72   : > { %334 = vst [vmem:[%s3102_s6 + $0x98] sm:$0xff] %v302_v19 }
  0x73   : > { %335 = vst [vmem:[%s3102_s6 + $0xa0] sm:$0xff] %v303_v20 }
  0x74   : > { %336 = vst [vmem:[%s3102_s6 + $0xa8] sm:$0xff] %v304_v21 }
  0x75   : > { %337 = vst [vmem:[%s3102_s6 + $0xb0] sm:$0xff] %v305_v22 }
  0x76   : > { %338 = vst [vmem:[%s3102_s6 + $0xb8] sm:$0xff] %v306_v23 }
  0x77   : > { %339 = vst [vmem:[%s3102_s6 + $0xc0] sm:$0xff] %v307_v24 }
  0x78   : > { %340 = vst [vmem:[%s3102_s6 + $0xc8] sm:$0xff] %v308_v25 }
  0x79   : > { %341 = vst [vmem:[%s3102_s6 + $0xd0] sm:$0xff] %v309_v26 }
  0x7a   : > { %342 = vst [vmem:[%s3102_s6 + $0xd8] sm:$0xff] %v310_v27 }
  0x7b   : > { %343 = vst [vmem:[%s3102_s6 + $0xe0] sm:$0xff] %v311_v28 }
  0x7c   : > { %344 = vst [vmem:[%s3102_s6 + $0xe8] sm:$0xff] %v312_v29 }
  0x7d   : > { %345 = vst [vmem:[%s3102_s6 + $0xf0] sm:$0xff] %v313_v30 }
  0x7e   : > { %346 = vst [vmem:[%s3102_s6 + $0xf8] sm:$0xff] %v314_v31 }
  0x7f PF: > { %v371_v38 = vld [vmem:[%s3102_s6 + $0xc0] sm:$0xff]  ;;  %v369_v39 = vld [vmem:[%s3102_s6 + $0xb0] sm:$0xff]  ;;  %s2256_s28 = sshra.s32 %s2880_s18, 2  ;;  %s2259_s29 = sand.u32 3, %s2880_s18  ;;  %vm2292_vm5 = vcmask 1040384  }
  0x80   : > { %v373_v34 = vld [vmem:[%s3102_s6 + $0xd0] sm:$0xff]  ;;  %v367_v40 = vld [vmem:[%s3102_s6 + $0xa0] sm:$0xff]  ;;  %v3149_v41 = vand.u32 4294901760, %v371_v38  ;;  %v3151_v42 = vand.u32 4294901760, %v369_v39  ;;  %s2556_s1 = sshll.u32 %s2256_s28, 3  ;;  %s4769_s14 = sshll.u32 %s2884_s19, 4 }
  0x81   : > { %v3144_v37 = vand.u32 4294901760, %v373_v34  ;;  %v3153_v43 = vand.u32 4294901760, %v367_v40  ;;  %v365_v44 = vld [vmem:[%s3102_s6 + $0x90] sm:$0xff]  ;;  %v363_v45 = vld [vmem:[%s3102_s6 + $0x80] sm:$0xff]  ;;  %s2262_s9 = sadd.s32 %s2556_s1, %s2259_s29  ;;  %s2414_s10 = scalar_lea.hbm %s4576_s4, %s4769_s14 }
  0x82   : > { %v375_v33 = vld [vmem:[%s3102_s6 + $0xe0] sm:$0xff]  ;;  %v3168_v49 = vand.u32 4294901760, %v365_v44  ;;  %v361_v50 = vld [vmem:[%s3102_s6 + $0x70] sm:$0xff]  ;;  %v3172_v51 = vsub.f32 %v371_v38, %v3149_v41  ;;  %v3175_v52 = vsub.f32 %v369_v39, %v3151_v42  ;;  %v3185_v57 = vand.u32 4294901760, %v363_v45  ;;  %s2263_s12 = scalar_lea.vmem [#allocation7], %s2262_s9  ;;  %s2265_s18 = scalar_lea.vmem [#allocation8], %s2262_s9 }
  0x83   : > { %v3142_v36 = vand.u32 4294901760, %v375_v33  ;;  %v3166_v48 = vsub.f32 %v373_v34, %v3144_v37  ;;  %v3178_v53 = vsub.f32 %v367_v40, %v3153_v43  ;;  %v359_v58 = vld [vmem:[%s3102_s6 + $0x60] sm:$0xff]  ;;  %v3190_v60 = vand.u32 4294901760, %v361_v50  ;;  %v357_v4 = vld [vmem:[%s3102_s6 + $0x50] sm:$0xff]  ;;  %s2415_s8 = sshll.u32 %s3102_s6, 4  ;;  %s2417_s13 = sshll.u32 %s2414_s10, 4  ;;  %s2416_s8 = int_to_ptr.vmem [resolvable:$true] %s2415_s8  ;;  %s2418_s13 = int_to_ptr.hbm [resolvable:$true] %s2417_s13 }
  0x84   : > { %v377_v32 = vld [vmem:[%s3102_s6 + $0xf0] sm:$0xff]  ;;  %v4592_v59 = vand.u32 4294901760, %v3172_v51  ;;  %v3193_v61 = vsub.f32 %v365_v44, %v3168_v49  ;;  %v4591_v1 = vand.u32 4294901760, %v3175_v52  ;;  %v3208_v2 = vand.u32 4294901760, %v359_v58  ;;  %v355_v9 = vld [vmem:[%s3102_s6 + $0x40] sm:$0xff]  ;;  %s2403_s19 = scalar_lea.sflag [#allocation4], %s272_s7 }
  0x85   : > { %v3140_v35 = vand.u32 4294901760, %v377_v32  ;;  %v3163_v47 = vsub.f32 %v375_v33, %v3142_v36  ;;  %v4596_v56 = vand.u32 4294901760, %v3166_v48  ;;  %v4589_v3 = vand.u32 4294901760, %v3178_v53  ;;  %v353_v17 = vld [vmem:[%s3102_s6 + $0x30] sm:$0xff]  ;;  %v351_v23 = vld [vmem:[%s3102_s6 + $0x20] sm:$0xff]  ;;  %v378_v31 = vld [vmem:[%s3102_s6 + $0xf8] sm:$0xff] }
  0x86   : > { %v577_v7 = vsub.f32 %v3172_v51, %v4592_v59  ;;  %v3218_v8 = vsub.f32 %v363_v45, %v3185_v57  ;;  %v4588_v10 = vand.u32 4294901760, %v3193_v61  ;;  %v3224_v11 = vsub.f32 %v361_v50, %v3190_v60  ;;  %v379_v24 = vld [vmem:[#allocation2] sm:$0xff]  ;;  %v347_v45 = vld [vmem:[%s3102_s6] sm:$0xff]  ;;  %s2804_s23 = sshra.s32 %s2418_s13, 4  ;;  %s2810_s27 = scalar_lea.hbm %s4576_s4, 512  ;;  %s2805_s23 = int_to_ptr.hbm [resolvable:$true] %s2804_s23 }
  0x87   : > { %396 = vmatpush.msra.mxu0 %v3140_v35  ;;  %v3159_v46 = vsub.f32 %v377_v32, %v3140_v35  ;;  %847 = vmatpush.msra.mxu3 %v3140_v35  ;;  %v4598_v55 = vand.u32 4294901760, %v3163_v47  ;;  %v571_v0 = vsub.f32 %v3166_v48, %v4596_v56  ;;  %v583_v13 = vsub.f32 %v3175_v52, %v4591_v1  ;;  %v349_v28 = vld [vmem:[%s3102_s6 + $0x10] sm:$0xff]  ;;  %s2806_s11 = scalar_lea.hbm %s2805_s23, 256  ;;  %p2811_p5 = scmp.lt.s32.totalorder %s2805_s23, %s4576_s4 }
  0x88   : > { %v3230_v14 = vand.u32 4294901760, %v357_v4  ;;  %v589_v15 = vsub.f32 %v3178_v53, %v4589_v3  ;;  %v3237_v16 = vand.u32 4294901760, %v355_v9  ;;  %v578_v18 = vand.u32 4294901760, %v577_v7  ;;  %p2807_p3 = scmp.ne.s32.totalorder %s2805_s23, %s2806_s11  ;;  %p2812_p0 = scmp.lt.s32.totalorder %s2810_s27, %s2806_s11 }
  0x89   : > { %398 = vmatpush.msra.mxu0 %v3142_v36  ;;  %719 = vmatpush.msra.mxu2 %v3159_v46  ;;  %v4599_v54 = vand.u32 4294901760, %v3159_v46  ;;  %v565_v63 = vsub.f32 %v3163_v47, %v4598_v55  ;;  %v572_v12 = vand.u32 4294901760, %v571_v0  ;;  %v4587_v19 = vand.u32 4294901760, %v3218_v8  ;;  %v380_v0 = vld [vmem:[#allocation2 + $0x8] sm:$0xff] }
  0x8a   : > { %849 = vmatpush.msra.mxu3 %v3142_v36  ;;  %v3243_v20 = vsub.f32 %v359_v58, %v3208_v2  ;;  %v595_v21 = vsub.f32 %v3193_v61, %v4588_v10  ;;  %v4585_v22 = vand.u32 4294901760, %v3224_v11  ;;  %v584_v25 = vand.u32 4294901760, %v583_v13  ;;  %v372_v10 = vld [vmem:[%s3102_s6 + $0xc8] sm:$0xff]  ;;  %p2808_p13 = pnand %p2807_p3, %p3000_p9  ;;  %p2813_p7 = por %p2812_p0, %p2811_p5 }
  0x8b   : > { %400 = vmatpush.msra.mxu0 %v3144_v37  ;;  %722 = vmatpush.msra.mxu2 %v3163_v47  ;;  %v559_v62 = vsub.f32 %v3159_v46, %v4599_v54  ;;  %v566_v6 = vand.u32 4294901760, %v565_v63  ;;  %v3253_v26 = vand.u32 4294901760, %v353_v17  ;;  %v3256_v27 = vsub.f32 %v357_v4, %v3230_v14  ;;  %v376_v4 = vld [vmem:[%s3102_s6 + $0xe8] sm:$0xff] }
  0x8c   : > { %851 = vmatpush.msra.mxu3 %v3144_v37  ;;  %v590_v29 = vand.u32 4294901760, %v589_v15  ;;  %v3262_v30 = vsub.f32 %v355_v9, %v3237_v16  ;;  %v601_v32 = vsub.f32 %v3218_v8, %v4587_v19  ;;  %v3269_v33 = vand.u32 4294901760, %v351_v23  ;;  %p2809_p1 = pneg %p2808_p13 }
  0x8d   : > { %402 = vmatpush.msra.mxu0 %v3149_v41  ;;  %v560_v5 = vand.u32 4294901760, %v559_v62  ;;  %725 = vmatpush.msra.mxu2 %v3166_v48  ;;  %v4584_v34 = vand.u32 4294901760, %v3243_v20  ;;  %v3272_v38 = vand.u32 4294901760, %v379_v24  ;;  %v596_v39 = vand.u32 4294901760, %v595_v21 }
  0x8e   : > { %853 = vmatpush.msra.mxu3 %v3149_v41  ;;  %v607_v40 = vsub.f32 %v3224_v11, %v4585_v22  ;;  %v3279_v44 = vand.u32 4294901760, %v349_v28  ;;  %v4582_v50 = vand.u32 4294901760, %v3256_v27  ;;  %v3285_v58 = vsub.f32 %v353_v17, %v3253_v26  ;;  %p2814_p8 = pnand %p2813_p7, %p2809_p1 }
  0x8f   : > { %404 = vmatpush.msra.mxu0 %v3151_v42  ;;  %561 = vmatpush.msra.mxu1 %v560_v5  ;;  %v3288_v62 = vsub.f32 %v379_v24, %v3272_v38  ;;  %v3290_v63 = vand.u32 4294901760, %v378_v31  ;;  %v4583_v5 = vand.u32 4294901760, %v3262_v30  ;;  %v613_v7 = vsub.f32 %v3243_v20, %v4584_v34 }
  0x90   : > { %728 = vmatpush.msra.mxu2 %v3172_v51  ;;  %855 = vmatpush.msra.mxu3 %v3151_v42  ;;  %v3300_v9 = vand.u32 4294901760, %v347_v45  ;;  %v608_v13 = vand.u32 4294901760, %v607_v40  ;;  %v3310_v17 = vand.u32 4294901760, %v380_v0  ;;  %v619_v21 = vsub.f32 %v3256_v27, %v4582_v50 }
  0x91   : > { %406 = vmatpush.msra.mxu0 %v3153_v43  ;;  %567 = vmatpush.msra.mxu1 %v566_v6  ;;  %4666 = vst [vmem:[#allocation20_spill] sm:$0xff] %v3288_v62  ;;  %v602_v6 = vand.u32 4294901760, %v601_v32  ;;  %v3308_v15 = vand.u32 4294901760, %v3288_v62  ;;  %v3320_v24 = vsub.f32 %v349_v28, %v3279_v44  ;;  %v625_v32 = vsub.f32 %v3262_v30, %v4583_v5 }
  0x92   : > { %731 = vmatpush.msra.mxu2 %v3175_v52  ;;  %857 = vmatpush.msra.mxu3 %v3153_v43  ;;  %v3334_v28 = vsub.f32 %v347_v45, %v3300_v9  ;;  %v3344_v5 = vsub.f32 %v380_v0, %v3310_v17  ;;  %v620_v45 = vand.u32 4294901760, %v619_v21 }
  0x93   : > { %408 = vmatpush.msra.mxu0 %v3168_v49  ;;  %573 = vmatpush.msra.mxu1 %v572_v12  ;;  %v3303_v12 = vsub.f32 %v351_v23, %v3269_v33  ;;  %4667 = vst [vmem:[#allocation21_spill] sm:$0xff] %v3308_v15  ;;  %v4586_v23 = vand.u32 4294901760, %v3285_v58  ;;  %v430_v50 = vsub.f32 %v3288_v62, %v3308_v15  ;;  %v4593_v34 = vand.u32 4294901760, %v3320_v24 }
  0x94   : > { %734 = vmatpush.msra.mxu2 %v3178_v53  ;;  %859 = vmatpush.msra.mxu3 %v3168_v49  ;;  %4668 = vst [vmem:[#allocation22_spill] sm:$0xff] %v3344_v5  ;;  %v626_v0 = vand.u32 4294901760, %v625_v32  ;;  %v4595_v21 = vand.u32 4294901760, %v3334_v28  ;;  %v3370_v32 = vand.u32 4294901760, %v3344_v5 }
  0x95   : > { %410 = vmatpush.msra.mxu0 %v3185_v57  ;;  %579 = vmatpush.msra.mxu1 %v578_v18  ;;  %v3312_v18 = vand.u32 4294901760, %v376_v4  ;;  %v4590_v40 = vand.u32 4294901760, %v3303_v12  ;;  %v3367_v3 = vand.u32 4294901760, %v430_v50  ;;  %v643_v59 = vsub.f32 %v3320_v24, %v4593_v34 }
  0x96   : > { %737 = vmatpush.msra.mxu2 %v3193_v61  ;;  %861 = vmatpush.msra.mxu3 %v3185_v57  ;;  %4669 = vst [vmem:[#allocation23_spill] sm:$0xff] %v3370_v32 }
  0x97   : > { %412 = vmatpush.msra.mxu0 %v3190_v60  ;;  %585 = vmatpush.msra.mxu1 %v584_v25  ;;  %v3323_v25 = vsub.f32 %v378_v31, %v3290_v63  ;;  %v3337_v31 = vsub.f32 %v376_v4, %v3312_v18  ;;  %v631_v4 = vsub.f32 %v3285_v58, %v4586_v23 }
  0x98   : > { %740 = vmatpush.msra.mxu2 %v3218_v8  ;;  %863 = vmatpush.msra.mxu3 %v3190_v60 }
  0x99   : > { %414 = vmatpush.msra.mxu0 %v3208_v2  ;;  %591 = vmatpush.msra.mxu1 %v590_v29  ;;  %v374_v29 = vld [vmem:[%s3102_s6 + $0xd8] sm:$0xff]  ;;  %v4594_v22 = vand.u32 4294901760, %v3323_v25  ;;  %v4597_v23 = vand.u32 4294901760, %v3337_v31  ;;  %v632_v1 = vand.u32 4294901760, %v631_v4  ;;  %v649_v4 = vsub.f32 %v3334_v28, %v4595_v21 }
  0x9a   : > { %743 = vmatpush.msra.mxu2 %v3224_v11  ;;  %865 = vmatpush.msra.mxu3 %v3208_v2  ;;  %v644_v21 = vand.u32 4294901760, %v643_v59 }
  0x9b   : > { %416 = vmatpush.msra.mxu0 %v3230_v14  ;;  %597 = vmatpush.msra.mxu1 %v596_v39  ;;  %v614_v39 = vand.u32 4294901760, %v613_v7  ;;  %v3346_v7 = vand.u32 4294901760, %v374_v29  ;;  %v1365_v50 = vsub.f32 %v3323_v25, %v4594_v22  ;;  %v1371_v34 = vsub.f32 %v3337_v31, %v4597_v23 }
  0x9c   : > { %746 = vmatpush.msra.mxu2 %v3243_v20  ;;  %867 = vmatpush.msra.mxu3 %v3230_v14  ;;  %v650_v55 = vand.u32 4294901760, %v649_v4 }
  0x9d   : > { %418 = vmatpush.msra.mxu0 %v3237_v16  ;;  %603 = vmatpush.msra.mxu1 %v602_v6  ;;  %v381_v6 = vld [vmem:[#allocation2 + $0x10] sm:$0xff]  ;;  %v1366_v56 = vand.u32 4294901760, %v1365_v50 }
  0x9e   : > { %749 = vmatpush.msra.mxu2 %v3256_v27  ;;  %869 = vmatpush.msra.mxu3 %v3237_v16  ;;  %v3362_v19 = vand.u32 4294901760, %v381_v6 }
  0x9f   : > { %420 = vmatpush.msra.mxu0 %v3253_v26  ;;  %609 = vmatpush.msra.mxu1 %v608_v13  ;;  %v637_v13 = vsub.f32 %v3303_v12, %v4590_v40  ;;  %v3375_v40 = vand.u32 4294901760, %v372_v10 }
  0xa0   : > { %752 = vmatpush.msra.mxu2 %v3262_v30  ;;  %871 = vmatpush.msra.mxu3 %v3253_v26  ;;  %v3401_v22 = vsub.f32 %v381_v6, %v3362_v19  ;;  %v1372_v6 = vand.u32 4294901760, %v1371_v34  ;;  %v4674_v34 = vand.u32 4294901760, %v3163_v47 }
  0xa1   : > { %422 = vmatpush.msra.mxu0 %v3269_v33  ;;  %615 = vmatpush.msra.mxu1 %v614_v39  ;;  %v3373_v39 = vsub.f32 %v374_v29, %v3346_v7  ;;  %v3387_v29 = vsub.f32 %v372_v10, %v3375_v40  ;;  %v438_v10 = vsub.f32 %v3344_v5, %v3370_v32 }
  0xa2   : > { %755 = vmatpush.msra.mxu2 %v3285_v58  ;;  %873 = vmatpush.msra.mxu3 %v3269_v33  ;;  %4670 = vst [vmem:[#allocation24_spill] sm:$0xff] %v3401_v22  ;;  %v3418_v50 = vand.u32 4294901760, %v3401_v22 }
  0xa3   : > { %424 = vmatpush.msra.mxu0 %v3279_v44  ;;  %621 = vmatpush.msra.mxu1 %v620_v45  ;;  %v638_v45 = vand.u32 4294901760, %v637_v13  ;;  %v382_v13 = vld [vmem:[#allocation2 + $0x18] sm:$0xff]  ;;  %v3415_v59 = vand.u32 4294901760, %v438_v10  ;;  %v4673_v23 = vand.u32 4294901760, %v3373_v39 }
  0xa4   : > { %758 = vmatpush.msra.mxu2 %v3303_v12  ;;  %875 = vmatpush.msra.mxu3 %v3279_v44  ;;  %v3409_v54 = vand.u32 4294901760, %v382_v13  ;;  %4672 = vst [vmem:[#allocation25_spill] sm:$0xff] %v3418_v50 }
  0xa5   : > { %426 = vmatpush.msra.mxu0 %v3300_v9  ;;  %627 = vmatpush.msra.mxu1 %v626_v0  ;;  %v370_v0 = vld [vmem:[%s3102_s6 + $0xb8] sm:$0xff] }
  0xa6   : > { %432 = vmatmul.f32.vlgmr.msra.gmra.mxu0 %v3367_v3  ;;  %761 = vmatpush.msra.mxu2 %v3320_v24  ;;  %v3439_v47 = vsub.f32 %v382_v13, %v3409_v54  ;;  %v368_v13 = vld [vmem:[%s3102_s6 + $0xa8] sm:$0xff] }
  0xa7   : > { %633 = vmatpush.msra.mxu1 %v632_v1  ;;  %877 = vmatpush.msra.mxu3 %v3300_v9  ;;  %v4671_v1 = vand.u32 4294901760, %v3159_v46  ;;  %v4675_v46 = vand.u32 4294901760, %v3387_v29 }
  0xa8   : > { %764 = vmatpush.msra.mxu2 %v3334_v28  ;;  %881 = vmatmul.f32.vlgmr.msra.gmra.mxu3 %v3308_v15  ;;  %v3423_v15 = vand.u32 4294901760, %v370_v0  ;;  %4676 = vst [vmem:[#allocation26_spill] sm:$0xff] %v3439_v47 }
  0xa9   : > { %639 = vmatpush.msra.mxu1 %v638_v45  ;;  %767 = vmatmul.f32.vlgmr.msra.gmra.mxu2 %v3288_v62  ;;  %v1377_v45 = vsub.f32 %v3373_v39, %v4673_v23  ;;  %v1383_v4 = vsub.f32 %v3387_v29, %v4675_v46  ;;  %v4679_v46 = vand.u32 4294901760, %v3172_v51  ;;  %v350_v62 = vld [vmem:[%s3102_s6 + $0x18] sm:$0xff] }
  0xaa   : > { %1202 = vmatpush.msrb.mxu2 %v3290_v63  ;;  %978 = vmatpush.msrb.mxu0 %v4671_v1  ;;  %v3432_v10 = vsub.f32 %v370_v0, %v3423_v15  ;;  %v4677_v0 = vand.u32 4294901760, %v3166_v48 }
  0xab   : > { %645 = vmatpush.msra.mxu1 %v644_v21  ;;  %1367 = vmatpush.msrb.mxu3 %v1366_v56  ;;  %v446_v56 = vsub.f32 %v3401_v22, %v3418_v50  ;;  %v1378_v23 = vand.u32 4294901760, %v1377_v45 }
  0xac   : > { %1204 = vmatpush.msrb.mxu2 %v3312_v18  ;;  %982 = vmatpush.msrb.mxu0 %v4674_v34  ;;  %v4606_v21 = vand.u32 4294901760, %v3432_v10  ;;  %v3461_v34 = vand.u32 4294901760, %v368_v13 }
  0xad   : > { %651 = vmatpush.msra.mxu1 %v650_v55  ;;  %1373 = vmatpush.msrb.mxu3 %v1372_v6  ;;  %v383_v55 = vld [vmem:[#allocation2 + $0x20] sm:$0xff]  ;;  %v1384_v6 = vand.u32 4294901760, %v1383_v4  ;;  %v3453_v45 = vand.u32 4294901760, %v446_v56  ;;  %v4680_v56 = vand.u32 4294901760, %v3175_v52 }
  0xae   : > { %440 = vmatmul.f32.gmra.mxu0 %v3415_v59  ;;  %653 = vmatmul.f32.vlgmr.msra.gmra.mxu1 %v3272_v38  ;;  %v1389_v1 = vsub.f32 %v3432_v10, %v4606_v21  ;;  %v3459_v48 = vand.u32 4294901760, %v383_v55 }
  0xaf   : > { %1105 = vmatpush.msrb.mxu1 %v3140_v35  ;;  %1206 = vmatpush.msrb.mxu2 %v3346_v7  ;;  %v3456_v35 = vand.u32 4294901760, %v3439_v47 }
  0xb0   : > { %887 = vmatmul.f32.gmra.mxu3 %v3370_v32  ;;  %986 = vmatpush.msrb.mxu0 %v4677_v0  ;;  %v1390_v4 = vand.u32 4294901760, %v1389_v1  ;;  %v3478_v51 = vsub.f32 %v383_v55, %v3459_v48  ;;  %v4682_v55 = vand.u32 4294901760, %v3178_v53 }
  0xb1   : > { %772 = vmatmul.f32.gmra.mxu2 %v3344_v5  ;;  %1107 = vmatpush.msrb.mxu1 %v3142_v36  ;;  %4678 = vst [vmem:[#allocation27_spill] sm:$0xff] %v3456_v35  ;;  %v3468_v36 = vsub.f32 %v368_v13, %v3461_v34 }
  0xb2   : > { %1379 = vmatpush.msrb.mxu3 %v1378_v23  ;;  %1208 = vmatpush.msrb.mxu2 %v3375_v40  ;;  %4681 = vst [vmem:[#allocation28_spill] sm:$0xff] %v3478_v51  ;;  %v384_v23 = vld [vmem:[#allocation2 + $0x28] sm:$0xff] }
  0xb3   : > { %1109 = vmatpush.msrb.mxu1 %v3144_v37  ;;  %990 = vmatpush.msrb.mxu0 %v4679_v46  ;;  %v454_v37 = vsub.f32 %v3439_v47, %v3456_v35  ;;  %v4605_v0 = vand.u32 4294901760, %v3468_v36  ;;  %v3488_v52 = vand.u32 4294901760, %v384_v23 }
  0xb4   : > { %1385 = vmatpush.msrb.mxu3 %v1384_v6  ;;  %1210 = vmatpush.msrb.mxu2 %v3423_v15  ;;  %v366_v6 = vld [vmem:[%s3102_s6 + $0x98] sm:$0xff] }
  0xb5   : > { %1111 = vmatpush.msrb.mxu1 %v3149_v41  ;;  %994 = vmatpush.msrb.mxu0 %v4680_v56  ;;  %v1395_v41 = vsub.f32 %v3468_v36, %v4605_v0  ;;  %v3493_v1 = vand.u32 4294901760, %v454_v37  ;;  %v3499_v46 = vand.u32 4294901760, %v366_v6  ;;  %v3508_v56 = vsub.f32 %v384_v23, %v3488_v52  ;;  %v389_v0 = vld [vmem:[#allocation2 + $0x50] sm:$0xff] }
  0xb6   : > { %448 = vmatmul.f32.gmra.mxu0 %v3453_v45  ;;  %657 = vmatmul.f32.gmra.mxu1 %v3310_v17  ;;  %v4686_v37 = vand.u32 4294901760, %v3218_v8  ;;  %v4687_v23 = vand.u32 4294901760, %v3224_v11 }
  0xb7   : > { %1391 = vmatpush.msrb.mxu3 %v1390_v4  ;;  %1113 = vmatpush.msrb.mxu1 %v3151_v42  ;;  %v3496_v42 = vand.u32 4294901760, %v3478_v51  ;;  %v1396_v13 = vand.u32 4294901760, %v1395_v41  ;;  %v4684_v4 = vand.u32 4294901760, %v3193_v61  ;;  %v3505_v53 = vsub.f32 %v366_v6, %v3499_v46  ;;  %4685 = vst [vmem:[#allocation30_spill] sm:$0xff] %v3508_v56  ;;  %v385_v41 = vld [vmem:[#allocation2 + $0x30] sm:$0xff] }
  0xb8   : > { %893 = vmatmul.f32.gmra.mxu3 %v3418_v50  ;;  %1212 = vmatpush.msrb.mxu2 %v3461_v34  ;;  %v3527_v8 = vand.u32 4294901760, %v3508_v56 }
  0xb9   : > { %777 = vmatmul.f32.gmra.mxu2 %v3401_v22  ;;  %998 = vmatpush.msrb.mxu0 %v4682_v55  ;;  %4683 = vst [vmem:[#allocation29_spill] sm:$0xff] %v3496_v42  ;;  %v4603_v61 = vand.u32 4294901760, %v3505_v53  ;;  %v364_v55 = vld [vmem:[%s3102_s6 + $0x88] sm:$0xff] }
  0xba   : > { %1115 = vmatpush.msrb.mxu1 %v3153_v43  ;;  %1397 = vmatpush.msrb.mxu3 %v1396_v13  ;;  %v462_v43 = vsub.f32 %v3478_v51, %v3496_v42  ;;  %4688 = vst [vmem:[#allocation31_spill] sm:$0xff] %v3527_v8  ;;  %v3535_v13 = vand.u32 4294901760, %v364_v55 }
  0xbb   : > { %1002 = vmatpush.msrb.mxu0 %v4684_v4  ;;  %1214 = vmatpush.msrb.mxu2 %v3499_v46  ;;  %v4689_v4 = vand.u32 4294901760, %v3243_v20 }
  0xbc   : > { %1117 = vmatpush.msrb.mxu1 %v3168_v49  ;;  %v1401_v49 = vsub.f32 %v3505_v53, %v4603_v61  ;;  %v3531_v6 = vand.u32 4294901760, %v462_v43  ;;  %v4690_v43 = vand.u32 4294901760, %v3256_v27 }
  0xbd   : > { %1006 = vmatpush.msrb.mxu0 %v4686_v37  ;;  %1216 = vmatpush.msrb.mxu2 %v3535_v13  ;;  %v3542_v37 = vsub.f32 %v364_v55, %v3535_v13  ;;  %v4693_v55 = vand.u32 4294901760, %v3285_v58  ;;  %v4696_v58 = vand.u32 4294901760, %v3320_v24 }
  0xbe   : > { %456 = vmatmul.f32.gmra.mxu0 %v3493_v1  ;;  %661 = vmatmul.f32.gmra.mxu1 %v3362_v19  ;;  %v1402_v11 = vand.u32 4294901760, %v1401_v49  ;;  %v4692_v49 = vand.u32 4294901760, %v3262_v30 }
  0xbf   : > { %1119 = vmatpush.msrb.mxu1 %v3185_v57  ;;  %1010 = vmatpush.msrb.mxu0 %v4687_v23  ;;  %v3533_v57 = vand.u32 4294901760, %v385_v41  ;;  %v4602_v20 = vand.u32 4294901760, %v3542_v37  ;;  %v386_v23 = vld [vmem:[#allocation2 + $0x38] sm:$0xff] }
  0xc0   : > { %899 = vmatmul.f32.gmra.mxu3 %v3456_v35  ;;  %v3571_v30 = vand.u32 4294901760, %v386_v23 }
  0xc1   : > { %782 = vmatmul.f32.gmra.mxu2 %v3439_v47  ;;  %1121 = vmatpush.msrb.mxu1 %v3190_v60  ;;  %v470_v60 = vsub.f32 %v3508_v56, %v3527_v8 }
  0xc2   : > { %1014 = vmatpush.msrb.mxu0 %v4689_v4  ;;  %1403 = vmatpush.msrb.mxu3 %v1402_v11 }
  0xc3   : > { %1123 = vmatpush.msrb.mxu1 %v3208_v2  ;;  %v3552_v2 = vsub.f32 %v385_v41, %v3533_v57  ;;  %v3563_v27 = vand.u32 4294901760, %v470_v60  ;;  %v362_v41 = vld [vmem:[%s3102_s6 + $0x78] sm:$0xff] }
  0xc4   : > { %1018 = vmatpush.msrb.mxu0 %v4690_v43  ;;  %v3573_v4 = vand.u32 4294901760, %v362_v41  ;;  %v4695_v43 = vand.u32 4294901760, %v3303_v12  ;;  %v3590_v12 = vsub.f32 %v386_v23, %v3571_v30 }
  0xc5   : > { %1125 = vmatpush.msrb.mxu1 %v3230_v14  ;;  %4691 = vst [vmem:[#allocation32_spill] sm:$0xff] %v3552_v2  ;;  %v1407_v14 = vsub.f32 %v3542_v37, %v4602_v20  ;;  %v3569_v11 = vand.u32 4294901760, %v3552_v2 }
  0xc6   : > { %464 = vmatmul.f32.gmra.mxu0 %v3531_v6  ;;  %665 = vmatmul.f32.gmra.mxu1 %v3409_v54  ;;  %v3580_v60 = vsub.f32 %v362_v41, %v3573_v4  ;;  %4697 = vst [vmem:[#allocation34_spill] sm:$0xff] %v3590_v12  ;;  %v360_v41 = vld [vmem:[%s3102_s6 + $0x68] sm:$0xff] }
  0xc7   : > { %1022 = vmatpush.msrb.mxu0 %v4692_v49  ;;  %1127 = vmatpush.msrb.mxu1 %v3237_v16  ;;  %4694 = vst [vmem:[#allocation33_spill] sm:$0xff] %v3569_v11  ;;  %v1408_v16 = vand.u32 4294901760, %v1407_v14  ;;  %v387_v49 = vld [vmem:[#allocation2 + $0x40] sm:$0xff] }
  0xc8   : > { %905 = vmatmul.f32.gmra.mxu3 %v3496_v42  ;;  %1218 = vmatpush.msrb.mxu2 %v3573_v4  ;;  %v4601_v14 = vand.u32 4294901760, %v3580_v60  ;;  %v3602_v23 = vand.u32 4294901760, %v387_v49 }
  0xc9   : > { %787 = vmatmul.f32.gmra.mxu2 %v3478_v51  ;;  %1026 = vmatpush.msrb.mxu0 %v4693_v55 }
  0xca   : > { %1129 = vmatpush.msrb.mxu1 %v3253_v26  ;;  %1409 = vmatpush.msrb.mxu3 %v1408_v16  ;;  %v478_v26 = vsub.f32 %v3552_v2, %v3569_v11  ;;  %v1413_v24 = vsub.f32 %v3580_v60, %v4601_v14  ;;  %4699 = vst [vmem:[#allocation35_spill] sm:$0xff] %v3602_v23  ;;  %v3611_v16 = vand.u32 4294901760, %v360_v41 }
  0xcb   : > { %1030 = vmatpush.msrb.mxu0 %v4695_v43 }
  0xcc   : > { %1131 = vmatpush.msrb.mxu1 %v3269_v33  ;;  %v4698_v33 = vand.u32 4294901760, %v3334_v28  ;;  %v3606_v55 = vand.u32 4294901760, %v478_v26  ;;  %v1414_v28 = vand.u32 4294901760, %v1413_v24  ;;  %1220 = vmatpush.msrb.mxu2 %v3611_v16  ;;  %v3617_v43 = vsub.f32 %v360_v41, %v3611_v16  ;;  %v358_v41 = vld [vmem:[%s3102_s6 + $0x58] sm:$0xff] }
  0xcd   : > { %1034 = vmatpush.msrb.mxu0 %v4696_v58  ;;  %v3645_v61 = vand.u32 4294901760, %v358_v41 }
  0xce   : > { %472 = vmatmul.f32.gmra.mxu0 %v3563_v27  ;;  %669 = vmatmul.f32.gmra.mxu1 %v3459_v48  ;;  %v4604_v26 = vand.u32 4294901760, %v3617_v43 }
  0xcf   : > { %1133 = vmatpush.msrb.mxu1 %v3279_v44  ;;  %1038 = vmatpush.msrb.mxu0 %v4698_v33  ;;  %v3609_v44 = vand.u32 4294901760, %v3590_v12  ;;  %v388_v33 = vld [vmem:[#allocation2 + $0x48] sm:$0xff] }
  0xd0   : > { %911 = vmatmul.f32.gmra.mxu3 %v3527_v8  ;;  %v3643_v14 = vand.u32 4294901760, %v388_v33  ;;  %1222 = vmatpush.msrb.mxu2 %v3645_v61  ;;  %v3677_v8 = vand.u32 4294901760, %v389_v0 }
  0xd1   : > { %1525 = vmatpush.msra.mxu0 %v3323_v25  ;;  %792 = vmatmul.f32.gmra.mxu2 %v3508_v56  ;;  %4700 = vst [vmem:[#allocation36_spill] sm:$0xff] %v3609_v44  ;;  %v486_v58 = vsub.f32 %v3590_v12, %v3609_v44  ;;  %v354_v56 = vld [vmem:[%s3102_s6 + $0x38] sm:$0xff] }
  0xd2   : > { %1135 = vmatpush.msrb.mxu1 %v3300_v9  ;;  %1415 = vmatpush.msrb.mxu3 %v1414_v28  ;;  %v3620_v9 = vsub.f32 %v387_v49, %v3602_v23  ;;  %v1419_v49 = vsub.f32 %v3617_v43, %v4604_v26  ;;  %4704 = vst [vmem:[#allocation40_spill] sm:$0xff] %v3643_v14  ;;  %v3713_v50 = vand.u32 4294901760, %v354_v56 }
  0xd3   : > { %1528 = vmatpush.msra.mxu0 %v3337_v31  ;;  %v3641_v28 = vand.u32 4294901760, %v486_v58  ;;  %v3651_v26 = vsub.f32 %v358_v41, %v3645_v61  ;;  %4708 = vst [vmem:[#allocation44_spill] sm:$0xff] %v3677_v8 }
  0xd4   : > { %1653 = vmatpush.msra.mxu1 %v3290_v63  ;;  %4701 = vst [vmem:[#allocation37_spill] sm:$0xff] %v3620_v9  ;;  %v3637_v24 = vand.u32 4294901760, %v3620_v9  ;;  %v1420_v20 = vand.u32 4294901760, %v1419_v49  ;;  %v3660_v49 = vsub.f32 %v388_v33, %v3643_v14 }
  0xd5   : > { %1531 = vmatpush.msra.mxu0 %v3373_v39  ;;  %4703 = vst [vmem:[#allocation39_spill] sm:$0xff] %v3641_v28 }
  0xd6   : > { %1655 = vmatpush.msra.mxu1 %v3312_v18  ;;  %480 = vmatmul.f32.gmra.mxu0 %v3606_v55  ;;  %4702 = vst [vmem:[#allocation38_spill] sm:$0xff] %v3637_v24  ;;  %v494_v58 = vsub.f32 %v3620_v9, %v3637_v24  ;;  %v3675_v33 = vand.u32 4294901760, %v3660_v49 }
  0xd7   : > { %673 = vmatmul.f32.gmra.mxu1 %v3488_v52  ;;  %1534 = vmatpush.msra.mxu0 %v3387_v29  ;;  %4705 = vst [vmem:[#allocation41_spill] sm:$0xff] %v3660_v49 }
  0xd8   : > { %1657 = vmatpush.msra.mxu1 %v3346_v7  ;;  %917 = vmatmul.f32.gmra.mxu3 %v3569_v11  ;;  %v3670_v21 = vand.u32 4294901760, %v494_v58  ;;  %v356_v11 = vld [vmem:[%s3102_s6 + $0x48] sm:$0xff]  ;;  %4707 = vst [vmem:[#allocation43_spill] sm:$0xff] %v3675_v33 }
  0xd9   : > { %797 = vmatmul.f32.gmra.mxu2 %v3552_v2  ;;  %1537 = vmatpush.msra.mxu0 %v3432_v10  ;;  %v3679_v42 = vand.u32 4294901760, %v356_v11 }
  0xda   : > { %1659 = vmatpush.msra.mxu1 %v3375_v40  ;;  %1421 = vmatpush.msrb.mxu3 %v1420_v20  ;;  %v4611_v20 = vand.u32 4294901760, %v3651_v26  ;;  %4706 = vst [vmem:[#allocation42_spill] sm:$0xff] %v3670_v21 }
  0xdb   : > { %1540 = vmatpush.msra.mxu0 %v3468_v36  ;;  %1224 = vmatpush.msrb.mxu2 %v3679_v42  ;;  %v3685_v58 = vsub.f32 %v356_v11, %v3679_v42 }
  0xdc   : > { %1661 = vmatpush.msra.mxu1 %v3423_v15  ;;  %v1425_v41 = vsub.f32 %v3651_v26, %v4611_v20  ;;  %v3694_v20 = vsub.f32 %v389_v0, %v3677_v8 }
  0xdd   : > { %1543 = vmatpush.msra.mxu0 %v3505_v53  ;;  %1226 = vmatpush.msrb.mxu2 %v3713_v50 }
  0xde   : > { %1663 = vmatpush.msra.mxu1 %v3461_v34  ;;  %488 = vmatmul.f32.gmra.mxu0 %v3641_v28  ;;  %v1426_v2 = vand.u32 4294901760, %v1425_v41  ;;  %v502_v41 = vsub.f32 %v3660_v49, %v3675_v33  ;;  %4709 = vst [vmem:[#allocation45_spill] sm:$0xff] %v3694_v20  ;;  %v3711_v35 = vand.u32 4294901760, %v3694_v20 }
  0xdf   : > { %677 = vmatmul.f32.gmra.mxu1 %v3533_v57  ;;  %1546 = vmatpush.msra.mxu0 %v3542_v37 }
  0xe0   : > { %1665 = vmatpush.msra.mxu1 %v3499_v46  ;;  %923 = vmatmul.f32.gmra.mxu3 %v3609_v44  ;;  %v4618_v44 = vand.u32 4294901760, %v3685_v58  ;;  %v3708_v0 = vand.u32 4294901760, %v502_v41  ;;  %4711 = vst [vmem:[#allocation47_spill] sm:$0xff] %v3711_v35 }
  0xe1   : > { %802 = vmatmul.f32.gmra.mxu2 %v3590_v12  ;;  %1549 = vmatpush.msra.mxu0 %v3580_v60 }
  0xe2   : > { %1667 = vmatpush.msra.mxu1 %v3535_v13  ;;  %1427 = vmatpush.msrb.mxu3 %v1426_v2  ;;  %v390_v2 = vld [vmem:[#allocation2 + $0x58] sm:$0xff]  ;;  %v1431_v11 = vsub.f32 %v3685_v58, %v4618_v44  ;;  %4710 = vst [vmem:[#allocation46_spill] sm:$0xff] %v3708_v0  ;;  %v3719_v44 = vsub.f32 %v354_v56, %v3713_v50 }
  0xe3   : > { %1552 = vmatpush.msra.mxu0 %v3617_v43  ;;  %v3704_v12 = vand.u32 4294901760, %v390_v2 }
  0xe4   : > { %1669 = vmatpush.msra.mxu1 %v3573_v4  ;;  %v1432_v51 = vand.u32 4294901760, %v1431_v11  ;;  %v510_v11 = vsub.f32 %v3694_v20, %v3711_v35 }
  0xe5   : > { %1555 = vmatpush.msra.mxu0 %v3651_v26  ;;  %v3722_v41 = vsub.f32 %v390_v2, %v3704_v12 }
  0xe6   : > { %496 = vmatmul.f32.gmra.mxu0 %v3670_v21  ;;  %1671 = vmatpush.msra.mxu1 %v3611_v16  ;;  %v3740_v47 = vand.u32 4294901760, %v510_v11 }
  0xe7   : > { %681 = vmatmul.f32.gmra.mxu1 %v3571_v30  ;;  %1558 = vmatpush.msra.mxu0 %v3685_v58  ;;  %4712 = vst [vmem:[#allocation48_spill] sm:$0xff] %v3722_v41  ;;  %v3737_v2 = vand.u32 4294901760, %v3722_v41 }
  0xe8   : > { %929 = vmatmul.f32.gmra.mxu3 %v3637_v24  ;;  %1673 = vmatpush.msra.mxu1 %v3645_v61  ;;  %v4626_v24 = vand.u32 4294901760, %v3719_v44  ;;  %4714 = vst [vmem:[#allocation50_spill] sm:$0xff] %v3740_v47 }
  0xe9   : > { %807 = vmatmul.f32.gmra.mxu2 %v3620_v9  ;;  %1433 = vmatpush.msrb.mxu3 %v1432_v51  ;;  %v391_v51 = vld [vmem:[#allocation2 + $0x60] sm:$0xff]  ;;  %4713 = vst [vmem:[#allocation49_spill] sm:$0xff] %v3737_v2  ;;  %v352_v9 = vld [vmem:[%s3102_s6 + $0x28] sm:$0xff] }
  0xea   : > { %1675 = vmatpush.msra.mxu1 %v3679_v42  ;;  %1561 = vmatpush.msra.mxu0 %v3719_v44  ;;  %v1437_v56 = vsub.f32 %v3719_v44, %v4626_v24  ;;  %v3742_v32 = vand.u32 4294901760, %v391_v51  ;;  %v3744_v5 = vand.u32 4294901760, %v352_v9  ;;  %v518_v24 = vsub.f32 %v3722_v41, %v3737_v2 }
  0xec   : > { %1677 = vmatpush.msra.mxu1 %v3713_v50  ;;  %v1438_v22 = vand.u32 4294901760, %v1437_v56  ;;  %1228 = vmatpush.msrb.mxu2 %v3744_v5  ;;  %v3756_v11 = vsub.f32 %v391_v51, %v3742_v32 }
  0xee   : > { %504 = vmatmul.f32.gmra.mxu0 %v3708_v0  ;;  %1439 = vmatpush.msrb.mxu3 %v1438_v22  ;;  %v392_v22 = vld [vmem:[#allocation2 + $0x68] sm:$0xff]  ;;  %v3769_v51 = vand.u32 4294901760, %v3756_v11 }
  0xef   : > { %685 = vmatmul.f32.gmra.mxu1 %v3602_v23 }
  0xf0   : > { %935 = vmatmul.f32.gmra.mxu3 %v3675_v33  ;;  %v3748_v33 = vsub.f32 %v352_v9, %v3744_v5  ;;  %1679 = vmatpush.msra.mxu1 %v3744_v5 }
  0xf1   : > { %812 = vmatmul.f32.gmra.mxu2 %v3660_v49  ;;  %v3765_v49 = vand.u32 4294901760, %v518_v24  ;;  %v526_v24 = vsub.f32 %v3756_v11, %v3769_v51 }
  0xf2   : > { %v4634_v56 = vand.u32 4294901760, %v3748_v33  ;;  %1564 = vmatpush.msra.mxu0 %v3748_v33 }
  0xf3   : > { %4715 = vst [vmem:[#allocation51_spill] sm:$0xff] %v3765_v49 }
  0xf4   : > { %v1443_v9 = vsub.f32 %v3748_v33, %v4634_v56 }
  0xf6   : > { %512 = vmatmul.f32.gmra.mxu0 %v3740_v47  ;;  %v3771_v47 = vand.u32 4294901760, %v392_v22  ;;  %v1444_v0 = vand.u32 4294901760, %v1443_v9 }
  0xf7   : > { %689 = vmatmul.f32.gmra.mxu1 %v3643_v14  ;;  %v3773_v14 = vand.u32 4294901760, %v350_v62 }
  0xf8   : > { %941 = vmatmul.f32.gmra.mxu3 %v3711_v35  ;;  %v3785_v56 = vsub.f32 %v392_v22, %v3771_v47  ;;  %v3801_v22 = vand.u32 4294901760, %v526_v24 }
  0xf9   : > { %817 = vmatmul.f32.gmra.mxu2 %v3694_v20  ;;  %1445 = vmatpush.msrb.mxu3 %v1444_v0  ;;  %v3777_v35 = vsub.f32 %v350_v62, %v3773_v14  ;;  %v348_v0 = vld [vmem:[%s3102_s6 + $0x8] sm:$0xff]  ;;  %v393_v20 = vld [vmem:[#allocation2 + $0x70] sm:$0xff] }
  0xfa   : > { %1230 = vmatpush.msrb.mxu2 %v3773_v14  ;;  %1681 = vmatpush.msra.mxu1 %v3773_v14  ;;  %v3789_v21 = vand.u32 4294901760, %v348_v0  ;;  %v3806_v23 = vand.u32 4294901760, %v393_v20 }
  0xfb   : > { %v4644_v9 = vand.u32 4294901760, %v3777_v35  ;;  %1567 = vmatpush.msra.mxu0 %v3777_v35 }
  0xfc   : > { %1683 = vmatpush.msra.mxu1 %v3789_v21  ;;  %1232 = vmatpush.msrb.mxu2 %v3789_v21 }
  0xfd   : > { %v1449_v62 = vsub.f32 %v3777_v35, %v4644_v9  ;;  %v4716_v9 = vand.u32 4294901760, %v3323_v25  ;;  %v3823_v25 = vsub.f32 %v393_v20, %v3806_v23  ;;  %v4719_v20 = vand.u32 4294901760, %v3387_v29 }
  0xfe   : > { %520 = vmatmul.f32.gmra.mxu0 %v3765_v49  ;;  %v3798_v49 = vsub.f32 %v348_v0, %v3789_v21  ;;  %v4717_v0 = vand.u32 4294901760, %v3337_v31 }
  0xff   : > { %693 = vmatmul.f32.gmra.mxu1 %v3677_v8  ;;  %v3804_v8 = vand.u32 4294901760, %v3785_v56  ;;  %v1450_v28 = vand.u32 4294901760, %v1449_v62  ;;  %1784 = vmatpush.msra.mxu2 %v4716_v9  ;;  %v394_v9 = vld [vmem:[#allocation2 + $0x78] sm:$0xff] }
 0x100   : > { %947 = vmatmul.f32.gmra.mxu3 %v3737_v2  ;;  %v4646_v2 = vand.u32 4294901760, %v3798_v49  ;;  %1570 = vmatpush.msra.mxu0 %v3798_v49 }
 0x101   : > { %822 = vmatmul.f32.gmra.mxu2 %v3722_v41  ;;  %1451 = vmatpush.msrb.mxu3 %v1450_v28  ;;  %v534_v62 = vsub.f32 %v3785_v56, %v3804_v8  ;;  %v4718_v28 = vand.u32 4294901760, %v3373_v39  ;;  %v4720_v39 = vand.u32 4294901760, %v3432_v10  ;;  %v4722_v10 = vand.u32 4294901760, %v3505_v53 }
 0x102   : > { %v1455_v24 = vsub.f32 %v3798_v49, %v4646_v2  ;;  %1788 = vmatpush.msra.mxu2 %v4717_v0  ;;  %v3832_v0 = vand.u32 4294901760, %v3823_v25  ;;  %v3834_v2 = vand.u32 4294901760, %v394_v9  ;;  %v4726_v53 = vand.u32 4294901760, %v3651_v26 }
 0x103   : > { %v3829_v31 = vand.u32 4294901760, %v534_v62 }
 0x104   : > { %v1456_v41 = vand.u32 4294901760, %v1455_v24  ;;  %1792 = vmatpush.msra.mxu2 %v4718_v28  ;;  %v3847_v24 = vsub.f32 %v394_v9, %v3834_v2 }
 0x106   : > { %528 = vmatmul.f32.gmra.mxu0 %v3801_v22  ;;  %1457 = vmatpush.msrb.mxu3 %v1456_v41  ;;  %v542_v41 = vsub.f32 %v3823_v25, %v3832_v0  ;;  %v3858_v29 = vand.u32 4294901760, %v3847_v24 }
 0x107   : > { %697 = vmatmul.f32.gmra.mxu1 %v3704_v12  ;;  %1796 = vmatpush.msra.mxu2 %v4719_v20 }
 0x108   : > { %953 = vmatmul.f32.gmra.mxu3 %v3769_v51 }
 0x109   : > { %827 = vmatmul.f32.gmra.mxu2 %v3756_v11  ;;  %1911 = vmatpush.msra.mxu3 %v3290_v63  ;;  %v4721_v63 = vand.u32 4294901760, %v3468_v36  ;;  %v4724_v36 = vand.u32 4294901760, %v3580_v60 }
 0x10a   : > { %1800 = vmatpush.msra.mxu2 %v4720_v39 }
 0x10b   : > { %1913 = vmatpush.msra.mxu3 %v3312_v18  ;;  %v3855_v18 = vand.u32 4294901760, %v542_v41 }
 0x10c   : > { %1804 = vmatpush.msra.mxu2 %v4721_v63 }
 0x10d   : > { %1915 = vmatpush.msra.mxu3 %v3346_v7  ;;  %v4723_v7 = vand.u32 4294901760, %v3542_v37 }
 0x10e   : > { %536 = vmatmul.f32.gmra.mxu0 %v3829_v31  ;;  %1808 = vmatpush.msra.mxu2 %v4722_v10 }
 0x10f   : > { %701 = vmatmul.f32.gmra.mxu1 %v3742_v32  ;;  %1917 = vmatpush.msra.mxu3 %v3375_v40  ;;  %v550_v40 = vsub.f32 %v3847_v24, %v3858_v29 }
 0x110   : > { %959 = vmatmul.f32.gmra.mxu3 %v3804_v8  ;;  %1812 = vmatpush.msra.mxu2 %v4723_v7 }
 0x111   : > { %832 = vmatmul.f32.gmra.mxu2 %v3785_v56  ;;  %1919 = vmatpush.msra.mxu3 %v3423_v15  ;;  %v3876_v15 = vand.u32 4294901760, %v550_v40 }
 0x112   : > { %1816 = vmatpush.msra.mxu2 %v4724_v36 }
 0x113   : > { %1921 = vmatpush.msra.mxu3 %v3461_v34  ;;  %v4725_v34 = vand.u32 4294901760, %v3617_v43 }
 0x115   : > { %1923 = vmatpush.msra.mxu3 %v3499_v46  ;;  %1820 = vmatpush.msra.mxu2 %v4725_v34  ;;  %v4727_v46 = vand.u32 4294901760, %v3685_v58 }
 0x116   : > { %544 = vmatmul.f32.gmra.mxu0 %v3855_v18 }
 0x117   : > { %705 = vmatmul.f32.gmra.mxu1 %v3771_v47  ;;  %1925 = vmatpush.msra.mxu3 %v3535_v13  ;;  %v4728_v13 = vand.u32 4294901760, %v3719_v44 }
 0x118   : > { %965 = vmatmul.f32.gmra.mxu3 %v3832_v0  ;;  %1824 = vmatpush.msra.mxu2 %v4726_v53 }
 0x119   : > { %837 = vmatmul.f32.gmra.mxu2 %v3823_v25  ;;  %1927 = vmatpush.msra.mxu3 %v3573_v4  ;;  %v4729_v4 = vand.u32 4294901760, %v3748_v33 }
 0x11a   : > { %1828 = vmatpush.msra.mxu2 %v4727_v46 }
 0x11b   : > { %1929 = vmatpush.msra.mxu3 %v3611_v16 }
 0x11c   : > { %1832 = vmatpush.msra.mxu2 %v4728_v13 }
 0x11d   : > { %1931 = vmatpush.msra.mxu3 %v3645_v61  ;;  %v4730_v61 = vand.u32 4294901760, %v3777_v35 }
 0x11e   : > { %552 = vmatmul.f32.gmra.mxu0 %v3876_v15  ;;  %1836 = vmatpush.msra.mxu2 %v4729_v4 }
 0x11f   : > { %709 = vmatmul.f32.gmra.mxu1 %v3806_v23  ;;  %1933 = vmatpush.msra.mxu3 %v3679_v42 }
 0x120   : > { %971 = vmatmul.f32.gmra.mxu3 %v3858_v29  ;;  %1840 = vmatpush.msra.mxu2 %v4730_v61 }
 0x121   : > { %842 = vmatmul.f32.gmra.mxu2 %v3847_v24  ;;  %1935 = vmatpush.msra.mxu3 %v3713_v50  ;;  %v4731_v50 = vand.u32 4294901760, %v3798_v49 }
 0x123   : > { %v433_v37 = vpop.f32.mrf.mxu0  ;;  %1937 = vmatpush.msra.mxu3 %v3744_v5  ;;  %1844 = vmatpush.msra.mxu2 %v4731_v50 }
 0x125   : > { %1939 = vmatpush.msra.mxu3 %v3773_v14 }
 0x126   : > { %1040 = vmatmul.f32.vlgmr.msrb.gmra.mxu0 %v3272_v38 }
 0x127   : > { %713 = vmatmul.f32.gmra.mxu1 %v3834_v2  ;;  %1941 = vmatpush.msra.mxu3 %v3789_v21 }
 0x128   : > { %1459 = vmatmul.f32.vlgmr.msrb.gmra.mxu3 %v3272_v38 }
 0x129   : > { %1238 = vmatmul.f32.vlgmr.msrb.gmra.mxu2 %v3367_v3 }
 0x12b   : > { %v441_v42 = vpop.f32.mrf.mxu0  ;;  %v654_v5 = vpop.f32.mrf.mxu1 }
 0x12c   : > { %v655_v60 = vadd.f32 %v654_v5, %v433_v37  ;;  %v768_v44 = vpop.f32.mrf.mxu2  ;;  %v882_v16 = vpop.f32.mrf.mxu3 }
 0x12e   : > { %v769_v43 = vadd.f32 %v768_v44, %v655_v60  ;;  %1044 = vmatmul.f32.gmra.mxu0 %v3310_v17 }
 0x12f   : > { %1137 = vmatmul.f32.vlgmr.msrb.gmra.mxu1 %v3272_v38 }
 0x130   : > { %v3910_v35 = vadd.f32 %v882_v16, %v769_v43  ;;  %1463 = vmatmul.f32.gmra.mxu3 %v3310_v17 }
 0x131   : > { %1246 = vmatmul.f32.gmra.mxu2 %v3415_v59 }
 0x133   : > { %v449_v3 = vpop.f32.mrf.mxu0  ;;  %v658_v21 = vpop.f32.mrf.mxu1 }
 0x134   : > { %v659_v14 = vadd.f32 %v658_v21, %v441_v42  ;;  %v773_v26 = vpop.f32.mrf.mxu2  ;;  %v888_v49 = vpop.f32.mrf.mxu3 }
 0x136   : > { %v774_v33 = vadd.f32 %v773_v26, %v659_v14  ;;  %1048 = vmatmul.f32.gmra.mxu0 %v3362_v19 }
 0x137   : > { %1141 = vmatmul.f32.gmra.mxu1 %v3310_v17 }
 0x138   : > { %v3916_v58 = vadd.f32 %v888_v49, %v774_v33  ;;  %1467 = vmatmul.f32.gmra.mxu3 %v3362_v19  ;;  %v4732_v33 = vld [vmem:[#allocation39_spill] sm:$0xff] }
 0x139   : > { %1254 = vmatmul.f32.gmra.mxu2 %v3453_v45 }
 0x13b   : > { %v457_v62 = vpop.f32.mrf.mxu0  ;;  %v662_v9 = vpop.f32.mrf.mxu1 }
 0x13c   : > { %v663_v28 = vadd.f32 %v662_v9, %v449_v3  ;;  %v778_v59 = vpop.f32.mrf.mxu2  ;;  %v894_v20 = vpop.f32.mrf.mxu3 }
 0x13e   : > { %v779_v39 = vadd.f32 %v778_v59, %v663_v28  ;;  %1052 = vmatmul.f32.gmra.mxu0 %v3409_v54 }
 0x13f   : > { %1145 = vmatmul.f32.gmra.mxu1 %v3362_v19 }
 0x140   : > { %v3922_v41 = vadd.f32 %v894_v20, %v779_v39  ;;  %1471 = vmatmul.f32.gmra.mxu3 %v3409_v54  ;;  %v4733_v39 = vld [vmem:[#allocation35_spill] sm:$0xff] }
 0x141   : > { %1262 = vmatmul.f32.gmra.mxu2 %v3493_v1 }
 0x143   : > { %v465_v63 = vpop.f32.mrf.mxu0  ;;  %v666_v10 = vpop.f32.mrf.mxu1 }
 0x144   : > { %v667_v7 = vadd.f32 %v666_v10, %v457_v62  ;;  %v783_v45 = vpop.f32.mrf.mxu2  ;;  %v900_v40 = vpop.f32.mrf.mxu3  ;;  %v4734_v10 = vld [vmem:[#allocation42_spill] sm:$0xff] }
 0x146   : > { %v784_v36 = vadd.f32 %v783_v45, %v667_v7  ;;  %1056 = vmatmul.f32.gmra.mxu0 %v3459_v48 }
 0x147   : > { %1149 = vmatmul.f32.gmra.mxu1 %v3409_v54 }
 0x148   : > { %v3928_v34 = vadd.f32 %v900_v40, %v784_v36  ;;  %1475 = vmatmul.f32.gmra.mxu3 %v3459_v48 }
 0x149   : > { %1270 = vmatmul.f32.gmra.mxu2 %v3531_v6 }
 0x14b   : > { %v473_v53 = vpop.f32.mrf.mxu0  ;;  %v670_v46 = vpop.f32.mrf.mxu1 }
 0x14c   : > { %v671_v13 = vadd.f32 %v670_v46, %v465_v63  ;;  %v788_v1 = vpop.f32.mrf.mxu2  ;;  %v906_v37 = vpop.f32.mrf.mxu3 }
 0x14e   : > { %v789_v4 = vadd.f32 %v788_v1, %v671_v13  ;;  %1060 = vmatmul.f32.gmra.mxu0 %v3488_v52  ;;  %v4735_v13 = vld [vmem:[#allocation40_spill] sm:$0xff] }
 0x14f   : > { %1153 = vmatmul.f32.gmra.mxu1 %v3459_v48 }
 0x150   : > { %v3934_v61 = vadd.f32 %v906_v37, %v789_v4  ;;  %1479 = vmatmul.f32.gmra.mxu3 %v3488_v52  ;;  %v4736_v37 = vld [vmem:[#allocation46_spill] sm:$0xff] }
 0x151   : > { %1278 = vmatmul.f32.gmra.mxu2 %v3563_v27 }
 0x153   : > { %v481_v50 = vpop.f32.mrf.mxu0 }
 0x154   : > { %v674_v42 = vpop.f32.mrf.mxu1  ;;  %v793_v6 = vpop.f32.mrf.mxu2 }
 0x155   : > { %v675_v5 = vadd.f32 %v674_v42, %v473_v53  ;;  %v912_v60 = vpop.f32.mrf.mxu3 }
 0x156   : > { %1064 = vmatmul.f32.gmra.mxu0 %v3533_v57 }
 0x157   : > { %v794_v44 = vadd.f32 %v793_v6, %v675_v5  ;;  %1157 = vmatmul.f32.gmra.mxu1 %v3488_v52 }
 0x158   : > { %1483 = vmatmul.f32.gmra.mxu3 %v3533_v57 }
 0x159   : > { %v3940_v16 = vadd.f32 %v912_v60, %v794_v44  ;;  %1286 = vmatmul.f32.gmra.mxu2 %v3606_v55  ;;  %v4737_v44 = vld [vmem:[#allocation44_spill] sm:$0xff] }
 0x15b   : > { %v489_v43 = vpop.f32.mrf.mxu0 }
 0x15c   : > { %v678_v3 = vpop.f32.mrf.mxu1  ;;  %v798_v27 = vpop.f32.mrf.mxu2 }
 0x15d   : > { %v679_v21 = vadd.f32 %v678_v3, %v481_v50  ;;  %v918_v14 = vpop.f32.mrf.mxu3  ;;  %v4738_v3 = vld [vmem:[#allocation50_spill] sm:$0xff] }
 0x15e   : > { %1068 = vmatmul.f32.gmra.mxu0 %v3571_v30 }
 0x15f   : > { %v799_v26 = vadd.f32 %v798_v27, %v679_v21  ;;  %1161 = vmatmul.f32.gmra.mxu1 %v3533_v57 }
 0x160   : > { %1487 = vmatmul.f32.gmra.mxu3 %v3571_v30 }
 0x161   : > { %v3946_v49 = vadd.f32 %v918_v14, %v799_v26  ;;  %1294 = vmatmul.f32.gmra.mxu2 %v4732_v33 }
 0x163   : > { %v497_v62 = vpop.f32.mrf.mxu0 }
 0x164   : > { %v682_v9 = vpop.f32.mrf.mxu1  ;;  %v803_v55 = vpop.f32.mrf.mxu2 }
 0x165   : > { %v683_v28 = vadd.f32 %v682_v9, %v489_v43  ;;  %v924_v59 = vpop.f32.mrf.mxu3 }
 0x166   : > { %1072 = vmatmul.f32.gmra.mxu0 %v4733_v39 }
 0x167   : > { %v804_v20 = vadd.f32 %v803_v55, %v683_v28  ;;  %1165 = vmatmul.f32.gmra.mxu1 %v3571_v30  ;;  %v4739_v28 = vld [vmem:[#allocation51_spill] sm:$0xff] }
 0x168   : > { %1491 = vmatmul.f32.gmra.mxu3 %v4733_v39 }
 0x169   : > { %v3952_v63 = vadd.f32 %v924_v59, %v804_v20  ;;  %1302 = vmatmul.f32.gmra.mxu2 %v4734_v10 }
 0x16b   : > { %v505_v7 = vpop.f32.mrf.mxu0 }
 0x16c   : > { %v686_v45 = vpop.f32.mrf.mxu1  ;;  %v808_v36 = vpop.f32.mrf.mxu2 }
 0x16d   : > { %v687_v40 = vadd.f32 %v686_v45, %v497_v62  ;;  %v930_v53 = vpop.f32.mrf.mxu3 }
 0x16e   : > { %1076 = vmatmul.f32.gmra.mxu0 %v4735_v13 }
 0x16f   : > { %v809_v46 = vadd.f32 %v808_v36, %v687_v40  ;;  %1169 = vmatmul.f32.gmra.mxu1 %v4733_v39 }
 0x170   : > { %1495 = vmatmul.f32.gmra.mxu3 %v4735_v13 }
 0x171   : > { %v3958_v1 = vadd.f32 %v930_v53, %v809_v46  ;;  %1310 = vmatmul.f32.gmra.mxu2 %v4736_v37 }
 0x173   : > { %v513_v4 = vpop.f32.mrf.mxu0 }
 0x174   : > { %v690_v50 = vpop.f32.mrf.mxu1  ;;  %v813_v5 = vpop.f32.mrf.mxu2 }
 0x175   : > { %v691_v42 = vadd.f32 %v690_v50, %v505_v7  ;;  %v936_v6 = vpop.f32.mrf.mxu3 }
 0x176   : > { %1080 = vmatmul.f32.gmra.mxu0 %v4737_v44 }
 0x177   : > { %v814_v60 = vadd.f32 %v813_v5, %v691_v42  ;;  %1173 = vmatmul.f32.gmra.mxu1 %v4735_v13 }
 0x178   : > { %1499 = vmatmul.f32.gmra.mxu3 %v4737_v44 }
 0x179   : > { %v3964_v43 = vadd.f32 %v936_v6, %v814_v60  ;;  %1318 = vmatmul.f32.gmra.mxu2 %v4738_v3 }
 0x17b   : > { %v521_v21 = vpop.f32.mrf.mxu0 }
 0x17c   : > { %v694_v27 = vpop.f32.mrf.mxu1  ;;  %v818_v26 = vpop.f32.mrf.mxu2 }
 0x17d   : > { %v695_v14 = vadd.f32 %v694_v27, %v513_v4  ;;  %v942_v33 = vpop.f32.mrf.mxu3 }
 0x17e   : > { %1084 = vmatmul.f32.gmra.mxu0 %v3704_v12 }
 0x17f   : > { %v819_v62 = vadd.f32 %v818_v26, %v695_v14  ;;  %1177 = vmatmul.f32.gmra.mxu1 %v4737_v44 }
 0x180   : > { %1503 = vmatmul.f32.gmra.mxu3 %v3704_v12 }
 0x181   : > { %v3970_v9 = vadd.f32 %v942_v33, %v819_v62  ;;  %1326 = vmatmul.f32.gmra.mxu2 %v4739_v28 }
 0x183   : > { %v529_v55 = vpop.f32.mrf.mxu0 }
 0x184   : > { %v698_v59 = vpop.f32.mrf.mxu1  ;;  %v823_v10 = vpop.f32.mrf.mxu2 }
 0x185   : > { %v699_v20 = vadd.f32 %v698_v59, %v521_v21  ;;  %v948_v7 = vpop.f32.mrf.mxu3 }
 0x186   : > { %1088 = vmatmul.f32.gmra.mxu0 %v3742_v32 }
 0x187   : > { %v824_v45 = vadd.f32 %v823_v10, %v699_v20  ;;  %1181 = vmatmul.f32.gmra.mxu1 %v3704_v12 }
 0x188   : > { %1507 = vmatmul.f32.gmra.mxu3 %v3742_v32 }
 0x189   : > { %v3976_v40 = vadd.f32 %v948_v7, %v824_v45  ;;  %1334 = vmatmul.f32.gmra.mxu2 %v3801_v22 }
 0x18b   : > { %v537_v36 = vpop.f32.mrf.mxu0 }
 0x18c   : > { %v702_v53 = vpop.f32.mrf.mxu1  ;;  %v828_v37 = vpop.f32.mrf.mxu2 }
 0x18d   : > { %v703_v46 = vadd.f32 %v702_v53, %v529_v55  ;;  %v954_v4 = vpop.f32.mrf.mxu3 }
 0x18e   : > { %1092 = vmatmul.f32.gmra.mxu0 %v3771_v47 }
 0x18f   : > { %v829_v50 = vadd.f32 %v828_v37, %v703_v46  ;;  %1185 = vmatmul.f32.gmra.mxu1 %v3742_v32 }
 0x190   : > { %1511 = vmatmul.f32.gmra.mxu3 %v3771_v47 }
 0x191   : > { %v3982_v42 = vadd.f32 %v954_v4, %v829_v50  ;;  %1342 = vmatmul.f32.gmra.mxu2 %v3829_v31 }
 0x193   : > { %v545_v5 = vpop.f32.mrf.mxu0 }
 0x194   : > { %v706_v6 = vpop.f32.mrf.mxu1  ;;  %v833_v22 = vpop.f32.mrf.mxu2 }
 0x195   : > { %v707_v60 = vadd.f32 %v706_v6, %v537_v36  ;;  %v960_v3 = vpop.f32.mrf.mxu3  ;;  %v4740_v36 = vld [vmem:[#allocation20_spill] sm:$0xff]  ;;  %v4742_v6 = vld [vmem:[#allocation21_spill] sm:$0xff] }
 0x196   : > { %1096 = vmatmul.f32.gmra.mxu0 %v3806_v23 }
 0x197   : > { %v834_v21 = vadd.f32 %v833_v22, %v707_v60  ;;  %1189 = vmatmul.f32.gmra.mxu1 %v3771_v47 }
 0x198   : > { %1515 = vmatmul.f32.gmra.mxu3 %v3806_v23 }
 0x199   : > { %v3988_v27 = vadd.f32 %v960_v3, %v834_v21  ;;  %1350 = vmatmul.f32.gmra.mxu2 %v3855_v18 }
 0x19b   : > { %v553_v14 = vpop.f32.mrf.mxu0 }
 0x19c   : > { %v710_v26 = vpop.f32.mrf.mxu1  ;;  %v838_v31 = vpop.f32.mrf.mxu2 }
 0x19d   : > { %v711_v33 = vadd.f32 %v710_v26, %v545_v5  ;;  %v966_v62 = vpop.f32.mrf.mxu3  ;;  %v4741_v5 = vld [vmem:[#allocation22_spill] sm:$0xff] }
 0x19e   : > { %1100 = vmatmul.f32.gmra.mxu0 %v3834_v2 }
 0x19f   : > { %v839_v28 = vadd.f32 %v838_v31, %v711_v33  ;;  %1193 = vmatmul.f32.gmra.mxu1 %v3806_v23 }
 0x1a0   : > { %1519 = vmatmul.f32.gmra.mxu3 %v3834_v2 }
 0x1a1   : > { %v3994_v55 = vadd.f32 %v966_v62, %v839_v28  ;;  %1358 = vmatmul.f32.gmra.mxu2 %v3876_v15  ;;  %v4743_v28 = vld [vmem:[#allocation24_spill] sm:$0xff] }
 0x1a3   : > { %v1041_v20 = vpop.f32.mrf.mxu0 }
 0x1a4   : > { %v714_v59 = vpop.f32.mrf.mxu1  ;;  %v843_v18 = vpop.f32.mrf.mxu2  ;;  %v1042_v60 = vadd.f32 %v1041_v20, %v3910_v35 }
 0x1a5   : > { %v715_v10 = vadd.f32 %v714_v59, %v553_v14  ;;  %v972_v7 = vpop.f32.mrf.mxu3  ;;  %v4744_v59 = vld [vmem:[#allocation23_spill] sm:$0xff] }
 0x1a6   : > { %1573 = vmatmul.f32.vlgmr.msra.gmra.mxu0 %v4740_v36 }
 0x1a7   : > { %v844_v45 = vadd.f32 %v843_v18, %v715_v10  ;;  %1197 = vmatmul.f32.gmra.mxu1 %v3834_v2 }
 0x1a8   : > { %1943 = vmatmul.f32.vlgmr.msra.gmra.mxu3 %v3272_v38 }
 0x1a9   : > { %v4000_v53 = vadd.f32 %v972_v7, %v844_v45  ;;  %1846 = vmatmul.f32.vlgmr.msra.gmra.mxu2 %v3272_v38 }
 0x1ab   : > { %v1045_v46 = vpop.f32.mrf.mxu0 }
 0x1ac   : > { %v1138_v37 = vpop.f32.mrf.mxu1  ;;  %v1239_v4 = vpop.f32.mrf.mxu2  ;;  %v1046_v22 = vadd.f32 %v1045_v46, %v3916_v58 }
 0x1ad   : > { %v1460_v15 = vpop.f32.mrf.mxu3  ;;  %v4012_v3 = vadd.f32 %v1138_v37, %v1042_v60  ;;  %v4745_v37 = vld [vmem:[#allocation26_spill] sm:$0xff] }
 0x1ae   : > { %v4004_v50 = vadd.f32 %v1460_v15, %v1239_v4  ;;  %1578 = vmatmul.f32.gmra.mxu0 %v4741_v5  ;;  %v4746_v4 = vld [vmem:[#allocation25_spill] sm:$0xff] }
 0x1af   : > { %1687 = vmatmul.f32.vlgmr.msra.gmra.mxu1 %v4742_v6  ;;  %v2007_v62 = vmax.f32 %v4012_v3, 0.0 }
 0x1b0   : > { %1947 = vmatmul.f32.gmra.mxu3 %v3310_v17 }
 0x1b1   : > { %1850 = vmatmul.f32.gmra.mxu2 %v3310_v17 }
 0x1b3   : > { %v1049_v38 = vpop.f32.mrf.mxu0 }
 0x1b4   : > { %v1142_v21 = vpop.f32.mrf.mxu1  ;;  %v1247_v26 = vpop.f32.mrf.mxu2  ;;  %v1050_v58 = vadd.f32 %v1049_v38, %v3922_v41 }
 0x1b5   : > { %v4014_v14 = vadd.f32 %v1142_v21, %v1046_v22  ;;  %v1464_v33 = vpop.f32.mrf.mxu3 }
 0x1b6   : > { %v4016_v31 = vadd.f32 %v1464_v33, %v1247_v26  ;;  %1583 = vmatmul.f32.gmra.mxu0 %v4743_v28  ;;  %v4747_v26 = vld [vmem:[#allocation28_spill] sm:$0xff]  ;;  %v4748_v33 = vld [vmem:[#allocation27_spill] sm:$0xff] }
 0x1b7   : > { %v2009_v35 = vmax.f32 %v4014_v14, 0.0  ;;  %1693 = vmatmul.f32.gmra.mxu1 %v4744_v59 }
 0x1b8   : > { %1951 = vmatmul.f32.gmra.mxu3 %v3362_v19 }
 0x1b9   : > { %v2039_v17 = vadd.f32 %v2009_v35, %v2007_v62  ;;  %1854 = vmatmul.f32.gmra.mxu2 %v3362_v19 }
 0x1bb   : > { %v1053_v20 = vpop.f32.mrf.mxu0 }
 0x1bc   : > { %v1146_v10 = vpop.f32.mrf.mxu1  ;;  %v1255_v7 = vpop.f32.mrf.mxu2  ;;  %v1054_v19 = vadd.f32 %v1053_v20, %v3928_v34 }
 0x1bd   : > { %v4029_v18 = vadd.f32 %v1146_v10, %v1050_v58  ;;  %v1468_v45 = vpop.f32.mrf.mxu3 }
 0x1be   : > { %v4031_v36 = vadd.f32 %v1468_v45, %v1255_v7  ;;  %1588 = vmatmul.f32.gmra.mxu0 %v4745_v37  ;;  %v4749_v45 = vld [vmem:[#allocation30_spill] sm:$0xff]  ;;  %v4750_v37 = vld [vmem:[#allocation29_spill] sm:$0xff] }
 0x1bf   : > { %v2011_v46 = vmax.f32 %v4029_v18, 0.0  ;;  %1699 = vmatmul.f32.gmra.mxu1 %v4746_v4 }
 0x1c0   : > { %1955 = vmatmul.f32.gmra.mxu3 %v3409_v54 }
 0x1c1   : > { %v2040_v15 = vadd.f32 %v2039_v17, %v2011_v46  ;;  %1858 = vmatmul.f32.gmra.mxu2 %v3409_v54 }
 0x1c3   : > { %v1057_v41 = vpop.f32.mrf.mxu0 }
 0x1c4   : > { %v1150_v5 = vpop.f32.mrf.mxu1  ;;  %v1263_v60 = vpop.f32.mrf.mxu2  ;;  %v1058_v54 = vadd.f32 %v1057_v41, %v3934_v61 }
 0x1c5   : > { %v4041_v6 = vadd.f32 %v1150_v5, %v1054_v19  ;;  %v1472_v22 = vpop.f32.mrf.mxu3 }
 0x1c6   : > { %v4043_v38 = vadd.f32 %v1472_v22, %v1263_v60  ;;  %1593 = vmatmul.f32.gmra.mxu0 %v4747_v26  ;;  %v4751_v26 = vld [vmem:[#allocation32_spill] sm:$0xff] }
 0x1c7   : > { %v2013_v21 = vmax.f32 %v4041_v6, 0.0  ;;  %1705 = vmatmul.f32.gmra.mxu1 %v4748_v33  ;;  %v4752_v33 = vld [vmem:[#allocation31_spill] sm:$0xff] }
 0x1c8   : > { %1959 = vmatmul.f32.gmra.mxu3 %v3459_v48 }
 0x1c9   : > { %v2041_v28 = vadd.f32 %v2040_v15, %v2013_v21  ;;  %1862 = vmatmul.f32.gmra.mxu2 %v3459_v48 }
 0x1cb   : > { %v1061_v34 = vpop.f32.mrf.mxu0 }
 0x1cc   : > { %v1154_v59 = vpop.f32.mrf.mxu1  ;;  %v1271_v58 = vpop.f32.mrf.mxu2  ;;  %v1062_v48 = vadd.f32 %v1061_v34, %v3940_v16 }
 0x1cd   : > { %v4053_v17 = vadd.f32 %v1154_v59, %v1058_v54  ;;  %v1476_v20 = vpop.f32.mrf.mxu3 }
 0x1ce   : > { %v4055_v10 = vadd.f32 %v1476_v20, %v1271_v58  ;;  %1598 = vmatmul.f32.gmra.mxu0 %v4749_v45 }
 0x1cf   : > { %v2015_v7 = vmax.f32 %v4053_v17, 0.0  ;;  %1711 = vmatmul.f32.gmra.mxu1 %v4750_v37  ;;  %v4753_v37 = vld [vmem:[#allocation34_spill] sm:$0xff] }
 0x1d0   : > { %1963 = vmatmul.f32.gmra.mxu3 %v3488_v52 }
 0x1d1   : > { %v2042_v4 = vadd.f32 %v2041_v28, %v2015_v7  ;;  %1866 = vmatmul.f32.gmra.mxu2 %v3488_v52 }
 0x1d3   : > { %v1065_v61 = vpop.f32.mrf.mxu0 }
 0x1d4   : > { %v1158_v15 = vpop.f32.mrf.mxu1  ;;  %v1279_v41 = vpop.f32.mrf.mxu2  ;;  %v1066_v52 = vadd.f32 %v1065_v61, %v3946_v49 }
 0x1d5   : > { %v4065_v19 = vadd.f32 %v1158_v15, %v1062_v48  ;;  %v1480_v5 = vpop.f32.mrf.mxu3  ;;  %v4754_v48 = vld [vmem:[#allocation33_spill] sm:$0xff] }
 0x1d6   : > { %v4067_v60 = vadd.f32 %v1480_v5, %v1279_v41  ;;  %1603 = vmatmul.f32.gmra.mxu0 %v4751_v26 }
 0x1d7   : > { %v2017_v22 = vmax.f32 %v4065_v19, 0.0  ;;  %1717 = vmatmul.f32.gmra.mxu1 %v4752_v33 }
 0x1d8   : > { %1967 = vmatmul.f32.gmra.mxu3 %v3533_v57 }
 0x1d9   : > { %v2043_v28 = vadd.f32 %v2042_v4, %v2017_v22  ;;  %1870 = vmatmul.f32.gmra.mxu2 %v3533_v57 }
 0x1db   : > { %v1069_v16 = vpop.f32.mrf.mxu0 }
 0x1dc   : > { %v1162_v54 = vpop.f32.mrf.mxu1  ;;  %v1287_v59 = vpop.f32.mrf.mxu2  ;;  %v1070_v57 = vadd.f32 %v1069_v16, %v3952_v63 }
 0x1dd   : > { %v4077_v34 = vadd.f32 %v1162_v54, %v1066_v52  ;;  %v1484_v58 = vpop.f32.mrf.mxu3  ;;  %v4755_v54 = vld [vmem:[#allocation37_spill] sm:$0xff] }
 0x1de   : > { %v4079_v20 = vadd.f32 %v1484_v58, %v1287_v59  ;;  %1608 = vmatmul.f32.gmra.mxu0 %v4753_v37 }
 0x1df   : > { %v2019_v45 = vmax.f32 %v4077_v34, 0.0  ;;  %1723 = vmatmul.f32.gmra.mxu1 %v4754_v48 }
 0x1e0   : > { %1971 = vmatmul.f32.gmra.mxu3 %v3571_v30 }
 0x1e1   : > { %v2044_v4 = vadd.f32 %v2043_v28, %v2019_v45  ;;  %1874 = vmatmul.f32.gmra.mxu2 %v3571_v30  ;;  %v4756_v28 = vld [vmem:[#allocation36_spill] sm:$0xff] }
 0x1e3   : > { %v1073_v49 = vpop.f32.mrf.mxu0 }
 0x1e4   : > { %v1166_v61 = vpop.f32.mrf.mxu1  ;;  %v1074_v15 = vadd.f32 %v1073_v49, %v3958_v1  ;;  %v1295_v5 = vpop.f32.mrf.mxu2  ;;  %v4758_v49 = vld [vmem:[#allocation38_spill] sm:$0xff] }
 0x1e5   : > { %v4090_v41 = vadd.f32 %v1166_v61, %v1070_v57  ;;  %v1488_v26 = vpop.f32.mrf.mxu3  ;;  %v4757_v57 = vld [vmem:[#allocation41_spill] sm:$0xff] }
 0x1e6   : > { %v4092_v33 = vadd.f32 %v1488_v26, %v1295_v5  ;;  %1613 = vmatmul.f32.gmra.mxu0 %v4755_v54  ;;  %v4759_v54 = vld [vmem:[#allocation45_spill] sm:$0xff] }
 0x1e7   : > { %v2021_v52 = vmax.f32 %v4090_v41, 0.0  ;;  %1729 = vmatmul.f32.gmra.mxu1 %v4756_v28  ;;  %v4760_v28 = vld [vmem:[#allocation43_spill] sm:$0xff] }
 0x1e8   : > { %1975 = vmatmul.f32.gmra.mxu3 %v4733_v39 }
 0x1e9   : > { %v2045_v30 = vadd.f32 %v2044_v4, %v2021_v52  ;;  %1878 = vmatmul.f32.gmra.mxu2 %v4733_v39 }
 0x1eb   : > { %v1077_v63 = vpop.f32.mrf.mxu0 }
 0x1ec   : > { %v1170_v1 = vpop.f32.mrf.mxu1  ;;  %v1078_v16 = vadd.f32 %v1077_v63, %v3964_v43  ;;  %v1303_v58 = vpop.f32.mrf.mxu2 }
 0x1ed   : > { %v4102_v59 = vadd.f32 %v1170_v1, %v1074_v15  ;;  %v1492_v37 = vpop.f32.mrf.mxu3 }
 0x1ee   : > { %v4104_v48 = vadd.f32 %v1492_v37, %v1303_v58  ;;  %1618 = vmatmul.f32.gmra.mxu0 %v4757_v57 }
 0x1ef   : > { %1735 = vmatmul.f32.gmra.mxu1 %v4758_v49  ;;  %v4648_v63 = vmax.f32 %v4102_v59, 0.0 }
 0x1f0   : > { %1979 = vmatmul.f32.gmra.mxu3 %v4735_v13 }
 0x1f1   : > { %1882 = vmatmul.f32.gmra.mxu2 %v4735_v13 }
 0x1f3   : > { %v1081_v4 = vpop.f32.mrf.mxu0 }
 0x1f4   : > { %v1174_v39 = vpop.f32.mrf.mxu1  ;;  %v1082_v61 = vadd.f32 %v1081_v4, %v3970_v9  ;;  %v1311_v43 = vpop.f32.mrf.mxu2 }
 0x1f5   : > { %v4111_v5 = vadd.f32 %v1174_v39, %v1078_v16  ;;  %v1496_v15 = vpop.f32.mrf.mxu3  ;;  %v2046_v16 = vadd.f32 %v2045_v30, %v4648_v63 }
 0x1f6   : > { %v4113_v26 = vadd.f32 %v1496_v15, %v1311_v43  ;;  %1623 = vmatmul.f32.gmra.mxu0 %v4759_v54  ;;  %v4761_v43 = vld [vmem:[#allocation48_spill] sm:$0xff]  ;;  %v4762_v15 = vld [vmem:[#allocation47_spill] sm:$0xff] }
 0x1f7   : > { %1741 = vmatmul.f32.gmra.mxu1 %v4760_v28  ;;  %v4647_v13 = vmax.f32 %v4111_v5, 0.0 }
 0x1f8   : > { %1983 = vmatmul.f32.gmra.mxu3 %v4737_v44 }
 0x1f9   : > { %1886 = vmatmul.f32.gmra.mxu2 %v4737_v44  ;;  %v2047_v39 = vadd.f32 %v2046_v16, %v4647_v13 }
 0x1fb   : > { %v1085_v1 = vpop.f32.mrf.mxu0 }
 0x1fc   : > { %v1178_v9 = vpop.f32.mrf.mxu1  ;;  %v1086_v58 = vadd.f32 %v1085_v1, %v3976_v40  ;;  %v1319_v57 = vpop.f32.mrf.mxu2 }
 0x1fd   : > { %v4124_v37 = vadd.f32 %v1178_v9, %v1082_v61  ;;  %v1500_v49 = vpop.f32.mrf.mxu3 }
 0x1fe   : > { %v4126_v4 = vadd.f32 %v1500_v49, %v1319_v57  ;;  %1628 = vmatmul.f32.gmra.mxu0 %v4761_v43  ;;  %v4763_v49 = vld [vmem:[#allocation49_spill] sm:$0xff] }
 0x1ff   : > { %v2027_v44 = vmax.f32 %v4124_v37, 0.0  ;;  %1747 = vmatmul.f32.gmra.mxu1 %v4762_v15 }
 0x200   : > { %1987 = vmatmul.f32.gmra.mxu3 %v3704_v12 }
 0x201   : > { %v2048_v30 = vadd.f32 %v2047_v39, %v2027_v44  ;;  %1890 = vmatmul.f32.gmra.mxu2 %v3704_v12 }
 0x203   : > { %v1089_v40 = vpop.f32.mrf.mxu0 }
 0x204   : > { %v1182_v61 = vpop.f32.mrf.mxu1  ;;  %v1090_v54 = vadd.f32 %v1089_v40, %v3982_v42  ;;  %v1327_v1 = vpop.f32.mrf.mxu2 }
 0x205   : > { %v4138_v28 = vadd.f32 %v1182_v61, %v1086_v58  ;;  %v1504_v9 = vpop.f32.mrf.mxu3 }
 0x206   : > { %v4140_v16 = vadd.f32 %v1504_v9, %v1327_v1  ;;  %1633 = vmatmul.f32.gmra.mxu0 %v3756_v11 }
 0x207   : > { %v2029_v57 = vmax.f32 %v4138_v28, 0.0  ;;  %1753 = vmatmul.f32.gmra.mxu1 %v4763_v49 }
 0x208   : > { %1991 = vmatmul.f32.gmra.mxu3 %v3742_v32 }
 0x209   : > { %v2049_v39 = vadd.f32 %v2048_v30, %v2029_v57  ;;  %1894 = vmatmul.f32.gmra.mxu2 %v3742_v32 }
 0x20b   : > { %v1093_v12 = vpop.f32.mrf.mxu0 }
 0x20c   : > { %v1186_v42 = vpop.f32.mrf.mxu1  ;;  %v1094_v58 = vadd.f32 %v1093_v12, %v3988_v27  ;;  %v1335_v15 = vpop.f32.mrf.mxu2 }
 0x20d   : > { %v4150_v43 = vadd.f32 %v1186_v42, %v1090_v54  ;;  %v1508_v40 = vpop.f32.mrf.mxu3 }
 0x20e   : > { %v4152_v61 = vadd.f32 %v1508_v40, %v1335_v15  ;;  %1638 = vmatmul.f32.gmra.mxu0 %v3785_v56 }
 0x20f   : > { %v2031_v11 = vmax.f32 %v4150_v43, 0.0  ;;  %1759 = vmatmul.f32.gmra.mxu1 %v3769_v51 }
 0x210   : > { %1995 = vmatmul.f32.gmra.mxu3 %v3771_v47 }
 0x211   : > { %v2050_v30 = vadd.f32 %v2049_v39, %v2031_v11  ;;  %1898 = vmatmul.f32.gmra.mxu2 %v3771_v47 }
 0x213   : > { %v1097_v32 = vpop.f32.mrf.mxu0 }
 0x214   : > { %v1190_v27 = vpop.f32.mrf.mxu1  ;;  %v1098_v54 = vadd.f32 %v1097_v32, %v3994_v55  ;;  %v1343_v9 = vpop.f32.mrf.mxu2 }
 0x215   : > { %v4162_v1 = vadd.f32 %v1190_v27, %v1094_v58  ;;  %v1512_v49 = vpop.f32.mrf.mxu3 }
 0x216   : > { %v4164_v12 = vadd.f32 %v1512_v49, %v1343_v9  ;;  %1643 = vmatmul.f32.gmra.mxu0 %v3823_v25 }
 0x217   : > { %v2033_v56 = vmax.f32 %v4162_v1, 0.0  ;;  %1765 = vmatmul.f32.gmra.mxu1 %v3804_v8 }
 0x218   : > { %1999 = vmatmul.f32.gmra.mxu3 %v3806_v23 }
 0x219   : > { %v2051_v51 = vadd.f32 %v2050_v30, %v2033_v56  ;;  %1902 = vmatmul.f32.gmra.mxu2 %v3806_v23 }
 0x21b   : > { %v1101_v47 = vpop.f32.mrf.mxu0 }
 0x21c   : > { %v1194_v39 = vpop.f32.mrf.mxu1  ;;  %v1102_v55 = vadd.f32 %v1101_v47, %v4000_v53  ;;  %v1351_v58 = vpop.f32.mrf.mxu2 }
 0x21d   : > { %v1195_v42 = vadd.f32 %v1194_v39, %v1098_v54  ;;  %v1516_v15 = vpop.f32.mrf.mxu3 }
 0x21e   : > { %v4172_v40 = vadd.f32 %v1516_v15, %v1351_v58  ;;  %1648 = vmatmul.f32.gmra.mxu0 %v3847_v24 }
 0x21f   : > { %v2035_v32 = vmax.f32 %v1195_v42, 0.0  ;;  %1771 = vmatmul.f32.gmra.mxu1 %v3832_v0 }
 0x220   : > { %2003 = vmatmul.f32.gmra.mxu3 %v3834_v2 }
 0x221   : > { %v2052_v8 = vadd.f32 %v2051_v51, %v2035_v32  ;;  %1906 = vmatmul.f32.gmra.mxu2 %v3834_v2 }
 0x223   : > { %v1574_v25 = vpop.f32.mrf.mxu0 }
 0x224   : > { %v1198_v23 = vpop.f32.mrf.mxu1  ;;  %v1575_v53 = vadd.f32 %v1574_v25, %v4004_v50  ;;  %v1359_v27 = vpop.f32.mrf.mxu2 }
 0x225   : > { %v1199_v30 = vadd.f32 %v1198_v23, %v1102_v55  ;;  %v1520_v54 = vpop.f32.mrf.mxu3 }
 0x226   : > { %v4179_v1 = vadd.f32 %v1520_v54, %v1359_v27 }
 0x227   : > { %v2037_v9 = vmax.f32 %v1199_v30, 0.0  ;;  %1777 = vmatmul.f32.gmra.mxu1 %v3858_v29 }
 0x229   : > { %v2053_v24 = vadd.f32 %v2052_v8, %v2037_v9 }
 0x22b   : > { %v2054_v49 = vrot.slane %v2053_v24, 4  ;;  %v1579_v0 = vpop.f32.mrf.mxu0 }
 0x22c   : > { %v1688_v51 = vpop.f32.mrf.mxu1  ;;  %v1580_v39 = vadd.f32 %v1579_v0, %v4016_v31  ;;  %v1847_v42 = vpop.f32.mrf.mxu2 }
 0x22d   : > { %v2055_v47 = vadd.f32 %v2054_v49, %v2053_v24  ;;  %v1689_v2 = vadd.f32 %v1688_v51, %v1575_v53  ;;  %v1944_v58 = vpop.f32.mrf.mxu3 }
 0x22f   : > { %v2056_v55 = vrot.slane %v2055_v47, 2  ;;  %v1848_v15 = vadd.f32 %v1847_v42, %v1689_v2 }
 0x231   : > { %v2057_v50 = vadd.f32 %v2056_v55, %v2055_v47  ;;  %v4183_v23 = vadd.f32 %v1944_v58, %v1848_v15 }
 0x233   : > { %v2058_v25 = vrot.slane %v2057_v50, 1  ;;  %v1584_v27 = vpop.f32.mrf.mxu0  ;;  %v2008_v43 = vmax.f32 %v4183_v23, 0.0 }
 0x234   : > { %v1694_v30 = vpop.f32.mrf.mxu1  ;;  %v1585_v29 = vadd.f32 %v1584_v27, %v4031_v36  ;;  %v1851_v13 = vpop.f32.mrf.mxu2 }
 0x235   : > { %v2059_v54 = vadd.f32 %v2058_v25, %v2057_v50  ;;  %v1695_v8 = vadd.f32 %v1694_v30, %v1580_v39  ;;  %v1948_v63 = vpop.f32.mrf.mxu3 }
 0x237   : > { %v4186_v24 = vmul.f32 0.015625, %v2059_v54  ;;  %v1852_v31 = vadd.f32 %v1851_v13, %v1695_v8 }
 0x239   : > { %v4191_v53 = vsub.f32 %v2007_v62, %v4186_v24  ;;  %v4196_v49 = vsub.f32 %v2009_v35, %v4186_v24  ;;  %v4201_v36 = vsub.f32 %v2011_v46, %v4186_v24  ;;  %v4206_v0 = vsub.f32 %v2013_v21, %v4186_v24 }
 0x23a   : > { %v4211_v3 = vsub.f32 %v2015_v7, %v4186_v24  ;;  %v4216_v14 = vsub.f32 %v2017_v22, %v4186_v24  ;;  %v4221_v62 = vsub.f32 %v2019_v45, %v4186_v24  ;;  %v4226_v35 = vsub.f32 %v2021_v52, %v4186_v24 }
 0x23b   : > { %v4231_v18 = vsub.f32 %v2027_v44, %v4186_v24  ;;  %v4236_v46 = vsub.f32 %v2029_v57, %v4186_v24  ;;  %v4241_v6 = vsub.f32 %v2031_v11, %v4186_v24  ;;  %v4244_v21 = vsub.f32 %v2033_v56, %v4186_v24  ;;  %v1589_v19 = vpop.f32.mrf.mxu0 }
 0x23c   : > { %v4247_v17 = vsub.f32 %v2035_v32, %v4186_v24  ;;  %v4250_v7 = vsub.f32 %v2037_v9, %v4186_v24  ;;  %v1700_v22 = vpop.f32.mrf.mxu1  ;;  %v2180_v34 = vmul.f32 %v4191_v53, %v4191_v53  ;;  %v2182_v45 = vmul.f32 %v4196_v49, %v4196_v49  ;;  %v1855_v41 = vpop.f32.mrf.mxu2 }
 0x23d   : > { %v1952_v52 = vpop.f32.mrf.mxu3  ;;  %v2184_v13 = vmul.f32 %v4201_v36, %v4201_v36  ;;  %v4258_v44 = vadd.f32 %v1948_v63, %v1852_v31  ;;  %v1590_v28 = vadd.f32 %v1589_v19, %v4043_v38  ;;  %v1701_v57 = vadd.f32 %v1700_v22, %v1585_v29 }
 0x23e   : > { %v2212_v37 = vadd.f32 %v2182_v45, %v2180_v34  ;;  %v2186_v11 = vmul.f32 %v4206_v0, %v4206_v0  ;;  %v2188_v51 = vmul.f32 %v4211_v3, %v4211_v3  ;;  %v2190_v39 = vmul.f32 %v4216_v14, %v4216_v14 }
 0x23f   : > { %v2010_v32 = vmax.f32 %v4258_v44, 0.0  ;;  %v1856_v9 = vadd.f32 %v1855_v41, %v1701_v57  ;;  %v2192_v30 = vmul.f32 %v4221_v62, %v4221_v62  ;;  %v2194_v31 = vmul.f32 %v4226_v35, %v4226_v35 }
 0x240   : > { %v2213_v56 = vadd.f32 %v2212_v37, %v2184_v13 }
 0x241   : > { %v2060_v63 = vadd.f32 %v2010_v32, %v2008_v43  ;;  %v4271_v38 = vadd.f32 %v1952_v52, %v1856_v9 }
 0x242   : > { %v2214_v47 = vadd.f32 %v2213_v56, %v2186_v11 }
 0x243   : > { %v1594_v2 = vpop.f32.mrf.mxu0  ;;  %v2012_v55 = vmax.f32 %v4271_v38, 0.0 }
 0x244   : > { %v1706_v42 = vpop.f32.mrf.mxu1  ;;  %v2215_v58 = vadd.f32 %v2214_v47, %v2188_v51  ;;  %v1595_v15 = vadd.f32 %v1594_v2, %v4055_v10  ;;  %v1859_v25 = vpop.f32.mrf.mxu2 }
 0x245   : > { %v1707_v50 = vadd.f32 %v1706_v42, %v1590_v28  ;;  %v1956_v27 = vpop.f32.mrf.mxu3  ;;  %v2061_v29 = vadd.f32 %v2060_v63, %v2012_v55 }
 0x246   : > { %v2216_v54 = vadd.f32 %v2215_v58, %v2190_v39 }
 0x247   : > { %v1860_v8 = vadd.f32 %v1859_v25, %v1707_v50 }
 0x248   : > { %v2217_v19 = vadd.f32 %v2216_v54, %v2192_v30 }
 0x249   : > { %v4283_v22 = vadd.f32 %v1956_v27, %v1860_v8 }
 0x24a   : > { %v4285_v34 = vadd.f32 %v2217_v19, %v2194_v31 }
 0x24b   : > { %v2014_v10 = vmax.f32 %v4283_v22, 0.0  ;;  %v1599_v45 = vpop.f32.mrf.mxu0 }
 0x24c   : > { %v1712_v41 = vpop.f32.mrf.mxu1  ;;  %v1863_v37 = vpop.f32.mrf.mxu2  ;;  %v1600_v56 = vadd.f32 %v1599_v45, %v4067_v60 }
 0x24d   : > { %v2062_v52 = vadd.f32 %v2061_v29, %v2014_v10  ;;  %v1713_v13 = vadd.f32 %v1712_v41, %v1595_v15  ;;  %v1960_v28 = vpop.f32.mrf.mxu3 }
 0x24f   : > { %v1864_v57 = vadd.f32 %v1863_v37, %v1713_v13 }
 0x251   : > { %v4290_v11 = vadd.f32 %v1960_v28, %v1864_v57 }
 0x253   : > { %v2016_v9 = vmax.f32 %v4290_v11, 0.0  ;;  %v1604_v51 = vpop.f32.mrf.mxu0 }
 0x254   : > { %v1718_v47 = vpop.f32.mrf.mxu1  ;;  %v1867_v2 = vpop.f32.mrf.mxu2  ;;  %v1605_v15 = vadd.f32 %v1604_v51, %v4079_v20 }
 0x255   : > { %v2063_v63 = vadd.f32 %v2062_v52, %v2016_v9  ;;  %v1719_v39 = vadd.f32 %v1718_v47, %v1600_v56  ;;  %v1964_v42 = vpop.f32.mrf.mxu3 }
 0x257   : > { %v1868_v58 = vadd.f32 %v1867_v2, %v1719_v39 }
 0x259   : > { %v4296_v50 = vadd.f32 %v1964_v42, %v1868_v58 }
 0x25b   : > { %v2018_v25 = vmax.f32 %v4296_v50, 0.0  ;;  %v1609_v27 = vpop.f32.mrf.mxu0 }
 0x25c   : > { %v1724_v30 = vpop.f32.mrf.mxu1  ;;  %v1871_v29 = vpop.f32.mrf.mxu2  ;;  %v1610_v45 = vadd.f32 %v1609_v27, %v4092_v33 }
 0x25d   : > { %v2064_v60 = vadd.f32 %v2063_v63, %v2018_v25  ;;  %v1725_v54 = vadd.f32 %v1724_v30, %v1605_v15  ;;  %v1968_v8 = vpop.f32.mrf.mxu3 }
 0x25f   : > { %v1872_v31 = vadd.f32 %v1871_v29, %v1725_v54 }
 0x261   : > { %v4302_v19 = vadd.f32 %v1968_v8, %v1872_v31 }
 0x263   : > { %v2020_v41 = vmax.f32 %v4302_v19, 0.0  ;;  %v1614_v52 = vpop.f32.mrf.mxu0 }
 0x264   : > { %v1730_v13 = vpop.f32.mrf.mxu1  ;;  %v1875_v28 = vpop.f32.mrf.mxu2  ;;  %v1615_v58 = vadd.f32 %v1614_v52, %v4104_v48 }
 0x265   : > { %v2065_v20 = vadd.f32 %v2064_v60, %v2020_v41  ;;  %v1731_v37 = vadd.f32 %v1730_v13, %v1610_v45  ;;  %v1972_v57 = vpop.f32.mrf.mxu3 }
 0x267   : > { %v1876_v56 = vadd.f32 %v1875_v28, %v1731_v37 }
 0x269   : > { %v4308_v51 = vadd.f32 %v1972_v57, %v1876_v56 }
 0x26b   : > { %v2022_v47 = vmax.f32 %v4308_v51, 0.0  ;;  %v1619_v63 = vpop.f32.mrf.mxu0 }
 0x26c   : > { %v1736_v39 = vpop.f32.mrf.mxu1  ;;  %v1879_v2 = vpop.f32.mrf.mxu2  ;;  %v1620_v27 = vadd.f32 %v1619_v63, %v4113_v26 }
 0x26d   : > { %v2066_v33 = vadd.f32 %v2065_v20, %v2022_v47  ;;  %v1976_v42 = vpop.f32.mrf.mxu3  ;;  %v1737_v15 = vadd.f32 %v1736_v39, %v1615_v58 }
 0x26f   : > { %v1880_v54 = vadd.f32 %v1879_v2, %v1737_v15 }
 0x271   : > { %v4315_v13 = vadd.f32 %v1976_v42, %v1880_v54 }
 0x273   : > { %v1624_v30 = vpop.f32.mrf.mxu0  ;;  %v4650_v48 = vmax.f32 %v4315_v13, 0.0 }
 0x274   : > { %v1742_v60 = vpop.f32.mrf.mxu1  ;;  %v1883_v8 = vpop.f32.mrf.mxu2  ;;  %v1625_v37 = vadd.f32 %v1624_v30, %v4126_v4 }
 0x275   : > { %v1743_v29 = vadd.f32 %v1742_v60, %v1620_v27  ;;  %v1980_v31 = vpop.f32.mrf.mxu3  ;;  %v2067_v2 = vadd.f32 %v2066_v33, %v4650_v48 }
 0x277   : > { %v1884_v45 = vadd.f32 %v1883_v8, %v1743_v29 }
 0x279   : > { %v4318_v28 = vadd.f32 %v1980_v31, %v1884_v45 }
 0x27b   : > { %v1629_v20 = vpop.f32.mrf.mxu0  ;;  %v4649_v63 = vmax.f32 %v4318_v28, 0.0 }
 0x27c   : > { %v1748_v57 = vpop.f32.mrf.mxu1  ;;  %v1887_v56 = vpop.f32.mrf.mxu2  ;;  %v1630_v42 = vadd.f32 %v1629_v20, %v4140_v16 }
 0x27d   : > { %v1749_v52 = vadd.f32 %v1748_v57, %v1625_v37  ;;  %v1984_v26 = vpop.f32.mrf.mxu3  ;;  %v2068_v4 = vadd.f32 %v2067_v2, %v4649_v63 }
 0x27f   : > { %v1888_v39 = vadd.f32 %v1887_v56, %v1749_v52 }
 0x281   : > { %v4324_v58 = vadd.f32 %v1984_v26, %v1888_v39 }
 0x283   : > { %v4651_v15 = vmax.f32 %v4324_v58, 0.0  ;;  %v1634_v27 = vpop.f32.mrf.mxu0 }
 0x284   : > { %v1754_v30 = vpop.f32.mrf.mxu1  ;;  %v1891_v29 = vpop.f32.mrf.mxu2  ;;  %v1635_v33 = vadd.f32 %v1634_v27, %v4152_v61 }
 0x285   : > { %v2069_v60 = vadd.f32 %v2068_v4, %v4651_v15  ;;  %v1755_v54 = vadd.f32 %v1754_v30, %v1630_v42  ;;  %v1988_v8 = vpop.f32.mrf.mxu3 }
 0x287   : > { %v1892_v31 = vadd.f32 %v1891_v29, %v1755_v54 }
 0x289   : > { %v1989_v45 = vadd.f32 %v1988_v8, %v1892_v31 }
 0x28b   : > { %v2030_v37 = vmax.f32 %v1989_v45, 0.0  ;;  %v1639_v57 = vpop.f32.mrf.mxu0 }
 0x28c   : > { %v1760_v52 = vpop.f32.mrf.mxu1  ;;  %v1895_v16 = vpop.f32.mrf.mxu2  ;;  %v1640_v63 = vadd.f32 %v1639_v57, %v4164_v12 }
 0x28d   : > { %v2070_v56 = vadd.f32 %v2069_v60, %v2030_v37  ;;  %v1761_v26 = vadd.f32 %v1760_v52, %v1635_v33  ;;  %v1992_v20 = vpop.f32.mrf.mxu3 }
 0x28f   : > { %v1896_v39 = vadd.f32 %v1895_v16, %v1761_v26 }
 0x291   : > { %v1993_v2 = vadd.f32 %v1992_v20, %v1896_v39 }
 0x293   : > { %v2032_v48 = vmax.f32 %v1993_v2, 0.0  ;;  %v1644_v29 = vpop.f32.mrf.mxu0 }
 0x294   : > { %v1766_v4 = vpop.f32.mrf.mxu1  ;;  %v1899_v15 = vpop.f32.mrf.mxu2  ;;  %v1645_v27 = vadd.f32 %v1644_v29, %v4172_v40 }
 0x295   : > { %v2071_v42 = vadd.f32 %v2070_v56, %v2032_v48  ;;  %v1767_v30 = vadd.f32 %v1766_v4, %v1640_v63  ;;  %v1996_v54 = vpop.f32.mrf.mxu3 }
 0x297   : > { %v1900_v8 = vadd.f32 %v1899_v15, %v1767_v30 }
 0x299   : > { %v1997_v61 = vadd.f32 %v1996_v54, %v1900_v8 }
 0x29b   : > { %v2034_v31 = vmax.f32 %v1997_v61, 0.0  ;;  %v1649_v20 = vpop.f32.mrf.mxu0 }
 0x29c   : > { %v1772_v60 = vpop.f32.mrf.mxu1  ;;  %v1903_v52 = vpop.f32.mrf.mxu2  ;;  %v1650_v57 = vadd.f32 %v1649_v20, %v4179_v1 }
 0x29d   : > { %v2072_v45 = vadd.f32 %v2071_v42, %v2034_v31  ;;  %v1773_v33 = vadd.f32 %v1772_v60, %v1645_v27  ;;  %v2000_v26 = vpop.f32.mrf.mxu3  ;;  %v2227_v60 = vrot.slane %v4285_v34, 4 }
 0x29f   : > { %v1904_v16 = vadd.f32 %v1903_v52, %v1773_v33  ;;  %v2228_v1 = vadd.f32 %v2227_v60, %v4285_v34 }
 0x2a1   : > { %v2001_v12 = vadd.f32 %v2000_v26, %v1904_v16  ;;  %v2229_v38 = vrot.slane %v2228_v1, 2 }
 0x2a3   : > { %v2036_v56 = vmax.f32 %v2001_v12, 0.0  ;;  %v2230_v51 = vadd.f32 %v2229_v38, %v2228_v1 }
 0x2a4   : > { %v1778_v63 = vpop.f32.mrf.mxu1  ;;  %v1907_v4 = vpop.f32.mrf.mxu2 }
 0x2a5   : > { %v2073_v39 = vadd.f32 %v2072_v45, %v2036_v56  ;;  %v1779_v2 = vadd.f32 %v1778_v63, %v1650_v57  ;;  %v2004_v15 = vpop.f32.mrf.mxu3 }
 0x2a7   : > { %v1908_v30 = vadd.f32 %v1907_v4, %v1779_v2 }
 0x2a9   : > { %v2005_v54 = vadd.f32 %v2004_v15, %v1908_v30 }
 0x2ab   : > { %v2038_v40 = vmax.f32 %v2005_v54, 0.0 }
 0x2ad   : > { %v2074_v29 = vadd.f32 %v2073_v39, %v2038_v40 }
 0x2af   : > { %v2075_v8 = vrot.slane %v2074_v29, 4 }
 0x2b1   : > { %v2076_v42 = vadd.f32 %v2075_v8, %v2074_v29 }
 0x2b3   : > { %v2077_v61 = vrot.slane %v2076_v42, 2 }
 0x2b5   : > { %v2078_v27 = vadd.f32 %v2077_v61, %v2076_v42 }
 0x2b7   : > { %v2079_v33 = vrot.slane %v2078_v27, 1 }
 0x2b9   : > { %v2080_v52 = vadd.f32 %v2079_v33, %v2078_v27 }
 0x2bb   : > { %v4338_v26 = vmul.f32 0.015625, %v2080_v52 }
 0x2bd   : > { %v4343_v45 = vsub.f32 %v2008_v43, %v4338_v26  ;;  %v4348_v16 = vsub.f32 %v2010_v32, %v4338_v26  ;;  %v4353_v20 = vsub.f32 %v2012_v55, %v4338_v26  ;;  %v4358_v34 = vsub.f32 %v2014_v10, %v4338_v26 }
 0x2be   : > { %v4363_v23 = vsub.f32 %v2016_v9, %v4338_v26  ;;  %v4368_v44 = vsub.f32 %v2018_v25, %v4338_v26  ;;  %v4373_v43 = vsub.f32 %v2020_v41, %v4338_v26  ;;  %v4378_v32 = vsub.f32 %v2022_v47, %v4338_v26 }
 0x2bf   : > { %v4764_v55 = vmax.f32 %v4324_v58, 0.0  ;;  %v4386_v10 = vsub.f32 %v2030_v37, %v4338_v26  ;;  %v4389_v11 = vsub.f32 %v2032_v48, %v4338_v26  ;;  %v4392_v9 = vsub.f32 %v2034_v31, %v4338_v26 }
 0x2c0   : > { %v4395_v50 = vsub.f32 %v2036_v56, %v4338_v26  ;;  %v4398_v25 = vsub.f32 %v2038_v40, %v4338_v26  ;;  %v2181_v19 = vmul.f32 %v4343_v45, %v4343_v45  ;;  %v2183_v41 = vmul.f32 %v4348_v16, %v4348_v16 }
 0x2c1   : > { %v4383_v22 = vsub.f32 %v4764_v55, %v4338_v26  ;;  %v2185_v47 = vmul.f32 %v4353_v20, %v4353_v20  ;;  %v2187_v58 = vmul.f32 %v4358_v34, %v4358_v34  ;;  %v2231_v31 = vrot.slane %v2230_v51, 1 }
 0x2c2   : > { %v2233_v48 = vadd.f32 %v2183_v41, %v2181_v19  ;;  %v2189_v12 = vmul.f32 %v4363_v23, %v4363_v23  ;;  %v2191_v56 = vmul.f32 %v4368_v44, %v4368_v44  ;;  %v2193_v39 = vmul.f32 %v4373_v43, %v4373_v43 }
 0x2c3   : > { %v2232_v2 = vadd.f32 %v2231_v31, %v2230_v51  ;;  %v2195_v15 = vmul.f32 %v4378_v32, %v4378_v32 }
 0x2c4   : > { %v2234_v37 = vadd.f32 %v2233_v48, %v2185_v47 }
 0x2c5   : > { %v2254_v40 = vmul.f32 0.015625, %v2232_v2 }
 0x2c6   : > { %v2235_v57 = vadd.f32 %v2234_v37, %v2187_v58 }
 0x2c7   : > { %v2267_v42 = vadd.f32 1e-05, %v2254_v40 }
 0x2c8   : > { %v2236_v63 = vadd.f32 %v2235_v57, %v2189_v12 }
 0x2c9   : > { %2666 = vrsqrt.f32 %v2267_v42  ;;  %vm2275_vm4 = vweird.f32 %v2267_v42 }
 0x2ca   : > { %v2237_v4 = vadd.f32 %v2236_v63, %v2191_v56  ;;  %v2264_v63 = vld [vmem:[%s2263_s12] ss:$4 sm:$0x3] }
 0x2cc   : > { %v2238_v30 = vadd.f32 %v2237_v4, %v2193_v39 }
 0x2ce   : > { %v2239_v54 = vadd.f32 %v2238_v30, %v2195_v15  ;;  %v2266_v15 = vld [vmem:[%s2265_s18] ss:$4 sm:$0x3] }
 0x2cf   : > { %v2667_v52 = vpop.eup %2666 }
 0x2d0   : > { %v2248_v29 = vrot.slane %v2239_v54, 4  ;;  %v2270_v55 = vmul.f32 %v2667_v52, %v2267_v42  ;;  %vm2276_vm1 = vweird.f32 %v2667_v52 }
 0x2d1   : > { %vm2277_vm6 = vmor %vm2275_vm4, %vm2276_vm1 }
 0x2d2   : > { %v2249_v8 = vadd.f32 %v2248_v29, %v2239_v54  ;;  %v2271_v19 = vmul.f32 %v2667_v52, %v2270_v55  ;;  %v4765_v54 = vmax.f32 %v4102_v59, 0.0  ;;  %v4766_v29 = vmax.f32 %v4111_v5, 0.0 }
 0x2d4   : > { %v2250_v61 = vrot.slane %v2249_v8, 2  ;;  %v2272_v51 = vmul.f32 0.5, %v2271_v19  ;;  %v2099_v40 = vsub.f32 %v4765_v54, %v4186_v24 }
 0x2d6   : > { %v2251_v27 = vadd.f32 %v2250_v61, %v2249_v8  ;;  %v2273_v58 = vsub.f32 1.5, %v2272_v51  ;;  %v2101_v8 = vsub.f32 %v4766_v29, %v4186_v24 }
 0x2d8   : > { %v2252_v60 = vrot.slane %v2251_v27, 1  ;;  %v2274_v12 = vmul.f32 %v2667_v52, %v2273_v58 }
 0x2da   : > { %v2253_v33 = vadd.f32 %v2252_v60, %v2251_v27  ;;  %v2278_v2 = vsel %vm2277_vm6, %v2667_v52, %v2274_v12  ;;  %v4767_v27 = vmax.f32 %v4315_v13, 0.0 }
 0x2dc   : > { %v2255_v1 = vmul.f32 0.015625, %v2253_v33  ;;  %v2100_v60 = vsub.f32 %v4767_v27, %v4338_v26  ;;  %v4768_v33 = vmax.f32 %v4318_v28, 0.0 }
 0x2de   : > { %v2268_v38 = vadd.f32 1e-05, %v2255_v1  ;;  %v2102_v52 = vsub.f32 %v4768_v33, %v4338_v26  ;;  %v4430_v1 = vperm.slane %v2266_v15, 0 }
 0x2e0   : > { %2668 = vrsqrt.f32 %v2268_v38  ;;  %vm2285_vm2 = vweird.f32 %v2268_v38 }
 0x2e6   : > { %v2669_v41 = vpop.eup %2668 }
 0x2e7   : > { %v2280_v47 = vmul.f32 %v2669_v41, %v2268_v38  ;;  %vm2286_vm0 = vweird.f32 %v2669_v41  ;;  %v4432_v38 = vperm.slane %v2266_v15, 1 }
 0x2e8   : > { %vm2287_vm3 = vmor %vm2285_vm2, %vm2286_vm0 }
 0x2e9   : > { %v2281_v48 = vmul.f32 %v2669_v41, %v2280_v47 }
 0x2eb   : > { %v2282_v37 = vmul.f32 0.5, %v2281_v48 }
 0x2ed   : > { %v2283_v31 = vsub.f32 1.5, %v2282_v37 }
 0x2ef   : > { %v2284_v57 = vmul.f32 %v2669_v41, %v2283_v31 }
 0x2f1   : > { %v2288_v56 = vsel %vm2287_vm3, %v2669_v41, %v2284_v57 }
 0x2f2   : > { %v2291_v39 = vrot.slane %v2288_v56, 7 }
 0x2f4   : > { %v2293_v4 = vsel %vm2292_vm5, %v2278_v2, %v2291_v39 }
 0x2f5   : > { %v2295_v30 = vmul.f32 %v2293_v4, %v2264_v63 }
 0x2f7   : > { %v2297_v42 = vperm.slane %v2295_v30, 0  ;;  %v2298_v61 = vperm.slane %v2295_v30, 1 }
 0x2f9   : > { %v2301_v59 = vmul.f32 %v2297_v42, %v4191_v53  ;;  %v2302_v55 = vmul.f32 %v2298_v61, %v4343_v45  ;;  %v2303_v5 = vmul.f32 %v2297_v42, %v4196_v49  ;;  %v2304_v24 = vmul.f32 %v2298_v61, %v4348_v16 }
 0x2fa   : > { %v2305_v19 = vmul.f32 %v2297_v42, %v4201_v36  ;;  %v2306_v13 = vmul.f32 %v2298_v61, %v4353_v20  ;;  %v2307_v41 = vmul.f32 %v2297_v42, %v4206_v0  ;;  %v2308_v28 = vmul.f32 %v2298_v61, %v4358_v34 }
 0x2fb   : > { %v2309_v26 = vmul.f32 %v2297_v42, %v4211_v3  ;;  %v2310_v51 = vmul.f32 %v2298_v61, %v4363_v23  ;;  %v2311_v53 = vmul.f32 %v2297_v42, %v4216_v14  ;;  %v2312_v45 = vmul.f32 %v2298_v61, %v4368_v44 }
 0x2fc   : > { %v2313_v49 = vmul.f32 %v2297_v42, %v4221_v62  ;;  %v2314_v16 = vmul.f32 %v2298_v61, %v4373_v43  ;;  %v2315_v36 = vmul.f32 %v2297_v42, %v4226_v35  ;;  %v2316_v20 = vmul.f32 %v2298_v61, %v4378_v32 }
 0x2fd   : > { %v2317_v47 = vmul.f32 %v2297_v42, %v2099_v40  ;;  %v2318_v0 = vmul.f32 %v2298_v61, %v2100_v60  ;;  %v2319_v48 = vmul.f32 %v2297_v42, %v2101_v8  ;;  %v2320_v34 = vmul.f32 %v2298_v61, %v2102_v52 }
 0x2fe   : > { %v2321_v3 = vmul.f32 %v2297_v42, %v4231_v18  ;;  %v2322_v23 = vmul.f32 %v2298_v61, %v4383_v22  ;;  %v2323_v14 = vmul.f32 %v2297_v42, %v4236_v46  ;;  %v2324_v44 = vmul.f32 %v2298_v61, %v4386_v10 }
 0x2ff   : > { %v2325_v62 = vmul.f32 %v2297_v42, %v4241_v6  ;;  %v2326_v35 = vmul.f32 %v2298_v61, %v4389_v11  ;;  %v2327_v43 = vmul.f32 %v2297_v42, %v4244_v21  ;;  %v2328_v32 = vmul.f32 %v2298_v61, %v4392_v9 }
 0x300   : > { %v2329_v18 = vmul.f32 %v2297_v42, %v4247_v17  ;;  %v2330_v22 = vmul.f32 %v2298_v61, %v4395_v50  ;;  %v2331_v46 = vmul.f32 %v2297_v42, %v4250_v7  ;;  %v2332_v10 = vmul.f32 %v2298_v61, %v4398_v25 }
 0x301   : > { %v2338_v6 = vadd.f32 %v4430_v1, %v2301_v59  ;;  %v2339_v11 = vadd.f32 %v4432_v38, %v2302_v55  ;;  %v2340_v21 = vadd.f32 %v4430_v1, %v2303_v5  ;;  %v2341_v9 = vadd.f32 %v4432_v38, %v2304_v24 }
 0x302   : > { %v2342_v17 = vadd.f32 %v4430_v1, %v2305_v19  ;;  %v2343_v50 = vadd.f32 %v4432_v38, %v2306_v13  ;;  %v2344_v7 = vadd.f32 %v4430_v1, %v2307_v41  ;;  %v2345_v25 = vadd.f32 %v4432_v38, %v2308_v28 }
 0x303   : > { %2370 = vst [vmem:[%s3102_s6] sm:$0xff] %v2338_v6  ;;  %v2346_v58 = vadd.f32 %v4430_v1, %v2309_v26  ;;  %v2347_v37 = vadd.f32 %v4432_v38, %v2310_v51  ;;  %v2348_v31 = vadd.f32 %v4430_v1, %v2311_v53  ;;  %v2349_v12 = vadd.f32 %v4432_v38, %v2312_v45 }
 0x304   : > { %2371 = vst [vmem:[%s3102_s6 + $0x8] sm:$0xff] %v2339_v11  ;;  %v2350_v57 = vadd.f32 %v4430_v1, %v2313_v49  ;;  %v2351_v56 = vadd.f32 %v4432_v38, %v2314_v16  ;;  %v2352_v63 = vadd.f32 %v4430_v1, %v2315_v36  ;;  %v2353_v39 = vadd.f32 %v4432_v38, %v2316_v20 }
 0x305   : > { %2372 = vst [vmem:[%s3102_s6 + $0x10] sm:$0xff] %v2340_v21  ;;  %v2354_v2 = vadd.f32 %v4430_v1, %v2317_v47  ;;  %v2355_v4 = vadd.f32 %v4432_v38, %v2318_v0  ;;  %v2356_v15 = vadd.f32 %v4430_v1, %v2319_v48  ;;  %v2357_v30 = vadd.f32 %v4432_v38, %v2320_v34 }
 0x306   : > { %2373 = vst [vmem:[%s3102_s6 + $0x18] sm:$0xff] %v2341_v9  ;;  %v2358_v54 = vadd.f32 %v4430_v1, %v2321_v3  ;;  %v2359_v40 = vadd.f32 %v4432_v38, %v2322_v23  ;;  %v2360_v29 = vadd.f32 %v4430_v1, %v2323_v14  ;;  %v2361_v8 = vadd.f32 %v4432_v38, %v2324_v44 }
 0x307   : > { %2374 = vst [vmem:[%s3102_s6 + $0x20] sm:$0xff] %v2342_v17  ;;  %v2362_v42 = vadd.f32 %v4430_v1, %v2325_v62  ;;  %v2363_v61 = vadd.f32 %v4432_v38, %v2326_v35  ;;  %v2364_v27 = vadd.f32 %v4430_v1, %v2327_v43  ;;  %v2365_v60 = vadd.f32 %v4432_v38, %v2328_v32 }
 0x308   : > { %2375 = vst [vmem:[%s3102_s6 + $0x28] sm:$0xff] %v2343_v50  ;;  %v2366_v33 = vadd.f32 %v4430_v1, %v2329_v18  ;;  %v2367_v52 = vadd.f32 %v4432_v38, %v2330_v22  ;;  %v2368_v59 = vadd.f32 %v4430_v1, %v2331_v46  ;;  %v2369_v55 = vadd.f32 %v4432_v38, %v2332_v10 }
 0x309   : > { %2376 = vst [vmem:[%s3102_s6 + $0x30] sm:$0xff] %v2344_v7 }
 0x30a   : > { %2377 = vst [vmem:[%s3102_s6 + $0x38] sm:$0xff] %v2345_v25 }
 0x30b   : > { %2378 = vst [vmem:[%s3102_s6 + $0x40] sm:$0xff] %v2346_v58 }
 0x30c   : > { %2379 = vst [vmem:[%s3102_s6 + $0x48] sm:$0xff] %v2347_v37 }
 0x30d   : > { %2380 = vst [vmem:[%s3102_s6 + $0x50] sm:$0xff] %v2348_v31 }
 0x30e   : > { %2381 = vst [vmem:[%s3102_s6 + $0x58] sm:$0xff] %v2349_v12 }
 0x30f   : > { %2382 = vst [vmem:[%s3102_s6 + $0x60] sm:$0xff] %v2350_v57 }
 0x310   : > { %2383 = vst [vmem:[%s3102_s6 + $0x68] sm:$0xff] %v2351_v56 }
 0x311   : > { %2384 = vst [vmem:[%s3102_s6 + $0x70] sm:$0xff] %v2352_v63 }
 0x312   : > { %2385 = vst [vmem:[%s3102_s6 + $0x78] sm:$0xff] %v2353_v39 }
 0x313   : > { %2386 = vst [vmem:[%s3102_s6 + $0x80] sm:$0xff] %v2354_v2 }
 0x314   : > { %2387 = vst [vmem:[%s3102_s6 + $0x88] sm:$0xff] %v2355_v4 }
 0x315   : > { %2388 = vst [vmem:[%s3102_s6 + $0x90] sm:$0xff] %v2356_v15 }
 0x316   : > { %2389 = vst [vmem:[%s3102_s6 + $0x98] sm:$0xff] %v2357_v30 }
 0x317   : > { %2390 = vst [vmem:[%s3102_s6 + $0xa0] sm:$0xff] %v2358_v54 }
 0x318   : > { %2391 = vst [vmem:[%s3102_s6 + $0xa8] sm:$0xff] %v2359_v40 }
 0x319   : > { %2392 = vst [vmem:[%s3102_s6 + $0xb0] sm:$0xff] %v2360_v29 }
 0x31a   : > { %2393 = vst [vmem:[%s3102_s6 + $0xb8] sm:$0xff] %v2361_v8 }
 0x31b   : > { %2394 = vst [vmem:[%s3102_s6 + $0xc0] sm:$0xff] %v2362_v42 }
 0x31c   : > { %2395 = vst [vmem:[%s3102_s6 + $0xc8] sm:$0xff] %v2363_v61 }
 0x31d   : > { %2396 = vst [vmem:[%s3102_s6 + $0xd0] sm:$0xff] %v2364_v27 }
 0x31e   : > { %2397 = vst [vmem:[%s3102_s6 + $0xd8] sm:$0xff] %v2365_v60 }
 0x31f   : > { %2398 = vst [vmem:[%s3102_s6 + $0xe0] sm:$0xff] %v2366_v33 }
 0x320   : > { %2399 = vst [vmem:[%s3102_s6 + $0xe8] sm:$0xff] %v2367_v52 }
 0x321   : > { %2400 = vst [vmem:[%s3102_s6 + $0xf0] sm:$0xff] %v2368_v59 }
 0x322   : > { %2401 = vst [vmem:[%s3102_s6 + $0xf8] sm:$0xff] %v2369_v55 }
 0x323   : > { %2817 = shalt.err (!%p2814_p8)
}
 0x324   : > { %s2907_s7 = smov 256   ;;  %s2908_s6 = smov 512  }
 0x325   : > { %s2909_s29 = smov 16  }
 0x326   : > { %2568 = dma.vmem_to_hbm [thread:$0]  (%p3000_p9), %s2416_s8, 4096, %s2418_s13, %s2403_s19, %s2907_s7, %s2908_s6, %s2909_s29  }
 0x327 PF: > { %p2589_p11 = scmp.ge.s32.totalorder %s2896_s22, 2  ;;  %s2432_s1 = sand.u32 1, %s2868_s15  }
 0x328   : > { %s2433_s9 = scalar_lea.sflag [#allocation4], %s2432_s1 }
 0x329   : > { %p2584_p12 = pnand %p2589_p11, %p3004_p10 }
 0x32b   : > { %p2585_p4 = pneg %p2584_p12 }
 0x32d   : > { %2863 = dma.done.wait (%p2585_p4), %s2433_s9, 4096  }
 0x32e   : > { %2865 = vsyncadd (%p2585_p4), %s2433_s9, 4294963200  ;;  %s20_s22 = sadd.s32 1, %s2896_s22   ;;  %s4770_s12 = sld [smem:[#allocation19_spill]] }
 0x32f   : > { %p17_p6 = scmp.ge.s32.totalorder %s20_s22, 8   ;;  %s4771_s18 = sld [smem:[#allocation15_spill]] }
 0x330   : > { %s4772_s19 = sld [smem:[#allocation16_spill]]  ;;  %s4775_s15 = smov %s2872_s16 }
 0x331   : > { %s4773_s20 = sld [smem:[#allocation17_spill]]  ;;  %s4776_s16 = smov %s2876_s17 }
 0x332   : > { %s4774_s21 = sld [smem:[#allocation18_spill]]  ;;  %19 = sbr.rel (!%p17_p6) target bundleno = 10 (0xa), region = 94 }
 0x334   : > { %s4777_s17 = smov %s4770_s12 }
 0x337   :  { %2439 = vsyncpa [#allocation3], 1 }
 0x338   :  { %2441 = vsyncpa [#allocation3 + $0x1], 1 }
 0x339   :  { %2442 = vsyncpa [#allocation6], 1 }
 0x33a   :  { %2443 = vsyncpa [#allocation9], 1 }
 0x33b   :  { %2444 = vsyncpa [#allocation4], 1 }
 0x33c   :  { %2446 = vsyncpa [#allocation4 + $0x1], 1 }

// kernel: tpu_custom_call.1
= control target key start
LH: loop header
LB: loop body
LE: loop exit
PB: predicated region body
PF: predicated region fallthrough
CT: control target
= control target key end

     0   :  { %s4688_s0 = inlined_call_operand.hbm [shape: f32[128,128], index: 0, kind: input, shape index: {}]   ;;  %s4689_s1 = inlined_call_operand.hbm [shape: f32[128,512], index: 1, kind: input, shape index: {}]   ;;  %s4690_s2 = inlined_call_operand.hbm [shape: f32[3,512], index: 2, kind: input, shape index: {}]   ;;  %s4691_s3 = inlined_call_operand.hbm [shape: f32[3,512], index: 3, kind: input, shape index: {}]   ;;  %s4692_s4 = inlined_call_operand.hbm [shape: f32[128,512], index: 4, kind: output, shape index: {}]  }
   0x1   :  { %4769 = sst [smem:[#allocation55_spill]] %s4688_s0 }
   0x2   :  { %4770 = sst [smem:[#allocation56_spill]] %s4689_s1 }
   0x3   :  { %9 = vsyncpa [#allocation3], 0 }
   0x4   :  { %10 = vsyncpa [#allocation6], 0 }
   0x5   :  { %12 = vsyncpa [#allocation6 + $0x1], 0 }
   0x6   :  { %13 = vsyncpa [#allocation9], 0 }
   0x7   :  { %15 = vsyncpa [#allocation9 + $0x1], 0 }
   0x8   :  { %16 = vsyncpa [#allocation4], 0 }
   0x9   :  { %18 = vsyncpa [#allocation4 + $0x1], 0  ;;  %s3018_s15 = smov 0   ;;  %s3020_s16 = smov 0  }
   0xa   :  { %s3022_s17 = smov 0   ;;  %s3024_s18 = smov 0  }
   0xb   :  { %s3026_s19 = smov 0   ;;  %s3028_s20 = smov 0  }
   0xc   :  { %s3030_s21 = smov 0   ;;  %s3032_s22 = smov 0  }
   0xd LB: > { %4771 = sst [smem:[#allocation15_spill]] %s2954_s15  ;;  %s33_s23 = sadd.s32 1, %s2974_s20  ;;  %s2982_s22 = sphi %s3032_s22, %s24_s22   ;;  %s2978_s21 = sphi %s3030_s21, %s4897_s21   ;;  %s2974_s20 = sphi %s3028_s20, %s4896_s20   ;;  %s2970_s19 = sphi %s3026_s19, %s4895_s19   ;;  %s2966_s18 = sphi %s3024_s18, %s4894_s18   ;;  %s2962_s17 = sphi %s3022_s17, %s4893_s17   ;;  %s2958_s16 = sphi %s3020_s16, %s4899_s16   ;;  %s2954_s15 = sphi %s3018_s15, %s4898_s15  }
   0xe   : > { %4772 = sst [smem:[#allocation16_spill]] %s2962_s17  ;;  %s36_s24 = sadd.s32 1, %s2978_s21 }
   0xf   : > { %4773 = sst [smem:[#allocation17_spill]] %s2974_s20  ;;  %p34_p0 = scmp.ge.s32.totalorder %s33_s23, 3 }
  0x10   : > { %4774 = sst [smem:[#allocation18_spill]] %s2978_s21  ;;  %s64_s25 = sadd.s32 1, %s2962_s17 }
  0x11   : > { %p71_p1 = scmp.ne.s32.totalorder %s2962_s17, %s2958_s16  ;;  %p72_p2 = scmp.eq.s32.totalorder %s2982_s22, 0 }
  0x12   : > { %s4901_s23 = smov (%p34_p0, %s33_s23), 0  ;;  %s4903_s24 = smov (!%p34_p0, %s36_s24), %s2978_s21 }
  0x13   : > { %4775 = sst [smem:[#allocation19_spill]] %s4901_s23  ;;  %p3070_p3 = por %p72_p2, %p71_p1 }
  0x14   : > { %p38_p4 = scmp.ge.s32.totalorder %s4903_s24, 2  ;;  %p2676_p5 = scmp.lt.s32.totalorder %s2982_s22, 6 }
  0x15   : > { %s193_s27 = sand.u32 1, %s2982_s22   ;;  %s3077_s28 = sand.u32 1, %s2962_s17  }
  0x16   : > { %s4905_s24 = smov (%p38_p4, %s4903_s24), 0  ;;  %s2617_s29 = sshll.u32 %s3077_s28, 8 }
  0x17   : > { %4777 = sst [smem:[#allocation20_spill]] %s4905_s24  ;;  %s61_s30 = ssub.s32 %s2978_s21, %s4905_s24 }
  0x18   : > { %p62_p6 = scmp.eq.s32.totalorder %s61_s30, 0  ;;  %s2640_s5 = sshll.u32 %s2978_s21, 4 }
  0x19   : > { %s4778_s1 = sld [smem:[#allocation56_spill]]  ;;  %s197_s9 = scalar_lea.vmem [#allocation5], %s2617_s29 }
  0x1a   : > { %s205_s10 = sshll.u32 %s197_s9, 4  ;;  %p3095_p7 = pnand %p2676_p5, %p3070_p3  ;;  %s206_s10 = int_to_ptr.vmem [resolvable:$true] %s205_s10 }
  0x1b   : > { %s3089_s11 = scalar_select %p62_p6, %s2962_s17, %s64_s25  }
  0x1c   : > { %s3099_s14 = scalar_lea.sflag [#allocation6], %s193_s27  ;;  %s2984_s29 = smov 512  }
  0x1d   : > { %4779 = sst [smem:[#allocation21_spill]] %s3089_s11  ;;  %s2985_s25 = smov 256  }
  0x1e   : > { %s2986_s30 = smov 16   ;;  %s2613_s26 = sadd.s32 4294967294, %s2982_s22  }
  0x1f   : > { %s202_s8 = scalar_lea.hbm %s4778_s1, %s2640_s5  ;;  %s3105_s5 = sadd.s32 4294967295, %s2982_s22  }
  0x20   : > { %s203_s12 = sshll.u32 %s202_s8, 4  ;;  %p77_p8 = scmp.ne.s32.totalorder %s2958_s16, %s2954_s15  ;;  %s204_s12 = int_to_ptr.hbm [resolvable:$true] %s203_s12 }
  0x21   : > { %2664 = dma.hbm_to_vmem [thread:$0]  (!%p3095_p7), %s204_s12, 4096, %s206_s10, %s3099_s14, %s2984_s29, %s2985_s25, %s2986_s30  }
  0x22   : > { %p78_p9 = scmp.eq.s32.totalorder %s3105_s5, 0  ;;  %p153_p10 = scmp.eq.s32.totalorder %s3105_s5, 5 }
  0x23   : > { %p159_p11 = scmp.eq.s32.totalorder %s2613_s26, 5  ;;  %p2614_p13 = scmp.ge.s32.totalorder %s2982_s22, 1 }
  0x24   : > { %p3114_p12 = por %p78_p9, %p77_p8  ;;  %p3122_p0 = por %p153_p10, %p71_p1 }
  0x25   : > { %p3126_p2 = por %p159_p11, %p77_p8  ;;  %p166_p3 = scmp.lt.s32.totalorder %s2982_s22, 7 }
  0x26   : > { %s4785_s0 = sld [smem:[#allocation55_spill]]  ;;  %s2987_s29 = smov [#allocation2]  }
  0x27   : > { %s4783_s7 = scalar_select %p3126_p2, 1, 0 }
  0x28   : > { %p3134_p4 = pnand %p2614_p13, %p166_p3  ;;  %s179_s25 = sshll.u32 %s2987_s29, 4  ;;  %s180_s25 = int_to_ptr.vmem [resolvable:$true] %s179_s25 }
  0x29   : > { %4784 = sst [smem:[#allocation22_spill]] %s4783_s7  ;;  %s2620_s30 = sshll.u32 %s3077_s28, 3 }
  0x2a   : > { %p2657_p1 = pneg %p3134_p4  ;;  %s2641_s26 = sshll.u32 %s2978_s21, 3 }
  0x2b   : > { %s219_s1 = scalar_lea.vmem [#allocation7], %s2620_s30  ;;  %s224_s24 = scalar_lea.hbm %s4690_s2, %s2641_s26 }
  0x2c   : > { %s177_s10 = sshll.u32 %s4785_s0, 4  ;;  %p2658_p5 = pnand %p2657_p1, %p78_p9  ;;  %s178_s10 = int_to_ptr.hbm [resolvable:$true] %s177_s10 }
  0x2d   : > { %s228_s8 = sshll.u32 %s219_s1, 4  ;;  %s2988_s23 = smov 128   ;;  %s229_s8 = int_to_ptr.vmem [resolvable:$true] %s228_s8 }
  0x2e   : > { %s2989_s20 = smov 8   ;;  %s226_s11 = sshll.u32 %s224_s24, 4  ;;  %s227_s11 = int_to_ptr.hbm [resolvable:$true] %s226_s11 }
  0x2f   : > { %2660 = dma.hbm_to_vmem [thread:$0]  (!%p2658_p5), %s178_s10, 2048, %s180_s25, [#allocation3], %s2988_s23, %s2988_s23, %s2989_s20  }
  0x30   : > { %2667 = dma.hbm_to_vmem [thread:$0]  (!%p3095_p7), %s227_s11, 128, %s229_s8, %s3099_s14  }
  0x31   : > { %s244_s21 = scalar_lea.hbm %s4691_s3, %s2641_s26  ;;  %s239_s15 = scalar_lea.vmem [#allocation8], %s2620_s30 }
  0x32   : > { %s246_s7 = sshll.u32 %s244_s21, 4  ;;  %s248_s1 = sshll.u32 %s239_s15, 4  ;;  %s247_s7 = int_to_ptr.hbm [resolvable:$true] %s246_s7  ;;  %s249_s1 = int_to_ptr.vmem [resolvable:$true] %s248_s1 }
  0x33   : > { %s236_s0 = scalar_lea.sflag [#allocation9], %s3077_s28  ;;  %257 = sbr.rel (%p3134_p4) target bundleno = 784 (0x310), region = 36 }
  0x34   : > { %2670 = dma.hbm_to_vmem [thread:$0]  (!%p3095_p7), %s247_s7, 128, %s249_s1, %s236_s0  }
  0x38   : > { %2937 = dma.done.wait (%p78_p9), [#allocation3], 2048  }
  0x39   : > { %2939 = vsyncadd (%p78_p9), [#allocation3], 4294965248  ;;  %s264_s17 = sand.u32 1, %s3105_s5   ;;  %s3164_s20 = sand.u32 1, %s2958_s16  }
  0x3a   : > { %s2628_s15 = sshll.u32 %s3164_s20, 8  ;;  %s265_s21 = scalar_lea.sflag [#allocation6], %s264_s17 }
  0x3b   : > { %s3167_s23 = scalar_lea.vmem [#allocation5], %s2628_s15 }
  0x3c   : > { %2941 = dma.done.wait (%p3114_p12), %s265_s21, 4224  }
  0x3d   : > { %2943 = vsyncadd (%p3114_p12), %s265_s21, 4294963072  ;;  %s2629_s24 = sshll.u32 %s3164_s20, 3  ;;  %s285_s11 = scalar_lea.sflag [#allocation9], %s3164_s20 }
  0x3e   : > { %s3174_s28 = scalar_lea.vmem [#allocation7], %s2629_s24  ;;  %s3177_s13 = scalar_lea.vmem [#allocation8], %s2629_s24 }
  0x3f   : > { %2945 = dma.done.wait (%p3114_p12), %s285_s11, 128  }
  0x40   : > { %2947 = vsyncadd (%p3114_p12), %s285_s11, 4294967168  ;;  %s3183_s14 = scalar_lea.vmem [#allocation10], %s2628_s15  ;;  %p2632_p6 = scmp.ne.s32.totalorder %s2966_s18, 0 }
  0x42   : > { %331 = sbr.rel (%p2632_p6) target bundleno = 104 (0x68), region = 56 }
  0x47   : > { %v332_v0 = vld [vmem:[%s3167_s23] sm:$0xff]  ;;  %v333_v1 = vld [vmem:[%s3167_s23 + $0x8] sm:$0xff]  ;;  %v334_v2 = vld [vmem:[%s3167_s23 + $0x10] sm:$0xff] }
  0x48   : > { %364 = vst [vmem:[%s3183_s14] sm:$0xff] %v332_v0  ;;  %v335_v3 = vld [vmem:[%s3167_s23 + $0x18] sm:$0xff]  ;;  %v336_v4 = vld [vmem:[%s3167_s23 + $0x20] sm:$0xff]  ;;  %v337_v5 = vld [vmem:[%s3167_s23 + $0x28] sm:$0xff] }
  0x49   : > { %365 = vst [vmem:[%s3183_s14 + $0x8] sm:$0xff] %v333_v1  ;;  %v338_v6 = vld [vmem:[%s3167_s23 + $0x30] sm:$0xff]  ;;  %v339_v7 = vld [vmem:[%s3167_s23 + $0x38] sm:$0xff]  ;;  %v340_v8 = vld [vmem:[%s3167_s23 + $0x40] sm:$0xff] }
  0x4a   : > { %366 = vst [vmem:[%s3183_s14 + $0x10] sm:$0xff] %v334_v2  ;;  %v341_v9 = vld [vmem:[%s3167_s23 + $0x48] sm:$0xff]  ;;  %v342_v10 = vld [vmem:[%s3167_s23 + $0x50] sm:$0xff]  ;;  %v343_v11 = vld [vmem:[%s3167_s23 + $0x58] sm:$0xff] }
  0x4b   : > { %367 = vst [vmem:[%s3183_s14 + $0x18] sm:$0xff] %v335_v3  ;;  %v344_v12 = vld [vmem:[%s3167_s23 + $0x60] sm:$0xff]  ;;  %v345_v13 = vld [vmem:[%s3167_s23 + $0x68] sm:$0xff]  ;;  %v346_v14 = vld [vmem:[%s3167_s23 + $0x70] sm:$0xff] }
  0x4c   : > { %368 = vst [vmem:[%s3183_s14 + $0x20] sm:$0xff] %v336_v4  ;;  %v347_v15 = vld [vmem:[%s3167_s23 + $0x78] sm:$0xff]  ;;  %v348_v16 = vld [vmem:[%s3167_s23 + $0x80] sm:$0xff]  ;;  %v349_v17 = vld [vmem:[%s3167_s23 + $0x88] sm:$0xff] }
  0x4d   : > { %369 = vst [vmem:[%s3183_s14 + $0x28] sm:$0xff] %v337_v5  ;;  %v350_v18 = vld [vmem:[%s3167_s23 + $0x90] sm:$0xff]  ;;  %v351_v19 = vld [vmem:[%s3167_s23 + $0x98] sm:$0xff]  ;;  %v352_v20 = vld [vmem:[%s3167_s23 + $0xa0] sm:$0xff] }
  0x4e   : > { %370 = vst [vmem:[%s3183_s14 + $0x30] sm:$0xff] %v338_v6  ;;  %v353_v21 = vld [vmem:[%s3167_s23 + $0xa8] sm:$0xff]  ;;  %v354_v22 = vld [vmem:[%s3167_s23 + $0xb0] sm:$0xff]  ;;  %v355_v23 = vld [vmem:[%s3167_s23 + $0xb8] sm:$0xff] }
  0x4f   : > { %371 = vst [vmem:[%s3183_s14 + $0x38] sm:$0xff] %v339_v7  ;;  %v356_v24 = vld [vmem:[%s3167_s23 + $0xc0] sm:$0xff]  ;;  %v357_v25 = vld [vmem:[%s3167_s23 + $0xc8] sm:$0xff]  ;;  %v358_v26 = vld [vmem:[%s3167_s23 + $0xd0] sm:$0xff] }
  0x50   : > { %372 = vst [vmem:[%s3183_s14 + $0x40] sm:$0xff] %v340_v8  ;;  %v359_v27 = vld [vmem:[%s3167_s23 + $0xd8] sm:$0xff]  ;;  %v360_v28 = vld [vmem:[%s3167_s23 + $0xe0] sm:$0xff]  ;;  %v361_v29 = vld [vmem:[%s3167_s23 + $0xe8] sm:$0xff] }
  0x51   : > { %373 = vst [vmem:[%s3183_s14 + $0x48] sm:$0xff] %v341_v9  ;;  %v362_v30 = vld [vmem:[%s3167_s23 + $0xf0] sm:$0xff]  ;;  %v363_v31 = vld [vmem:[%s3167_s23 + $0xf8] sm:$0xff] }
  0x52   : > { %374 = vst [vmem:[%s3183_s14 + $0x50] sm:$0xff] %v342_v10 }
  0x53   : > { %375 = vst [vmem:[%s3183_s14 + $0x58] sm:$0xff] %v343_v11 }
  0x54   : > { %376 = vst [vmem:[%s3183_s14 + $0x60] sm:$0xff] %v344_v12 }
  0x55   : > { %377 = vst [vmem:[%s3183_s14 + $0x68] sm:$0xff] %v345_v13 }
  0x56   : > { %378 = vst [vmem:[%s3183_s14 + $0x70] sm:$0xff] %v346_v14 }
  0x57   : > { %379 = vst [vmem:[%s3183_s14 + $0x78] sm:$0xff] %v347_v15 }
  0x58   : > { %380 = vst [vmem:[%s3183_s14 + $0x80] sm:$0xff] %v348_v16 }
  0x59   : > { %381 = vst [vmem:[%s3183_s14 + $0x88] sm:$0xff] %v349_v17 }
  0x5a   : > { %382 = vst [vmem:[%s3183_s14 + $0x90] sm:$0xff] %v350_v18 }
  0x5b   : > { %383 = vst [vmem:[%s3183_s14 + $0x98] sm:$0xff] %v351_v19 }
  0x5c   : > { %384 = vst [vmem:[%s3183_s14 + $0xa0] sm:$0xff] %v352_v20 }
  0x5d   : > { %385 = vst [vmem:[%s3183_s14 + $0xa8] sm:$0xff] %v353_v21 }
  0x5e   : > { %386 = vst [vmem:[%s3183_s14 + $0xb0] sm:$0xff] %v354_v22 }
  0x5f   : > { %387 = vst [vmem:[%s3183_s14 + $0xb8] sm:$0xff] %v355_v23 }
  0x60   : > { %388 = vst [vmem:[%s3183_s14 + $0xc0] sm:$0xff] %v356_v24 }
  0x61   : > { %389 = vst [vmem:[%s3183_s14 + $0xc8] sm:$0xff] %v357_v25 }
  0x62   : > { %390 = vst [vmem:[%s3183_s14 + $0xd0] sm:$0xff] %v358_v26 }
  0x63   : > { %391 = vst [vmem:[%s3183_s14 + $0xd8] sm:$0xff] %v359_v27 }
  0x64   : > { %392 = vst [vmem:[%s3183_s14 + $0xe0] sm:$0xff] %v360_v28 }
  0x65   : > { %393 = vst [vmem:[%s3183_s14 + $0xe8] sm:$0xff] %v361_v29 }
  0x66   : > { %394 = vst [vmem:[%s3183_s14 + $0xf0] sm:$0xff] %v362_v30 }
  0x67   : > { %395 = vst [vmem:[%s3183_s14 + $0xf8] sm:$0xff] %v363_v31 }
  0x68 PF: > { %v420_v38 = vld [vmem:[%s3183_s14 + $0xc0] sm:$0xff]  ;;  %v418_v39 = vld [vmem:[%s3183_s14 + $0xb0] sm:$0xff]  ;;  %s2305_s5 = sshra.s32 %s2966_s18, 2  ;;  %s2308_s27 = sand.u32 3, %s2966_s18  ;;  %vm2341_vm5 = vcmask 1040384  }
  0x69   : > { %v422_v34 = vld [vmem:[%s3183_s14 + $0xd0] sm:$0xff]  ;;  %v416_v40 = vld [vmem:[%s3183_s14 + $0xa0] sm:$0xff]  ;;  %v3262_v41 = vand.u32 4294901760, %v420_v38  ;;  %v3264_v42 = vand.u32 4294901760, %v418_v39  ;;  %s2643_s7 = sshll.u32 %s2305_s5, 3  ;;  %s2644_s18 = sshll.u32 %s2970_s19, 4 }
  0x6a   : > { %v3257_v37 = vand.u32 4294901760, %v422_v34  ;;  %v3266_v43 = vand.u32 4294901760, %v416_v40  ;;  %v414_v44 = vld [vmem:[%s3183_s14 + $0x90] sm:$0xff]  ;;  %v412_v45 = vld [vmem:[%s3183_s14 + $0x80] sm:$0xff]  ;;  %s2311_s10 = sadd.s32 %s2643_s7, %s2308_s27  ;;  %s2463_s8 = scalar_lea.hbm %s4692_s4, %s2644_s18 }
  0x6b   : > { %v424_v33 = vld [vmem:[%s3183_s14 + $0xe0] sm:$0xff]  ;;  %v3281_v49 = vand.u32 4294901760, %v414_v44  ;;  %v410_v50 = vld [vmem:[%s3183_s14 + $0x70] sm:$0xff]  ;;  %v3285_v51 = vsub.f32 %v420_v38, %v3262_v41  ;;  %v3288_v52 = vsub.f32 %v418_v39, %v3264_v42  ;;  %v3298_v57 = vand.u32 4294901760, %v412_v45  ;;  %s2312_s12 = scalar_lea.vmem %s3174_s28, %s2311_s10 [#allocation7]  ;;  %s2314_s25 = scalar_lea.vmem %s3177_s13, %s2311_s10 [#allocation8] }
  0x6c   : > { %v3255_v36 = vand.u32 4294901760, %v424_v33  ;;  %v3279_v48 = vsub.f32 %v422_v34, %v3257_v37  ;;  %v3291_v53 = vsub.f32 %v416_v40, %v3266_v43  ;;  %v408_v58 = vld [vmem:[%s3183_s14 + $0x60] sm:$0xff]  ;;  %v3303_v60 = vand.u32 4294901760, %v410_v50  ;;  %v406_v4 = vld [vmem:[%s3183_s14 + $0x50] sm:$0xff]  ;;  %s2464_s19 = sshll.u32 %s3183_s14, 4  ;;  %s2466_s9 = sshll.u32 %s2463_s8, 4  ;;  %s2465_s19 = int_to_ptr.vmem [resolvable:$true] %s2464_s19  ;;  %s2467_s9 = int_to_ptr.hbm [resolvable:$true] %s2466_s9 }
  0x6d   : > { %v426_v32 = vld [vmem:[%s3183_s14 + $0xf0] sm:$0xff]  ;;  %v4709_v59 = vand.u32 4294901760, %v3285_v51  ;;  %v3306_v61 = vsub.f32 %v414_v44, %v3281_v49  ;;  %v4708_v1 = vand.u32 4294901760, %v3288_v52  ;;  %v3321_v2 = vand.u32 4294901760, %v408_v58  ;;  %v404_v9 = vld [vmem:[%s3183_s14 + $0x40] sm:$0xff]  ;;  %s2452_s29 = scalar_lea.sflag [#allocation4], %s3164_s20 }
  0x6e   : > { %v3253_v35 = vand.u32 4294901760, %v426_v32  ;;  %v3276_v47 = vsub.f32 %v424_v33, %v3255_v36  ;;  %v4713_v56 = vand.u32 4294901760, %v3279_v48  ;;  %v4706_v3 = vand.u32 4294901760, %v3291_v53  ;;  %v402_v17 = vld [vmem:[%s3183_s14 + $0x30] sm:$0xff]  ;;  %v400_v23 = vld [vmem:[%s3183_s14 + $0x20] sm:$0xff]  ;;  %v427_v31 = vld [vmem:[%s3183_s14 + $0xf8] sm:$0xff] }
  0x6f   : > { %v626_v7 = vsub.f32 %v3285_v51, %v4709_v59  ;;  %v3331_v8 = vsub.f32 %v412_v45, %v3298_v57  ;;  %v4705_v10 = vand.u32 4294901760, %v3306_v61  ;;  %v3337_v11 = vsub.f32 %v410_v50, %v3303_v60  ;;  %v428_v24 = vld [vmem:[#allocation2] sm:$0xff]  ;;  %v398_v28 = vld [vmem:[%s3183_s14 + $0x10] sm:$0xff]  ;;  %s2890_s1 = sshra.s32 %s2467_s9, 4  ;;  %s2896_s21 = scalar_lea.hbm %s4692_s4, 512  ;;  %s2891_s1 = int_to_ptr.hbm [resolvable:$true] %s2890_s1 }
  0x70   : > { %445 = vmatpush.msra.mxu0 %v3253_v35  ;;  %v3272_v46 = vsub.f32 %v426_v32, %v3253_v35  ;;  %896 = vmatpush.msra.mxu3 %v3253_v35  ;;  %v4715_v55 = vand.u32 4294901760, %v3276_v47  ;;  %v620_v0 = vsub.f32 %v3279_v48, %v4713_v56  ;;  %v632_v13 = vsub.f32 %v3288_v52, %v4708_v1  ;;  %v396_v45 = vld [vmem:[%s3183_s14] sm:$0xff]  ;;  %s2892_s0 = scalar_lea.hbm %s2891_s1, 256  ;;  %p2897_p10 = scmp.lt.s32.totalorder %s2891_s1, %s4692_s4 }
  0x71   : > { %v3343_v14 = vand.u32 4294901760, %v406_v4  ;;  %v638_v15 = vsub.f32 %v3291_v53, %v4706_v3  ;;  %v3350_v16 = vand.u32 4294901760, %v404_v9  ;;  %v627_v18 = vand.u32 4294901760, %v626_v7  ;;  %p2893_p7 = scmp.ne.s32.totalorder %s2891_s1, %s2892_s0  ;;  %p2898_p11 = scmp.lt.s32.totalorder %s2896_s21, %s2892_s0 }
  0x72   : > { %447 = vmatpush.msra.mxu0 %v3255_v36  ;;  %768 = vmatpush.msra.mxu2 %v3272_v46  ;;  %v4716_v54 = vand.u32 4294901760, %v3272_v46  ;;  %v614_v63 = vsub.f32 %v3276_v47, %v4715_v55  ;;  %v621_v12 = vand.u32 4294901760, %v620_v0  ;;  %v4704_v19 = vand.u32 4294901760, %v3331_v8  ;;  %v429_v0 = vld [vmem:[#allocation2 + $0x8] sm:$0xff] }
  0x73   : > { %898 = vmatpush.msra.mxu3 %v3255_v36  ;;  %v3356_v20 = vsub.f32 %v408_v58, %v3321_v2  ;;  %v644_v21 = vsub.f32 %v3306_v61, %v4705_v10  ;;  %v4702_v22 = vand.u32 4294901760, %v3337_v11  ;;  %v633_v25 = vand.u32 4294901760, %v632_v13  ;;  %v421_v10 = vld [vmem:[%s3183_s14 + $0xc8] sm:$0xff]  ;;  %p2894_p8 = pnand %p2893_p7, %p3122_p0  ;;  %p2899_p12 = por %p2898_p11, %p2897_p10 }
  0x74   : > { %449 = vmatpush.msra.mxu0 %v3257_v37  ;;  %771 = vmatpush.msra.mxu2 %v3276_v47  ;;  %v608_v62 = vsub.f32 %v3272_v46, %v4716_v54  ;;  %v615_v6 = vand.u32 4294901760, %v614_v63  ;;  %v3366_v26 = vand.u32 4294901760, %v402_v17  ;;  %v3369_v27 = vsub.f32 %v406_v4, %v3343_v14  ;;  %v425_v4 = vld [vmem:[%s3183_s14 + $0xe8] sm:$0xff] }
  0x75   : > { %900 = vmatpush.msra.mxu3 %v3257_v37  ;;  %v639_v29 = vand.u32 4294901760, %v638_v15  ;;  %v3375_v30 = vsub.f32 %v404_v9, %v3350_v16  ;;  %v650_v32 = vsub.f32 %v3331_v8, %v4704_v19  ;;  %v3382_v33 = vand.u32 4294901760, %v400_v23  ;;  %p2895_p9 = pneg %p2894_p8 }
  0x76   : > { %451 = vmatpush.msra.mxu0 %v3262_v41  ;;  %v609_v5 = vand.u32 4294901760, %v608_v62  ;;  %774 = vmatpush.msra.mxu2 %v3279_v48  ;;  %v4701_v34 = vand.u32 4294901760, %v3356_v20  ;;  %v3385_v38 = vand.u32 4294901760, %v428_v24  ;;  %v645_v39 = vand.u32 4294901760, %v644_v21 }
  0x77   : > { %902 = vmatpush.msra.mxu3 %v3262_v41  ;;  %v656_v40 = vsub.f32 %v3337_v11, %v4702_v22  ;;  %v3392_v44 = vand.u32 4294901760, %v398_v28  ;;  %v4699_v50 = vand.u32 4294901760, %v3369_v27  ;;  %v3398_v58 = vsub.f32 %v402_v17, %v3366_v26  ;;  %p2900_p13 = pnand %p2899_p12, %p2895_p9 }
  0x78   : > { %453 = vmatpush.msra.mxu0 %v3264_v42  ;;  %610 = vmatpush.msra.mxu1 %v609_v5  ;;  %v3401_v62 = vsub.f32 %v428_v24, %v3385_v38  ;;  %v3403_v63 = vand.u32 4294901760, %v427_v31  ;;  %v4700_v5 = vand.u32 4294901760, %v3375_v30  ;;  %v662_v7 = vsub.f32 %v3356_v20, %v4701_v34 }
  0x79   : > { %777 = vmatpush.msra.mxu2 %v3285_v51  ;;  %904 = vmatpush.msra.mxu3 %v3264_v42  ;;  %v3413_v9 = vand.u32 4294901760, %v396_v45  ;;  %v657_v13 = vand.u32 4294901760, %v656_v40  ;;  %v3423_v17 = vand.u32 4294901760, %v429_v0  ;;  %v668_v21 = vsub.f32 %v3369_v27, %v4699_v50 }
  0x7a   : > { %455 = vmatpush.msra.mxu0 %v3266_v43  ;;  %616 = vmatpush.msra.mxu1 %v615_v6  ;;  %4787 = vst [vmem:[#allocation23_spill] sm:$0xff] %v3401_v62  ;;  %v651_v6 = vand.u32 4294901760, %v650_v32  ;;  %v3421_v15 = vand.u32 4294901760, %v3401_v62  ;;  %v3433_v24 = vsub.f32 %v398_v28, %v3392_v44  ;;  %v674_v32 = vsub.f32 %v3375_v30, %v4700_v5 }
  0x7b   : > { %780 = vmatpush.msra.mxu2 %v3288_v52  ;;  %906 = vmatpush.msra.mxu3 %v3266_v43  ;;  %v3447_v28 = vsub.f32 %v396_v45, %v3413_v9  ;;  %v3457_v5 = vsub.f32 %v429_v0, %v3423_v17  ;;  %v669_v45 = vand.u32 4294901760, %v668_v21 }
  0x7c   : > { %457 = vmatpush.msra.mxu0 %v3281_v49  ;;  %622 = vmatpush.msra.mxu1 %v621_v12  ;;  %v3416_v12 = vsub.f32 %v400_v23, %v3382_v33  ;;  %4788 = vst [vmem:[#allocation24_spill] sm:$0xff] %v3421_v15  ;;  %v4703_v23 = vand.u32 4294901760, %v3398_v58  ;;  %v479_v50 = vsub.f32 %v3401_v62, %v3421_v15  ;;  %v4710_v34 = vand.u32 4294901760, %v3433_v24 }
  0x7d   : > { %783 = vmatpush.msra.mxu2 %v3291_v53  ;;  %908 = vmatpush.msra.mxu3 %v3281_v49  ;;  %4789 = vst [vmem:[#allocation25_spill] sm:$0xff] %v3457_v5  ;;  %v675_v0 = vand.u32 4294901760, %v674_v32  ;;  %v4712_v21 = vand.u32 4294901760, %v3447_v28  ;;  %v3483_v32 = vand.u32 4294901760, %v3457_v5 }
  0x7e   : > { %459 = vmatpush.msra.mxu0 %v3298_v57  ;;  %628 = vmatpush.msra.mxu1 %v627_v18  ;;  %v3425_v18 = vand.u32 4294901760, %v425_v4  ;;  %v4707_v40 = vand.u32 4294901760, %v3416_v12  ;;  %v3480_v3 = vand.u32 4294901760, %v479_v50  ;;  %v692_v59 = vsub.f32 %v3433_v24, %v4710_v34 }
  0x7f   : > { %786 = vmatpush.msra.mxu2 %v3306_v61  ;;  %910 = vmatpush.msra.mxu3 %v3298_v57  ;;  %4790 = vst [vmem:[#allocation26_spill] sm:$0xff] %v3483_v32 }
  0x80   : > { %461 = vmatpush.msra.mxu0 %v3303_v60  ;;  %634 = vmatpush.msra.mxu1 %v633_v25  ;;  %v3436_v25 = vsub.f32 %v427_v31, %v3403_v63  ;;  %v3450_v31 = vsub.f32 %v425_v4, %v3425_v18  ;;  %v680_v4 = vsub.f32 %v3398_v58, %v4703_v23 }
  0x81   : > { %789 = vmatpush.msra.mxu2 %v3331_v8  ;;  %912 = vmatpush.msra.mxu3 %v3303_v60 }
  0x82   : > { %463 = vmatpush.msra.mxu0 %v3321_v2  ;;  %640 = vmatpush.msra.mxu1 %v639_v29  ;;  %v423_v29 = vld [vmem:[%s3183_s14 + $0xd8] sm:$0xff]  ;;  %v4711_v22 = vand.u32 4294901760, %v3436_v25  ;;  %v4714_v23 = vand.u32 4294901760, %v3450_v31  ;;  %v681_v1 = vand.u32 4294901760, %v680_v4  ;;  %v698_v4 = vsub.f32 %v3447_v28, %v4712_v21 }
  0x83   : > { %792 = vmatpush.msra.mxu2 %v3337_v11  ;;  %914 = vmatpush.msra.mxu3 %v3321_v2  ;;  %v693_v21 = vand.u32 4294901760, %v692_v59 }
  0x84   : > { %465 = vmatpush.msra.mxu0 %v3343_v14  ;;  %646 = vmatpush.msra.mxu1 %v645_v39  ;;  %v663_v39 = vand.u32 4294901760, %v662_v7  ;;  %v3459_v7 = vand.u32 4294901760, %v423_v29  ;;  %v1414_v50 = vsub.f32 %v3436_v25, %v4711_v22  ;;  %v1420_v34 = vsub.f32 %v3450_v31, %v4714_v23 }
  0x85   : > { %795 = vmatpush.msra.mxu2 %v3356_v20  ;;  %916 = vmatpush.msra.mxu3 %v3343_v14  ;;  %v699_v55 = vand.u32 4294901760, %v698_v4 }
  0x86   : > { %467 = vmatpush.msra.mxu0 %v3350_v16  ;;  %652 = vmatpush.msra.mxu1 %v651_v6  ;;  %v430_v6 = vld [vmem:[#allocation2 + $0x10] sm:$0xff]  ;;  %v1415_v56 = vand.u32 4294901760, %v1414_v50 }
  0x87   : > { %798 = vmatpush.msra.mxu2 %v3369_v27  ;;  %918 = vmatpush.msra.mxu3 %v3350_v16  ;;  %v3475_v19 = vand.u32 4294901760, %v430_v6 }
  0x88   : > { %469 = vmatpush.msra.mxu0 %v3366_v26  ;;  %658 = vmatpush.msra.mxu1 %v657_v13  ;;  %v686_v13 = vsub.f32 %v3416_v12, %v4707_v40  ;;  %v3488_v40 = vand.u32 4294901760, %v421_v10 }
  0x89   : > { %801 = vmatpush.msra.mxu2 %v3375_v30  ;;  %920 = vmatpush.msra.mxu3 %v3366_v26  ;;  %v3514_v22 = vsub.f32 %v430_v6, %v3475_v19  ;;  %v1421_v6 = vand.u32 4294901760, %v1420_v34  ;;  %v4795_v34 = vand.u32 4294901760, %v3276_v47 }
  0x8a   : > { %471 = vmatpush.msra.mxu0 %v3382_v33  ;;  %664 = vmatpush.msra.mxu1 %v663_v39  ;;  %v3486_v39 = vsub.f32 %v423_v29, %v3459_v7  ;;  %v3500_v29 = vsub.f32 %v421_v10, %v3488_v40  ;;  %v487_v10 = vsub.f32 %v3457_v5, %v3483_v32 }
  0x8b   : > { %804 = vmatpush.msra.mxu2 %v3398_v58  ;;  %922 = vmatpush.msra.mxu3 %v3382_v33  ;;  %4791 = vst [vmem:[#allocation27_spill] sm:$0xff] %v3514_v22  ;;  %v3531_v50 = vand.u32 4294901760, %v3514_v22 }
  0x8c   : > { %473 = vmatpush.msra.mxu0 %v3392_v44  ;;  %670 = vmatpush.msra.mxu1 %v669_v45  ;;  %v687_v45 = vand.u32 4294901760, %v686_v13  ;;  %v431_v13 = vld [vmem:[#allocation2 + $0x18] sm:$0xff]  ;;  %v3528_v59 = vand.u32 4294901760, %v487_v10  ;;  %v4794_v23 = vand.u32 4294901760, %v3486_v39 }
  0x8d   : > { %807 = vmatpush.msra.mxu2 %v3416_v12  ;;  %924 = vmatpush.msra.mxu3 %v3392_v44  ;;  %v3522_v54 = vand.u32 4294901760, %v431_v13  ;;  %4793 = vst [vmem:[#allocation28_spill] sm:$0xff] %v3531_v50 }
  0x8e   : > { %475 = vmatpush.msra.mxu0 %v3413_v9  ;;  %676 = vmatpush.msra.mxu1 %v675_v0  ;;  %v419_v0 = vld [vmem:[%s3183_s14 + $0xb8] sm:$0xff] }
  0x8f   : > { %481 = vmatmul.f32.vlgmr.msra.gmra.mxu0 %v3480_v3  ;;  %810 = vmatpush.msra.mxu2 %v3433_v24  ;;  %v3552_v47 = vsub.f32 %v431_v13, %v3522_v54  ;;  %v417_v13 = vld [vmem:[%s3183_s14 + $0xa8] sm:$0xff] }
  0x90   : > { %682 = vmatpush.msra.mxu1 %v681_v1  ;;  %926 = vmatpush.msra.mxu3 %v3413_v9  ;;  %v4792_v1 = vand.u32 4294901760, %v3272_v46  ;;  %v4796_v46 = vand.u32 4294901760, %v3500_v29 }
  0x91   : > { %813 = vmatpush.msra.mxu2 %v3447_v28  ;;  %930 = vmatmul.f32.vlgmr.msra.gmra.mxu3 %v3421_v15  ;;  %v3536_v15 = vand.u32 4294901760, %v419_v0  ;;  %4797 = vst [vmem:[#allocation29_spill] sm:$0xff] %v3552_v47 }
  0x92   : > { %688 = vmatpush.msra.mxu1 %v687_v45  ;;  %816 = vmatmul.f32.vlgmr.msra.gmra.mxu2 %v3401_v62  ;;  %v1426_v45 = vsub.f32 %v3486_v39, %v4794_v23  ;;  %v1432_v4 = vsub.f32 %v3500_v29, %v4796_v46  ;;  %v4800_v46 = vand.u32 4294901760, %v3285_v51  ;;  %v399_v62 = vld [vmem:[%s3183_s14 + $0x18] sm:$0xff] }
  0x93   : > { %1251 = vmatpush.msrb.mxu2 %v3403_v63  ;;  %1027 = vmatpush.msrb.mxu0 %v4792_v1  ;;  %v3545_v10 = vsub.f32 %v419_v0, %v3536_v15  ;;  %v4798_v0 = vand.u32 4294901760, %v3279_v48 }
  0x94   : > { %694 = vmatpush.msra.mxu1 %v693_v21  ;;  %1416 = vmatpush.msrb.mxu3 %v1415_v56  ;;  %v495_v56 = vsub.f32 %v3514_v22, %v3531_v50  ;;  %v1427_v23 = vand.u32 4294901760, %v1426_v45 }
  0x95   : > { %1253 = vmatpush.msrb.mxu2 %v3425_v18  ;;  %1031 = vmatpush.msrb.mxu0 %v4795_v34  ;;  %v4723_v21 = vand.u32 4294901760, %v3545_v10  ;;  %v3574_v34 = vand.u32 4294901760, %v417_v13 }
  0x96   : > { %700 = vmatpush.msra.mxu1 %v699_v55  ;;  %1422 = vmatpush.msrb.mxu3 %v1421_v6  ;;  %v432_v55 = vld [vmem:[#allocation2 + $0x20] sm:$0xff]  ;;  %v1433_v6 = vand.u32 4294901760, %v1432_v4  ;;  %v3566_v45 = vand.u32 4294901760, %v495_v56  ;;  %v4801_v56 = vand.u32 4294901760, %v3288_v52 }
  0x97   : > { %489 = vmatmul.f32.gmra.mxu0 %v3528_v59  ;;  %702 = vmatmul.f32.vlgmr.msra.gmra.mxu1 %v3385_v38  ;;  %v1438_v1 = vsub.f32 %v3545_v10, %v4723_v21  ;;  %v3572_v48 = vand.u32 4294901760, %v432_v55 }
  0x98   : > { %1154 = vmatpush.msrb.mxu1 %v3253_v35  ;;  %1255 = vmatpush.msrb.mxu2 %v3459_v7  ;;  %v3569_v35 = vand.u32 4294901760, %v3552_v47 }
  0x99   : > { %936 = vmatmul.f32.gmra.mxu3 %v3483_v32  ;;  %1035 = vmatpush.msrb.mxu0 %v4798_v0  ;;  %v1439_v4 = vand.u32 4294901760, %v1438_v1  ;;  %v3591_v51 = vsub.f32 %v432_v55, %v3572_v48  ;;  %v4803_v55 = vand.u32 4294901760, %v3291_v53 }
  0x9a   : > { %821 = vmatmul.f32.gmra.mxu2 %v3457_v5  ;;  %1156 = vmatpush.msrb.mxu1 %v3255_v36  ;;  %4799 = vst [vmem:[#allocation30_spill] sm:$0xff] %v3569_v35  ;;  %v3581_v36 = vsub.f32 %v417_v13, %v3574_v34 }
  0x9b   : > { %1428 = vmatpush.msrb.mxu3 %v1427_v23  ;;  %1257 = vmatpush.msrb.mxu2 %v3488_v40  ;;  %4802 = vst [vmem:[#allocation31_spill] sm:$0xff] %v3591_v51  ;;  %v433_v23 = vld [vmem:[#allocation2 + $0x28] sm:$0xff] }
  0x9c   : > { %1158 = vmatpush.msrb.mxu1 %v3257_v37  ;;  %1039 = vmatpush.msrb.mxu0 %v4800_v46  ;;  %v503_v37 = vsub.f32 %v3552_v47, %v3569_v35  ;;  %v4722_v0 = vand.u32 4294901760, %v3581_v36  ;;  %v3601_v52 = vand.u32 4294901760, %v433_v23 }
  0x9d   : > { %1434 = vmatpush.msrb.mxu3 %v1433_v6  ;;  %1259 = vmatpush.msrb.mxu2 %v3536_v15  ;;  %v415_v6 = vld [vmem:[%s3183_s14 + $0x98] sm:$0xff] }
  0x9e   : > { %1160 = vmatpush.msrb.mxu1 %v3262_v41  ;;  %1043 = vmatpush.msrb.mxu0 %v4801_v56  ;;  %v1444_v41 = vsub.f32 %v3581_v36, %v4722_v0  ;;  %v3606_v1 = vand.u32 4294901760, %v503_v37  ;;  %v3612_v46 = vand.u32 4294901760, %v415_v6  ;;  %v3621_v56 = vsub.f32 %v433_v23, %v3601_v52  ;;  %v438_v0 = vld [vmem:[#allocation2 + $0x50] sm:$0xff] }
  0x9f   : > { %497 = vmatmul.f32.gmra.mxu0 %v3566_v45  ;;  %706 = vmatmul.f32.gmra.mxu1 %v3423_v17  ;;  %v4807_v37 = vand.u32 4294901760, %v3331_v8  ;;  %v4808_v23 = vand.u32 4294901760, %v3337_v11 }
  0xa0   : > { %1440 = vmatpush.msrb.mxu3 %v1439_v4  ;;  %1162 = vmatpush.msrb.mxu1 %v3264_v42  ;;  %v3609_v42 = vand.u32 4294901760, %v3591_v51  ;;  %v1445_v13 = vand.u32 4294901760, %v1444_v41  ;;  %v4805_v4 = vand.u32 4294901760, %v3306_v61  ;;  %v3618_v53 = vsub.f32 %v415_v6, %v3612_v46  ;;  %4806 = vst [vmem:[#allocation33_spill] sm:$0xff] %v3621_v56  ;;  %v434_v41 = vld [vmem:[#allocation2 + $0x30] sm:$0xff] }
  0xa1   : > { %942 = vmatmul.f32.gmra.mxu3 %v3531_v50  ;;  %1261 = vmatpush.msrb.mxu2 %v3574_v34  ;;  %v3640_v8 = vand.u32 4294901760, %v3621_v56 }
  0xa2   : > { %826 = vmatmul.f32.gmra.mxu2 %v3514_v22  ;;  %1047 = vmatpush.msrb.mxu0 %v4803_v55  ;;  %4804 = vst [vmem:[#allocation32_spill] sm:$0xff] %v3609_v42  ;;  %v4720_v61 = vand.u32 4294901760, %v3618_v53  ;;  %v413_v55 = vld [vmem:[%s3183_s14 + $0x88] sm:$0xff] }
  0xa3   : > { %1164 = vmatpush.msrb.mxu1 %v3266_v43  ;;  %1446 = vmatpush.msrb.mxu3 %v1445_v13  ;;  %v511_v43 = vsub.f32 %v3591_v51, %v3609_v42  ;;  %4809 = vst [vmem:[#allocation34_spill] sm:$0xff] %v3640_v8  ;;  %v3648_v13 = vand.u32 4294901760, %v413_v55 }
  0xa4   : > { %1051 = vmatpush.msrb.mxu0 %v4805_v4  ;;  %1263 = vmatpush.msrb.mxu2 %v3612_v46  ;;  %v4810_v4 = vand.u32 4294901760, %v3356_v20 }
  0xa5   : > { %1166 = vmatpush.msrb.mxu1 %v3281_v49  ;;  %v1450_v49 = vsub.f32 %v3618_v53, %v4720_v61  ;;  %v3644_v6 = vand.u32 4294901760, %v511_v43  ;;  %v4811_v43 = vand.u32 4294901760, %v3369_v27 }
  0xa6   : > { %1055 = vmatpush.msrb.mxu0 %v4807_v37  ;;  %1265 = vmatpush.msrb.mxu2 %v3648_v13  ;;  %v3655_v37 = vsub.f32 %v413_v55, %v3648_v13  ;;  %v4814_v55 = vand.u32 4294901760, %v3398_v58  ;;  %v4817_v58 = vand.u32 4294901760, %v3433_v24 }
  0xa7   : > { %505 = vmatmul.f32.gmra.mxu0 %v3606_v1  ;;  %710 = vmatmul.f32.gmra.mxu1 %v3475_v19  ;;  %v1451_v11 = vand.u32 4294901760, %v1450_v49  ;;  %v4813_v49 = vand.u32 4294901760, %v3375_v30 }
  0xa8   : > { %1168 = vmatpush.msrb.mxu1 %v3298_v57  ;;  %1059 = vmatpush.msrb.mxu0 %v4808_v23  ;;  %v3646_v57 = vand.u32 4294901760, %v434_v41  ;;  %v4719_v20 = vand.u32 4294901760, %v3655_v37  ;;  %v435_v23 = vld [vmem:[#allocation2 + $0x38] sm:$0xff] }
  0xa9   : > { %948 = vmatmul.f32.gmra.mxu3 %v3569_v35  ;;  %v3684_v30 = vand.u32 4294901760, %v435_v23 }
  0xaa   : > { %831 = vmatmul.f32.gmra.mxu2 %v3552_v47  ;;  %1170 = vmatpush.msrb.mxu1 %v3303_v60  ;;  %v519_v60 = vsub.f32 %v3621_v56, %v3640_v8 }
  0xab   : > { %1063 = vmatpush.msrb.mxu0 %v4810_v4  ;;  %1452 = vmatpush.msrb.mxu3 %v1451_v11 }
  0xac   : > { %1172 = vmatpush.msrb.mxu1 %v3321_v2  ;;  %v3665_v2 = vsub.f32 %v434_v41, %v3646_v57  ;;  %v3676_v27 = vand.u32 4294901760, %v519_v60  ;;  %v411_v41 = vld [vmem:[%s3183_s14 + $0x78] sm:$0xff] }
  0xad   : > { %1067 = vmatpush.msrb.mxu0 %v4811_v43  ;;  %v3686_v4 = vand.u32 4294901760, %v411_v41  ;;  %v4816_v43 = vand.u32 4294901760, %v3416_v12  ;;  %v3703_v12 = vsub.f32 %v435_v23, %v3684_v30 }
  0xae   : > { %1174 = vmatpush.msrb.mxu1 %v3343_v14  ;;  %4812 = vst [vmem:[#allocation35_spill] sm:$0xff] %v3665_v2  ;;  %v1456_v14 = vsub.f32 %v3655_v37, %v4719_v20  ;;  %v3682_v11 = vand.u32 4294901760, %v3665_v2 }
  0xaf   : > { %513 = vmatmul.f32.gmra.mxu0 %v3644_v6  ;;  %714 = vmatmul.f32.gmra.mxu1 %v3522_v54  ;;  %v3693_v60 = vsub.f32 %v411_v41, %v3686_v4  ;;  %4818 = vst [vmem:[#allocation37_spill] sm:$0xff] %v3703_v12  ;;  %v409_v41 = vld [vmem:[%s3183_s14 + $0x68] sm:$0xff] }
  0xb0   : > { %1071 = vmatpush.msrb.mxu0 %v4813_v49  ;;  %1176 = vmatpush.msrb.mxu1 %v3350_v16  ;;  %4815 = vst [vmem:[#allocation36_spill] sm:$0xff] %v3682_v11  ;;  %v1457_v16 = vand.u32 4294901760, %v1456_v14  ;;  %v436_v49 = vld [vmem:[#allocation2 + $0x40] sm:$0xff] }
  0xb1   : > { %954 = vmatmul.f32.gmra.mxu3 %v3609_v42  ;;  %1267 = vmatpush.msrb.mxu2 %v3686_v4  ;;  %v4718_v14 = vand.u32 4294901760, %v3693_v60  ;;  %v3715_v23 = vand.u32 4294901760, %v436_v49 }
  0xb2   : > { %836 = vmatmul.f32.gmra.mxu2 %v3591_v51  ;;  %1075 = vmatpush.msrb.mxu0 %v4814_v55 }
  0xb3   : > { %1178 = vmatpush.msrb.mxu1 %v3366_v26  ;;  %1458 = vmatpush.msrb.mxu3 %v1457_v16  ;;  %v527_v26 = vsub.f32 %v3665_v2, %v3682_v11  ;;  %v1462_v24 = vsub.f32 %v3693_v60, %v4718_v14  ;;  %4820 = vst [vmem:[#allocation38_spill] sm:$0xff] %v3715_v23  ;;  %v3724_v16 = vand.u32 4294901760, %v409_v41 }
  0xb4   : > { %1079 = vmatpush.msrb.mxu0 %v4816_v43 }
  0xb5   : > { %1180 = vmatpush.msrb.mxu1 %v3382_v33  ;;  %v4819_v33 = vand.u32 4294901760, %v3447_v28  ;;  %v3719_v55 = vand.u32 4294901760, %v527_v26  ;;  %v1463_v28 = vand.u32 4294901760, %v1462_v24  ;;  %1269 = vmatpush.msrb.mxu2 %v3724_v16  ;;  %v3730_v43 = vsub.f32 %v409_v41, %v3724_v16  ;;  %v407_v41 = vld [vmem:[%s3183_s14 + $0x58] sm:$0xff] }
  0xb6   : > { %1083 = vmatpush.msrb.mxu0 %v4817_v58  ;;  %v3758_v61 = vand.u32 4294901760, %v407_v41 }
  0xb7   : > { %521 = vmatmul.f32.gmra.mxu0 %v3676_v27  ;;  %718 = vmatmul.f32.gmra.mxu1 %v3572_v48  ;;  %v4721_v26 = vand.u32 4294901760, %v3730_v43 }
  0xb8   : > { %1182 = vmatpush.msrb.mxu1 %v3392_v44  ;;  %1087 = vmatpush.msrb.mxu0 %v4819_v33  ;;  %v3722_v44 = vand.u32 4294901760, %v3703_v12  ;;  %v437_v33 = vld [vmem:[#allocation2 + $0x48] sm:$0xff] }
  0xb9   : > { %960 = vmatmul.f32.gmra.mxu3 %v3640_v8  ;;  %v3756_v14 = vand.u32 4294901760, %v437_v33  ;;  %1271 = vmatpush.msrb.mxu2 %v3758_v61  ;;  %v3790_v8 = vand.u32 4294901760, %v438_v0 }
  0xba   : > { %1574 = vmatpush.msra.mxu0 %v3436_v25  ;;  %841 = vmatmul.f32.gmra.mxu2 %v3621_v56  ;;  %4821 = vst [vmem:[#allocation39_spill] sm:$0xff] %v3722_v44  ;;  %v535_v58 = vsub.f32 %v3703_v12, %v3722_v44  ;;  %v403_v56 = vld [vmem:[%s3183_s14 + $0x38] sm:$0xff] }
  0xbb   : > { %1184 = vmatpush.msrb.mxu1 %v3413_v9  ;;  %1464 = vmatpush.msrb.mxu3 %v1463_v28  ;;  %v3733_v9 = vsub.f32 %v436_v49, %v3715_v23  ;;  %v1468_v49 = vsub.f32 %v3730_v43, %v4721_v26  ;;  %4825 = vst [vmem:[#allocation43_spill] sm:$0xff] %v3756_v14  ;;  %v3826_v50 = vand.u32 4294901760, %v403_v56 }
  0xbc   : > { %1577 = vmatpush.msra.mxu0 %v3450_v31  ;;  %v3754_v28 = vand.u32 4294901760, %v535_v58  ;;  %v3764_v26 = vsub.f32 %v407_v41, %v3758_v61  ;;  %4829 = vst [vmem:[#allocation47_spill] sm:$0xff] %v3790_v8 }
  0xbd   : > { %1702 = vmatpush.msra.mxu1 %v3403_v63  ;;  %4822 = vst [vmem:[#allocation40_spill] sm:$0xff] %v3733_v9  ;;  %v3750_v24 = vand.u32 4294901760, %v3733_v9  ;;  %v1469_v20 = vand.u32 4294901760, %v1468_v49  ;;  %v3773_v49 = vsub.f32 %v437_v33, %v3756_v14 }
  0xbe   : > { %1580 = vmatpush.msra.mxu0 %v3486_v39  ;;  %4824 = vst [vmem:[#allocation42_spill] sm:$0xff] %v3754_v28 }
  0xbf   : > { %1704 = vmatpush.msra.mxu1 %v3425_v18  ;;  %529 = vmatmul.f32.gmra.mxu0 %v3719_v55  ;;  %4823 = vst [vmem:[#allocation41_spill] sm:$0xff] %v3750_v24  ;;  %v543_v58 = vsub.f32 %v3733_v9, %v3750_v24  ;;  %v3788_v33 = vand.u32 4294901760, %v3773_v49 }
  0xc0   : > { %722 = vmatmul.f32.gmra.mxu1 %v3601_v52  ;;  %1583 = vmatpush.msra.mxu0 %v3500_v29  ;;  %4826 = vst [vmem:[#allocation44_spill] sm:$0xff] %v3773_v49 }
  0xc1   : > { %1706 = vmatpush.msra.mxu1 %v3459_v7  ;;  %966 = vmatmul.f32.gmra.mxu3 %v3682_v11  ;;  %v3783_v21 = vand.u32 4294901760, %v543_v58  ;;  %v405_v11 = vld [vmem:[%s3183_s14 + $0x48] sm:$0xff]  ;;  %4828 = vst [vmem:[#allocation46_spill] sm:$0xff] %v3788_v33 }
  0xc2   : > { %846 = vmatmul.f32.gmra.mxu2 %v3665_v2  ;;  %1586 = vmatpush.msra.mxu0 %v3545_v10  ;;  %v3792_v42 = vand.u32 4294901760, %v405_v11 }
  0xc3   : > { %1708 = vmatpush.msra.mxu1 %v3488_v40  ;;  %1470 = vmatpush.msrb.mxu3 %v1469_v20  ;;  %v4728_v20 = vand.u32 4294901760, %v3764_v26  ;;  %4827 = vst [vmem:[#allocation45_spill] sm:$0xff] %v3783_v21 }
  0xc4   : > { %1589 = vmatpush.msra.mxu0 %v3581_v36  ;;  %1273 = vmatpush.msrb.mxu2 %v3792_v42  ;;  %v3798_v58 = vsub.f32 %v405_v11, %v3792_v42 }
  0xc5   : > { %1710 = vmatpush.msra.mxu1 %v3536_v15  ;;  %v1474_v41 = vsub.f32 %v3764_v26, %v4728_v20  ;;  %v3807_v20 = vsub.f32 %v438_v0, %v3790_v8 }
  0xc6   : > { %1592 = vmatpush.msra.mxu0 %v3618_v53  ;;  %1275 = vmatpush.msrb.mxu2 %v3826_v50 }
  0xc7   : > { %1712 = vmatpush.msra.mxu1 %v3574_v34  ;;  %537 = vmatmul.f32.gmra.mxu0 %v3754_v28  ;;  %v1475_v2 = vand.u32 4294901760, %v1474_v41  ;;  %v551_v41 = vsub.f32 %v3773_v49, %v3788_v33  ;;  %4830 = vst [vmem:[#allocation48_spill] sm:$0xff] %v3807_v20  ;;  %v3824_v35 = vand.u32 4294901760, %v3807_v20 }
  0xc8   : > { %726 = vmatmul.f32.gmra.mxu1 %v3646_v57  ;;  %1595 = vmatpush.msra.mxu0 %v3655_v37 }
  0xc9   : > { %1714 = vmatpush.msra.mxu1 %v3612_v46  ;;  %972 = vmatmul.f32.gmra.mxu3 %v3722_v44  ;;  %v4735_v44 = vand.u32 4294901760, %v3798_v58  ;;  %v3821_v0 = vand.u32 4294901760, %v551_v41  ;;  %4832 = vst [vmem:[#allocation50_spill] sm:$0xff] %v3824_v35 }
  0xca   : > { %851 = vmatmul.f32.gmra.mxu2 %v3703_v12  ;;  %1598 = vmatpush.msra.mxu0 %v3693_v60 }
  0xcb   : > { %1716 = vmatpush.msra.mxu1 %v3648_v13  ;;  %1476 = vmatpush.msrb.mxu3 %v1475_v2  ;;  %v439_v2 = vld [vmem:[#allocation2 + $0x58] sm:$0xff]  ;;  %v1480_v11 = vsub.f32 %v3798_v58, %v4735_v44  ;;  %4831 = vst [vmem:[#allocation49_spill] sm:$0xff] %v3821_v0  ;;  %v3832_v44 = vsub.f32 %v403_v56, %v3826_v50 }
  0xcc   : > { %1601 = vmatpush.msra.mxu0 %v3730_v43  ;;  %v3817_v12 = vand.u32 4294901760, %v439_v2 }
  0xcd   : > { %1718 = vmatpush.msra.mxu1 %v3686_v4  ;;  %v1481_v51 = vand.u32 4294901760, %v1480_v11  ;;  %v559_v11 = vsub.f32 %v3807_v20, %v3824_v35 }
  0xce   : > { %1604 = vmatpush.msra.mxu0 %v3764_v26  ;;  %v3835_v41 = vsub.f32 %v439_v2, %v3817_v12 }
  0xcf   : > { %545 = vmatmul.f32.gmra.mxu0 %v3783_v21  ;;  %1720 = vmatpush.msra.mxu1 %v3724_v16  ;;  %v3853_v47 = vand.u32 4294901760, %v559_v11 }
  0xd0   : > { %730 = vmatmul.f32.gmra.mxu1 %v3684_v30  ;;  %1607 = vmatpush.msra.mxu0 %v3798_v58  ;;  %4833 = vst [vmem:[#allocation51_spill] sm:$0xff] %v3835_v41  ;;  %v3850_v2 = vand.u32 4294901760, %v3835_v41 }
  0xd1   : > { %978 = vmatmul.f32.gmra.mxu3 %v3750_v24  ;;  %1722 = vmatpush.msra.mxu1 %v3758_v61  ;;  %v4743_v24 = vand.u32 4294901760, %v3832_v44  ;;  %4835 = vst [vmem:[#allocation53_spill] sm:$0xff] %v3853_v47 }
  0xd2   : > { %856 = vmatmul.f32.gmra.mxu2 %v3733_v9  ;;  %1482 = vmatpush.msrb.mxu3 %v1481_v51  ;;  %v440_v51 = vld [vmem:[#allocation2 + $0x60] sm:$0xff]  ;;  %4834 = vst [vmem:[#allocation52_spill] sm:$0xff] %v3850_v2  ;;  %v401_v9 = vld [vmem:[%s3183_s14 + $0x28] sm:$0xff] }
  0xd3   : > { %1724 = vmatpush.msra.mxu1 %v3792_v42  ;;  %1610 = vmatpush.msra.mxu0 %v3832_v44  ;;  %v1486_v56 = vsub.f32 %v3832_v44, %v4743_v24  ;;  %v3855_v32 = vand.u32 4294901760, %v440_v51  ;;  %v3857_v5 = vand.u32 4294901760, %v401_v9  ;;  %v567_v24 = vsub.f32 %v3835_v41, %v3850_v2 }
  0xd5   : > { %1726 = vmatpush.msra.mxu1 %v3826_v50  ;;  %v1487_v22 = vand.u32 4294901760, %v1486_v56  ;;  %1277 = vmatpush.msrb.mxu2 %v3857_v5  ;;  %v3869_v11 = vsub.f32 %v440_v51, %v3855_v32 }
  0xd7   : > { %553 = vmatmul.f32.gmra.mxu0 %v3821_v0  ;;  %1488 = vmatpush.msrb.mxu3 %v1487_v22  ;;  %v441_v22 = vld [vmem:[#allocation2 + $0x68] sm:$0xff]  ;;  %v3882_v51 = vand.u32 4294901760, %v3869_v11 }
  0xd8   : > { %734 = vmatmul.f32.gmra.mxu1 %v3715_v23 }
  0xd9   : > { %984 = vmatmul.f32.gmra.mxu3 %v3788_v33  ;;  %v3861_v33 = vsub.f32 %v401_v9, %v3857_v5  ;;  %1728 = vmatpush.msra.mxu1 %v3857_v5 }
  0xda   : > { %861 = vmatmul.f32.gmra.mxu2 %v3773_v49  ;;  %v3878_v49 = vand.u32 4294901760, %v567_v24  ;;  %v575_v24 = vsub.f32 %v3869_v11, %v3882_v51 }
  0xdb   : > { %v4751_v56 = vand.u32 4294901760, %v3861_v33  ;;  %1613 = vmatpush.msra.mxu0 %v3861_v33 }
  0xdc   : > { %4836 = vst [vmem:[#allocation54_spill] sm:$0xff] %v3878_v49 }
  0xdd   : > { %v1492_v9 = vsub.f32 %v3861_v33, %v4751_v56 }
  0xdf   : > { %561 = vmatmul.f32.gmra.mxu0 %v3853_v47  ;;  %v3884_v47 = vand.u32 4294901760, %v441_v22  ;;  %v1493_v0 = vand.u32 4294901760, %v1492_v9 }
  0xe0   : > { %738 = vmatmul.f32.gmra.mxu1 %v3756_v14  ;;  %v3886_v14 = vand.u32 4294901760, %v399_v62 }
  0xe1   : > { %990 = vmatmul.f32.gmra.mxu3 %v3824_v35  ;;  %v3898_v56 = vsub.f32 %v441_v22, %v3884_v47  ;;  %v3914_v22 = vand.u32 4294901760, %v575_v24 }
  0xe2   : > { %866 = vmatmul.f32.gmra.mxu2 %v3807_v20  ;;  %1494 = vmatpush.msrb.mxu3 %v1493_v0  ;;  %v3890_v35 = vsub.f32 %v399_v62, %v3886_v14  ;;  %v397_v0 = vld [vmem:[%s3183_s14 + $0x8] sm:$0xff]  ;;  %v442_v20 = vld [vmem:[#allocation2 + $0x70] sm:$0xff] }
  0xe3   : > { %1279 = vmatpush.msrb.mxu2 %v3886_v14  ;;  %1730 = vmatpush.msra.mxu1 %v3886_v14  ;;  %v3902_v21 = vand.u32 4294901760, %v397_v0  ;;  %v3919_v23 = vand.u32 4294901760, %v442_v20 }
  0xe4   : > { %v4761_v9 = vand.u32 4294901760, %v3890_v35  ;;  %1616 = vmatpush.msra.mxu0 %v3890_v35 }
  0xe5   : > { %1732 = vmatpush.msra.mxu1 %v3902_v21  ;;  %1281 = vmatpush.msrb.mxu2 %v3902_v21 }
  0xe6   : > { %v1498_v62 = vsub.f32 %v3890_v35, %v4761_v9  ;;  %v4837_v9 = vand.u32 4294901760, %v3436_v25  ;;  %v3936_v25 = vsub.f32 %v442_v20, %v3919_v23  ;;  %v4840_v20 = vand.u32 4294901760, %v3500_v29 }
  0xe7   : > { %569 = vmatmul.f32.gmra.mxu0 %v3878_v49  ;;  %v3911_v49 = vsub.f32 %v397_v0, %v3902_v21  ;;  %v4838_v0 = vand.u32 4294901760, %v3450_v31 }
  0xe8   : > { %742 = vmatmul.f32.gmra.mxu1 %v3790_v8  ;;  %v3917_v8 = vand.u32 4294901760, %v3898_v56  ;;  %v1499_v28 = vand.u32 4294901760, %v1498_v62  ;;  %1833 = vmatpush.msra.mxu2 %v4837_v9  ;;  %v443_v9 = vld [vmem:[#allocation2 + $0x78] sm:$0xff] }
  0xe9   : > { %996 = vmatmul.f32.gmra.mxu3 %v3850_v2  ;;  %v4763_v2 = vand.u32 4294901760, %v3911_v49  ;;  %1619 = vmatpush.msra.mxu0 %v3911_v49 }
  0xea   : > { %871 = vmatmul.f32.gmra.mxu2 %v3835_v41  ;;  %1500 = vmatpush.msrb.mxu3 %v1499_v28  ;;  %v583_v62 = vsub.f32 %v3898_v56, %v3917_v8  ;;  %v4839_v28 = vand.u32 4294901760, %v3486_v39  ;;  %v4841_v39 = vand.u32 4294901760, %v3545_v10  ;;  %v4843_v10 = vand.u32 4294901760, %v3618_v53 }
  0xeb   : > { %v1504_v24 = vsub.f32 %v3911_v49, %v4763_v2  ;;  %1837 = vmatpush.msra.mxu2 %v4838_v0  ;;  %v3945_v0 = vand.u32 4294901760, %v3936_v25  ;;  %v3947_v2 = vand.u32 4294901760, %v443_v9  ;;  %v4847_v53 = vand.u32 4294901760, %v3764_v26 }
  0xec   : > { %v3942_v31 = vand.u32 4294901760, %v583_v62 }
  0xed   : > { %v1505_v41 = vand.u32 4294901760, %v1504_v24  ;;  %1841 = vmatpush.msra.mxu2 %v4839_v28  ;;  %v3960_v24 = vsub.f32 %v443_v9, %v3947_v2 }
  0xef   : > { %577 = vmatmul.f32.gmra.mxu0 %v3914_v22  ;;  %1506 = vmatpush.msrb.mxu3 %v1505_v41  ;;  %v591_v41 = vsub.f32 %v3936_v25, %v3945_v0  ;;  %v3971_v29 = vand.u32 4294901760, %v3960_v24 }
  0xf0   : > { %746 = vmatmul.f32.gmra.mxu1 %v3817_v12  ;;  %1845 = vmatpush.msra.mxu2 %v4840_v20 }
  0xf1   : > { %1002 = vmatmul.f32.gmra.mxu3 %v3882_v51 }
  0xf2   : > { %876 = vmatmul.f32.gmra.mxu2 %v3869_v11  ;;  %1960 = vmatpush.msra.mxu3 %v3403_v63  ;;  %v4842_v63 = vand.u32 4294901760, %v3581_v36  ;;  %v4845_v36 = vand.u32 4294901760, %v3693_v60 }
  0xf3   : > { %1849 = vmatpush.msra.mxu2 %v4841_v39 }
  0xf4   : > { %1962 = vmatpush.msra.mxu3 %v3425_v18  ;;  %v3968_v18 = vand.u32 4294901760, %v591_v41 }
  0xf5   : > { %1853 = vmatpush.msra.mxu2 %v4842_v63 }
  0xf6   : > { %1964 = vmatpush.msra.mxu3 %v3459_v7  ;;  %v4844_v7 = vand.u32 4294901760, %v3655_v37 }
  0xf7   : > { %585 = vmatmul.f32.gmra.mxu0 %v3942_v31  ;;  %1857 = vmatpush.msra.mxu2 %v4843_v10 }
  0xf8   : > { %750 = vmatmul.f32.gmra.mxu1 %v3855_v32  ;;  %1966 = vmatpush.msra.mxu3 %v3488_v40  ;;  %v599_v40 = vsub.f32 %v3960_v24, %v3971_v29 }
  0xf9   : > { %1008 = vmatmul.f32.gmra.mxu3 %v3917_v8  ;;  %1861 = vmatpush.msra.mxu2 %v4844_v7 }
  0xfa   : > { %881 = vmatmul.f32.gmra.mxu2 %v3898_v56  ;;  %1968 = vmatpush.msra.mxu3 %v3536_v15  ;;  %v3989_v15 = vand.u32 4294901760, %v599_v40 }
  0xfb   : > { %1865 = vmatpush.msra.mxu2 %v4845_v36 }
  0xfc   : > { %1970 = vmatpush.msra.mxu3 %v3574_v34  ;;  %v4846_v34 = vand.u32 4294901760, %v3730_v43 }
  0xfe   : > { %1972 = vmatpush.msra.mxu3 %v3612_v46  ;;  %1869 = vmatpush.msra.mxu2 %v4846_v34  ;;  %v4848_v46 = vand.u32 4294901760, %v3798_v58 }
  0xff   : > { %593 = vmatmul.f32.gmra.mxu0 %v3968_v18 }
 0x100   : > { %754 = vmatmul.f32.gmra.mxu1 %v3884_v47  ;;  %1974 = vmatpush.msra.mxu3 %v3648_v13  ;;  %v4849_v13 = vand.u32 4294901760, %v3832_v44 }
 0x101   : > { %1014 = vmatmul.f32.gmra.mxu3 %v3945_v0  ;;  %1873 = vmatpush.msra.mxu2 %v4847_v53 }
 0x102   : > { %886 = vmatmul.f32.gmra.mxu2 %v3936_v25  ;;  %1976 = vmatpush.msra.mxu3 %v3686_v4  ;;  %v4850_v4 = vand.u32 4294901760, %v3861_v33 }
 0x103   : > { %1877 = vmatpush.msra.mxu2 %v4848_v46 }
 0x104   : > { %1978 = vmatpush.msra.mxu3 %v3724_v16 }
 0x105   : > { %1881 = vmatpush.msra.mxu2 %v4849_v13 }
 0x106   : > { %1980 = vmatpush.msra.mxu3 %v3758_v61  ;;  %v4851_v61 = vand.u32 4294901760, %v3890_v35 }
 0x107   : > { %601 = vmatmul.f32.gmra.mxu0 %v3989_v15  ;;  %1885 = vmatpush.msra.mxu2 %v4850_v4 }
 0x108   : > { %758 = vmatmul.f32.gmra.mxu1 %v3919_v23  ;;  %1982 = vmatpush.msra.mxu3 %v3792_v42 }
 0x109   : > { %1020 = vmatmul.f32.gmra.mxu3 %v3971_v29  ;;  %1889 = vmatpush.msra.mxu2 %v4851_v61 }
 0x10a   : > { %891 = vmatmul.f32.gmra.mxu2 %v3960_v24  ;;  %1984 = vmatpush.msra.mxu3 %v3826_v50  ;;  %v4852_v50 = vand.u32 4294901760, %v3911_v49 }
 0x10c   : > { %v482_v37 = vpop.f32.mrf.mxu0  ;;  %1986 = vmatpush.msra.mxu3 %v3857_v5  ;;  %1893 = vmatpush.msra.mxu2 %v4852_v50 }
 0x10e   : > { %1988 = vmatpush.msra.mxu3 %v3886_v14 }
 0x10f   : > { %1089 = vmatmul.f32.vlgmr.msrb.gmra.mxu0 %v3385_v38 }
 0x110   : > { %762 = vmatmul.f32.gmra.mxu1 %v3947_v2  ;;  %1990 = vmatpush.msra.mxu3 %v3902_v21 }
 0x111   : > { %1508 = vmatmul.f32.vlgmr.msrb.gmra.mxu3 %v3385_v38 }
 0x112   : > { %1287 = vmatmul.f32.vlgmr.msrb.gmra.mxu2 %v3480_v3 }
 0x114   : > { %v490_v42 = vpop.f32.mrf.mxu0  ;;  %v703_v5 = vpop.f32.mrf.mxu1 }
 0x115   : > { %v704_v60 = vadd.f32 %v703_v5, %v482_v37  ;;  %v817_v44 = vpop.f32.mrf.mxu2  ;;  %v931_v16 = vpop.f32.mrf.mxu3 }
 0x117   : > { %v818_v43 = vadd.f32 %v817_v44, %v704_v60  ;;  %1093 = vmatmul.f32.gmra.mxu0 %v3423_v17 }
 0x118   : > { %1186 = vmatmul.f32.vlgmr.msrb.gmra.mxu1 %v3385_v38 }
 0x119   : > { %v4023_v35 = vadd.f32 %v931_v16, %v818_v43  ;;  %1512 = vmatmul.f32.gmra.mxu3 %v3423_v17 }
 0x11a   : > { %1295 = vmatmul.f32.gmra.mxu2 %v3528_v59 }
 0x11c   : > { %v498_v3 = vpop.f32.mrf.mxu0  ;;  %v707_v21 = vpop.f32.mrf.mxu1 }
 0x11d   : > { %v708_v14 = vadd.f32 %v707_v21, %v490_v42  ;;  %v822_v26 = vpop.f32.mrf.mxu2  ;;  %v937_v49 = vpop.f32.mrf.mxu3 }
 0x11f   : > { %v823_v33 = vadd.f32 %v822_v26, %v708_v14  ;;  %1097 = vmatmul.f32.gmra.mxu0 %v3475_v19 }
 0x120   : > { %1190 = vmatmul.f32.gmra.mxu1 %v3423_v17 }
 0x121   : > { %v4029_v58 = vadd.f32 %v937_v49, %v823_v33  ;;  %1516 = vmatmul.f32.gmra.mxu3 %v3475_v19  ;;  %v4853_v33 = vld [vmem:[#allocation42_spill] sm:$0xff] }
 0x122   : > { %1303 = vmatmul.f32.gmra.mxu2 %v3566_v45 }
 0x124   : > { %v506_v62 = vpop.f32.mrf.mxu0  ;;  %v711_v9 = vpop.f32.mrf.mxu1 }
 0x125   : > { %v712_v28 = vadd.f32 %v711_v9, %v498_v3  ;;  %v827_v59 = vpop.f32.mrf.mxu2  ;;  %v943_v20 = vpop.f32.mrf.mxu3 }
 0x127   : > { %v828_v39 = vadd.f32 %v827_v59, %v712_v28  ;;  %1101 = vmatmul.f32.gmra.mxu0 %v3522_v54 }
 0x128   : > { %1194 = vmatmul.f32.gmra.mxu1 %v3475_v19 }
 0x129   : > { %v4035_v41 = vadd.f32 %v943_v20, %v828_v39  ;;  %1520 = vmatmul.f32.gmra.mxu3 %v3522_v54  ;;  %v4854_v39 = vld [vmem:[#allocation38_spill] sm:$0xff] }
 0x12a   : > { %1311 = vmatmul.f32.gmra.mxu2 %v3606_v1 }
 0x12c   : > { %v514_v63 = vpop.f32.mrf.mxu0  ;;  %v715_v10 = vpop.f32.mrf.mxu1 }
 0x12d   : > { %v716_v7 = vadd.f32 %v715_v10, %v506_v62  ;;  %v832_v45 = vpop.f32.mrf.mxu2  ;;  %v949_v40 = vpop.f32.mrf.mxu3  ;;  %v4855_v10 = vld [vmem:[#allocation45_spill] sm:$0xff] }
 0x12f   : > { %v833_v36 = vadd.f32 %v832_v45, %v716_v7  ;;  %1105 = vmatmul.f32.gmra.mxu0 %v3572_v48 }
 0x130   : > { %1198 = vmatmul.f32.gmra.mxu1 %v3522_v54 }
 0x131   : > { %v4041_v34 = vadd.f32 %v949_v40, %v833_v36  ;;  %1524 = vmatmul.f32.gmra.mxu3 %v3572_v48 }
 0x132   : > { %1319 = vmatmul.f32.gmra.mxu2 %v3644_v6 }
 0x134   : > { %v522_v53 = vpop.f32.mrf.mxu0  ;;  %v719_v46 = vpop.f32.mrf.mxu1 }
 0x135   : > { %v720_v13 = vadd.f32 %v719_v46, %v514_v63  ;;  %v837_v1 = vpop.f32.mrf.mxu2  ;;  %v955_v37 = vpop.f32.mrf.mxu3 }
 0x137   : > { %v838_v4 = vadd.f32 %v837_v1, %v720_v13  ;;  %1109 = vmatmul.f32.gmra.mxu0 %v3601_v52  ;;  %v4856_v13 = vld [vmem:[#allocation43_spill] sm:$0xff] }
 0x138   : > { %1202 = vmatmul.f32.gmra.mxu1 %v3572_v48 }
 0x139   : > { %v4047_v61 = vadd.f32 %v955_v37, %v838_v4  ;;  %1528 = vmatmul.f32.gmra.mxu3 %v3601_v52  ;;  %v4857_v37 = vld [vmem:[#allocation49_spill] sm:$0xff] }
 0x13a   : > { %1327 = vmatmul.f32.gmra.mxu2 %v3676_v27 }
 0x13c   : > { %v530_v50 = vpop.f32.mrf.mxu0 }
 0x13d   : > { %v723_v42 = vpop.f32.mrf.mxu1  ;;  %v842_v6 = vpop.f32.mrf.mxu2 }
 0x13e   : > { %v724_v5 = vadd.f32 %v723_v42, %v522_v53  ;;  %v961_v60 = vpop.f32.mrf.mxu3 }
 0x13f   : > { %1113 = vmatmul.f32.gmra.mxu0 %v3646_v57 }
 0x140   : > { %v843_v44 = vadd.f32 %v842_v6, %v724_v5  ;;  %1206 = vmatmul.f32.gmra.mxu1 %v3601_v52 }
 0x141   : > { %1532 = vmatmul.f32.gmra.mxu3 %v3646_v57 }
 0x142   : > { %v4053_v16 = vadd.f32 %v961_v60, %v843_v44  ;;  %1335 = vmatmul.f32.gmra.mxu2 %v3719_v55  ;;  %v4858_v44 = vld [vmem:[#allocation47_spill] sm:$0xff] }
 0x144   : > { %v538_v43 = vpop.f32.mrf.mxu0 }
 0x145   : > { %v727_v3 = vpop.f32.mrf.mxu1  ;;  %v847_v27 = vpop.f32.mrf.mxu2 }
 0x146   : > { %v728_v21 = vadd.f32 %v727_v3, %v530_v50  ;;  %v967_v14 = vpop.f32.mrf.mxu3  ;;  %v4859_v3 = vld [vmem:[#allocation53_spill] sm:$0xff] }
 0x147   : > { %1117 = vmatmul.f32.gmra.mxu0 %v3684_v30 }
 0x148   : > { %v848_v26 = vadd.f32 %v847_v27, %v728_v21  ;;  %1210 = vmatmul.f32.gmra.mxu1 %v3646_v57 }
 0x149   : > { %1536 = vmatmul.f32.gmra.mxu3 %v3684_v30 }
 0x14a   : > { %v4059_v49 = vadd.f32 %v967_v14, %v848_v26  ;;  %1343 = vmatmul.f32.gmra.mxu2 %v4853_v33 }
 0x14c   : > { %v546_v62 = vpop.f32.mrf.mxu0 }
 0x14d   : > { %v731_v9 = vpop.f32.mrf.mxu1  ;;  %v852_v55 = vpop.f32.mrf.mxu2 }
 0x14e   : > { %v732_v28 = vadd.f32 %v731_v9, %v538_v43  ;;  %v973_v59 = vpop.f32.mrf.mxu3 }
 0x14f   : > { %1121 = vmatmul.f32.gmra.mxu0 %v4854_v39 }
 0x150   : > { %v853_v20 = vadd.f32 %v852_v55, %v732_v28  ;;  %1214 = vmatmul.f32.gmra.mxu1 %v3684_v30  ;;  %v4860_v28 = vld [vmem:[#allocation54_spill] sm:$0xff] }
 0x151   : > { %1540 = vmatmul.f32.gmra.mxu3 %v4854_v39 }
 0x152   : > { %v4065_v63 = vadd.f32 %v973_v59, %v853_v20  ;;  %1351 = vmatmul.f32.gmra.mxu2 %v4855_v10 }
 0x154   : > { %v554_v7 = vpop.f32.mrf.mxu0 }
 0x155   : > { %v735_v45 = vpop.f32.mrf.mxu1  ;;  %v857_v36 = vpop.f32.mrf.mxu2 }
 0x156   : > { %v736_v40 = vadd.f32 %v735_v45, %v546_v62  ;;  %v979_v53 = vpop.f32.mrf.mxu3 }
 0x157   : > { %1125 = vmatmul.f32.gmra.mxu0 %v4856_v13 }
 0x158   : > { %v858_v46 = vadd.f32 %v857_v36, %v736_v40  ;;  %1218 = vmatmul.f32.gmra.mxu1 %v4854_v39 }
 0x159   : > { %1544 = vmatmul.f32.gmra.mxu3 %v4856_v13 }
 0x15a   : > { %v4071_v1 = vadd.f32 %v979_v53, %v858_v46  ;;  %1359 = vmatmul.f32.gmra.mxu2 %v4857_v37 }
 0x15c   : > { %v562_v4 = vpop.f32.mrf.mxu0 }
 0x15d   : > { %v739_v50 = vpop.f32.mrf.mxu1  ;;  %v862_v5 = vpop.f32.mrf.mxu2 }
 0x15e   : > { %v740_v42 = vadd.f32 %v739_v50, %v554_v7  ;;  %v985_v6 = vpop.f32.mrf.mxu3 }
 0x15f   : > { %1129 = vmatmul.f32.gmra.mxu0 %v4858_v44 }
 0x160   : > { %v863_v60 = vadd.f32 %v862_v5, %v740_v42  ;;  %1222 = vmatmul.f32.gmra.mxu1 %v4856_v13 }
 0x161   : > { %1548 = vmatmul.f32.gmra.mxu3 %v4858_v44 }
 0x162   : > { %v4077_v43 = vadd.f32 %v985_v6, %v863_v60  ;;  %1367 = vmatmul.f32.gmra.mxu2 %v4859_v3 }
 0x164   : > { %v570_v21 = vpop.f32.mrf.mxu0 }
 0x165   : > { %v743_v27 = vpop.f32.mrf.mxu1  ;;  %v867_v26 = vpop.f32.mrf.mxu2 }
 0x166   : > { %v744_v14 = vadd.f32 %v743_v27, %v562_v4  ;;  %v991_v33 = vpop.f32.mrf.mxu3 }
 0x167   : > { %1133 = vmatmul.f32.gmra.mxu0 %v3817_v12 }
 0x168   : > { %v868_v62 = vadd.f32 %v867_v26, %v744_v14  ;;  %1226 = vmatmul.f32.gmra.mxu1 %v4858_v44 }
 0x169   : > { %1552 = vmatmul.f32.gmra.mxu3 %v3817_v12 }
 0x16a   : > { %v4083_v9 = vadd.f32 %v991_v33, %v868_v62  ;;  %1375 = vmatmul.f32.gmra.mxu2 %v4860_v28 }
 0x16c   : > { %v578_v55 = vpop.f32.mrf.mxu0 }
 0x16d   : > { %v747_v59 = vpop.f32.mrf.mxu1  ;;  %v872_v10 = vpop.f32.mrf.mxu2 }
 0x16e   : > { %v748_v20 = vadd.f32 %v747_v59, %v570_v21  ;;  %v997_v7 = vpop.f32.mrf.mxu3 }
 0x16f   : > { %1137 = vmatmul.f32.gmra.mxu0 %v3855_v32 }
 0x170   : > { %v873_v45 = vadd.f32 %v872_v10, %v748_v20  ;;  %1230 = vmatmul.f32.gmra.mxu1 %v3817_v12 }
 0x171   : > { %1556 = vmatmul.f32.gmra.mxu3 %v3855_v32 }
 0x172   : > { %v4089_v40 = vadd.f32 %v997_v7, %v873_v45  ;;  %1383 = vmatmul.f32.gmra.mxu2 %v3914_v22 }
 0x174   : > { %v586_v36 = vpop.f32.mrf.mxu0 }
 0x175   : > { %v751_v53 = vpop.f32.mrf.mxu1  ;;  %v877_v37 = vpop.f32.mrf.mxu2 }
 0x176   : > { %v752_v46 = vadd.f32 %v751_v53, %v578_v55  ;;  %v1003_v4 = vpop.f32.mrf.mxu3 }
 0x177   : > { %1141 = vmatmul.f32.gmra.mxu0 %v3884_v47 }
 0x178   : > { %v878_v50 = vadd.f32 %v877_v37, %v752_v46  ;;  %1234 = vmatmul.f32.gmra.mxu1 %v3855_v32 }
 0x179   : > { %1560 = vmatmul.f32.gmra.mxu3 %v3884_v47 }
 0x17a   : > { %v4095_v42 = vadd.f32 %v1003_v4, %v878_v50  ;;  %1391 = vmatmul.f32.gmra.mxu2 %v3942_v31 }
 0x17c   : > { %v594_v5 = vpop.f32.mrf.mxu0 }
 0x17d   : > { %v755_v6 = vpop.f32.mrf.mxu1  ;;  %v882_v22 = vpop.f32.mrf.mxu2 }
 0x17e   : > { %v756_v60 = vadd.f32 %v755_v6, %v586_v36  ;;  %v1009_v3 = vpop.f32.mrf.mxu3  ;;  %v4861_v36 = vld [vmem:[#allocation23_spill] sm:$0xff]  ;;  %v4863_v6 = vld [vmem:[#allocation24_spill] sm:$0xff] }
 0x17f   : > { %1145 = vmatmul.f32.gmra.mxu0 %v3919_v23 }
 0x180   : > { %v883_v21 = vadd.f32 %v882_v22, %v756_v60  ;;  %1238 = vmatmul.f32.gmra.mxu1 %v3884_v47 }
 0x181   : > { %1564 = vmatmul.f32.gmra.mxu3 %v3919_v23 }
 0x182   : > { %v4101_v27 = vadd.f32 %v1009_v3, %v883_v21  ;;  %1399 = vmatmul.f32.gmra.mxu2 %v3968_v18 }
 0x184   : > { %v602_v14 = vpop.f32.mrf.mxu0 }
 0x185   : > { %v759_v26 = vpop.f32.mrf.mxu1  ;;  %v887_v31 = vpop.f32.mrf.mxu2 }
 0x186   : > { %v760_v33 = vadd.f32 %v759_v26, %v594_v5  ;;  %v1015_v62 = vpop.f32.mrf.mxu3  ;;  %v4862_v5 = vld [vmem:[#allocation25_spill] sm:$0xff] }
 0x187   : > { %1149 = vmatmul.f32.gmra.mxu0 %v3947_v2 }
 0x188   : > { %v888_v28 = vadd.f32 %v887_v31, %v760_v33  ;;  %1242 = vmatmul.f32.gmra.mxu1 %v3919_v23 }
 0x189   : > { %1568 = vmatmul.f32.gmra.mxu3 %v3947_v2 }
 0x18a   : > { %v4107_v55 = vadd.f32 %v1015_v62, %v888_v28  ;;  %1407 = vmatmul.f32.gmra.mxu2 %v3989_v15  ;;  %v4864_v28 = vld [vmem:[#allocation27_spill] sm:$0xff] }
 0x18c   : > { %v1090_v20 = vpop.f32.mrf.mxu0 }
 0x18d   : > { %v763_v59 = vpop.f32.mrf.mxu1  ;;  %v892_v18 = vpop.f32.mrf.mxu2  ;;  %v1091_v60 = vadd.f32 %v1090_v20, %v4023_v35 }
 0x18e   : > { %v764_v10 = vadd.f32 %v763_v59, %v602_v14  ;;  %v1021_v7 = vpop.f32.mrf.mxu3  ;;  %v4865_v59 = vld [vmem:[#allocation26_spill] sm:$0xff] }
 0x18f   : > { %1622 = vmatmul.f32.vlgmr.msra.gmra.mxu0 %v4861_v36 }
 0x190   : > { %v893_v45 = vadd.f32 %v892_v18, %v764_v10  ;;  %1246 = vmatmul.f32.gmra.mxu1 %v3947_v2 }
 0x191   : > { %1992 = vmatmul.f32.vlgmr.msra.gmra.mxu3 %v3385_v38 }
 0x192   : > { %v4113_v53 = vadd.f32 %v1021_v7, %v893_v45  ;;  %1895 = vmatmul.f32.vlgmr.msra.gmra.mxu2 %v3385_v38 }
 0x194   : > { %v1094_v46 = vpop.f32.mrf.mxu0 }
 0x195   : > { %v1187_v37 = vpop.f32.mrf.mxu1  ;;  %v1288_v4 = vpop.f32.mrf.mxu2  ;;  %v1095_v22 = vadd.f32 %v1094_v46, %v4029_v58 }
 0x196   : > { %v1509_v15 = vpop.f32.mrf.mxu3  ;;  %v4125_v3 = vadd.f32 %v1187_v37, %v1091_v60  ;;  %v4866_v37 = vld [vmem:[#allocation29_spill] sm:$0xff] }
 0x197   : > { %v4117_v50 = vadd.f32 %v1509_v15, %v1288_v4  ;;  %1627 = vmatmul.f32.gmra.mxu0 %v4862_v5  ;;  %v4867_v4 = vld [vmem:[#allocation28_spill] sm:$0xff] }
 0x198   : > { %1736 = vmatmul.f32.vlgmr.msra.gmra.mxu1 %v4863_v6  ;;  %v2056_v62 = vmax.f32 %v4125_v3, 0.0 }
 0x199   : > { %1996 = vmatmul.f32.gmra.mxu3 %v3423_v17 }
 0x19a   : > { %1899 = vmatmul.f32.gmra.mxu2 %v3423_v17 }
 0x19c   : > { %v1098_v38 = vpop.f32.mrf.mxu0 }
 0x19d   : > { %v1191_v21 = vpop.f32.mrf.mxu1  ;;  %v1296_v26 = vpop.f32.mrf.mxu2  ;;  %v1099_v58 = vadd.f32 %v1098_v38, %v4035_v41 }
 0x19e   : > { %v4127_v14 = vadd.f32 %v1191_v21, %v1095_v22  ;;  %v1513_v33 = vpop.f32.mrf.mxu3 }
 0x19f   : > { %v4129_v31 = vadd.f32 %v1513_v33, %v1296_v26  ;;  %1632 = vmatmul.f32.gmra.mxu0 %v4864_v28  ;;  %v4868_v26 = vld [vmem:[#allocation31_spill] sm:$0xff]  ;;  %v4869_v33 = vld [vmem:[#allocation30_spill] sm:$0xff] }
 0x1a0   : > { %v2058_v35 = vmax.f32 %v4127_v14, 0.0  ;;  %1742 = vmatmul.f32.gmra.mxu1 %v4865_v59 }
 0x1a1   : > { %2000 = vmatmul.f32.gmra.mxu3 %v3475_v19 }
 0x1a2   : > { %v2088_v17 = vadd.f32 %v2058_v35, %v2056_v62  ;;  %1903 = vmatmul.f32.gmra.mxu2 %v3475_v19 }
 0x1a4   : > { %v1102_v20 = vpop.f32.mrf.mxu0 }
 0x1a5   : > { %v1195_v10 = vpop.f32.mrf.mxu1  ;;  %v1304_v7 = vpop.f32.mrf.mxu2  ;;  %v1103_v19 = vadd.f32 %v1102_v20, %v4041_v34 }
 0x1a6   : > { %v4142_v18 = vadd.f32 %v1195_v10, %v1099_v58  ;;  %v1517_v45 = vpop.f32.mrf.mxu3 }
 0x1a7   : > { %v4144_v36 = vadd.f32 %v1517_v45, %v1304_v7  ;;  %1637 = vmatmul.f32.gmra.mxu0 %v4866_v37  ;;  %v4870_v45 = vld [vmem:[#allocation33_spill] sm:$0xff]  ;;  %v4871_v37 = vld [vmem:[#allocation32_spill] sm:$0xff] }
 0x1a8   : > { %v2060_v46 = vmax.f32 %v4142_v18, 0.0  ;;  %1748 = vmatmul.f32.gmra.mxu1 %v4867_v4 }
 0x1a9   : > { %2004 = vmatmul.f32.gmra.mxu3 %v3522_v54 }
 0x1aa   : > { %v2089_v15 = vadd.f32 %v2088_v17, %v2060_v46  ;;  %1907 = vmatmul.f32.gmra.mxu2 %v3522_v54 }
 0x1ac   : > { %v1106_v41 = vpop.f32.mrf.mxu0 }
 0x1ad   : > { %v1199_v5 = vpop.f32.mrf.mxu1  ;;  %v1312_v60 = vpop.f32.mrf.mxu2  ;;  %v1107_v54 = vadd.f32 %v1106_v41, %v4047_v61 }
 0x1ae   : > { %v4154_v6 = vadd.f32 %v1199_v5, %v1103_v19  ;;  %v1521_v22 = vpop.f32.mrf.mxu3 }
 0x1af   : > { %v4156_v38 = vadd.f32 %v1521_v22, %v1312_v60  ;;  %1642 = vmatmul.f32.gmra.mxu0 %v4868_v26  ;;  %v4872_v26 = vld [vmem:[#allocation35_spill] sm:$0xff] }
 0x1b0   : > { %v2062_v21 = vmax.f32 %v4154_v6, 0.0  ;;  %1754 = vmatmul.f32.gmra.mxu1 %v4869_v33  ;;  %v4873_v33 = vld [vmem:[#allocation34_spill] sm:$0xff] }
 0x1b1   : > { %2008 = vmatmul.f32.gmra.mxu3 %v3572_v48 }
 0x1b2   : > { %v2090_v28 = vadd.f32 %v2089_v15, %v2062_v21  ;;  %1911 = vmatmul.f32.gmra.mxu2 %v3572_v48 }
 0x1b4   : > { %v1110_v34 = vpop.f32.mrf.mxu0 }
 0x1b5   : > { %v1203_v59 = vpop.f32.mrf.mxu1  ;;  %v1320_v58 = vpop.f32.mrf.mxu2  ;;  %v1111_v48 = vadd.f32 %v1110_v34, %v4053_v16 }
 0x1b6   : > { %v4166_v17 = vadd.f32 %v1203_v59, %v1107_v54  ;;  %v1525_v20 = vpop.f32.mrf.mxu3 }
 0x1b7   : > { %v4168_v10 = vadd.f32 %v1525_v20, %v1320_v58  ;;  %1647 = vmatmul.f32.gmra.mxu0 %v4870_v45 }
 0x1b8   : > { %v2064_v7 = vmax.f32 %v4166_v17, 0.0  ;;  %1760 = vmatmul.f32.gmra.mxu1 %v4871_v37  ;;  %v4874_v37 = vld [vmem:[#allocation37_spill] sm:$0xff] }
 0x1b9   : > { %2012 = vmatmul.f32.gmra.mxu3 %v3601_v52 }
 0x1ba   : > { %v2091_v4 = vadd.f32 %v2090_v28, %v2064_v7  ;;  %1915 = vmatmul.f32.gmra.mxu2 %v3601_v52 }
 0x1bc   : > { %v1114_v61 = vpop.f32.mrf.mxu0 }
 0x1bd   : > { %v1207_v15 = vpop.f32.mrf.mxu1  ;;  %v1328_v41 = vpop.f32.mrf.mxu2  ;;  %v1115_v52 = vadd.f32 %v1114_v61, %v4059_v49 }
 0x1be   : > { %v4178_v19 = vadd.f32 %v1207_v15, %v1111_v48  ;;  %v1529_v5 = vpop.f32.mrf.mxu3  ;;  %v4875_v48 = vld [vmem:[#allocation36_spill] sm:$0xff] }
 0x1bf   : > { %v4180_v60 = vadd.f32 %v1529_v5, %v1328_v41  ;;  %1652 = vmatmul.f32.gmra.mxu0 %v4872_v26 }
 0x1c0   : > { %v2066_v22 = vmax.f32 %v4178_v19, 0.0  ;;  %1766 = vmatmul.f32.gmra.mxu1 %v4873_v33 }
 0x1c1   : > { %2016 = vmatmul.f32.gmra.mxu3 %v3646_v57 }
 0x1c2   : > { %v2092_v28 = vadd.f32 %v2091_v4, %v2066_v22  ;;  %1919 = vmatmul.f32.gmra.mxu2 %v3646_v57 }
 0x1c4   : > { %v1118_v16 = vpop.f32.mrf.mxu0 }
 0x1c5   : > { %v1211_v54 = vpop.f32.mrf.mxu1  ;;  %v1336_v59 = vpop.f32.mrf.mxu2  ;;  %v1119_v57 = vadd.f32 %v1118_v16, %v4065_v63 }
 0x1c6   : > { %v4190_v34 = vadd.f32 %v1211_v54, %v1115_v52  ;;  %v1533_v58 = vpop.f32.mrf.mxu3  ;;  %v4876_v54 = vld [vmem:[#allocation40_spill] sm:$0xff] }
 0x1c7   : > { %v4192_v20 = vadd.f32 %v1533_v58, %v1336_v59  ;;  %1657 = vmatmul.f32.gmra.mxu0 %v4874_v37 }
 0x1c8   : > { %v2068_v45 = vmax.f32 %v4190_v34, 0.0  ;;  %1772 = vmatmul.f32.gmra.mxu1 %v4875_v48 }
 0x1c9   : > { %2020 = vmatmul.f32.gmra.mxu3 %v3684_v30 }
 0x1ca   : > { %v2093_v4 = vadd.f32 %v2092_v28, %v2068_v45  ;;  %1923 = vmatmul.f32.gmra.mxu2 %v3684_v30  ;;  %v4877_v28 = vld [vmem:[#allocation39_spill] sm:$0xff] }
 0x1cc   : > { %v1122_v49 = vpop.f32.mrf.mxu0 }
 0x1cd   : > { %v1215_v61 = vpop.f32.mrf.mxu1  ;;  %v1123_v15 = vadd.f32 %v1122_v49, %v4071_v1  ;;  %v1344_v5 = vpop.f32.mrf.mxu2  ;;  %v4879_v49 = vld [vmem:[#allocation41_spill] sm:$0xff] }
 0x1ce   : > { %v4203_v41 = vadd.f32 %v1215_v61, %v1119_v57  ;;  %v1537_v26 = vpop.f32.mrf.mxu3  ;;  %v4878_v57 = vld [vmem:[#allocation44_spill] sm:$0xff] }
 0x1cf   : > { %v4205_v33 = vadd.f32 %v1537_v26, %v1344_v5  ;;  %1662 = vmatmul.f32.gmra.mxu0 %v4876_v54  ;;  %v4880_v54 = vld [vmem:[#allocation48_spill] sm:$0xff] }
 0x1d0   : > { %v2070_v52 = vmax.f32 %v4203_v41, 0.0  ;;  %1778 = vmatmul.f32.gmra.mxu1 %v4877_v28  ;;  %v4881_v28 = vld [vmem:[#allocation46_spill] sm:$0xff] }
 0x1d1   : > { %2024 = vmatmul.f32.gmra.mxu3 %v4854_v39 }
 0x1d2   : > { %v2094_v30 = vadd.f32 %v2093_v4, %v2070_v52  ;;  %1927 = vmatmul.f32.gmra.mxu2 %v4854_v39 }
 0x1d4   : > { %v1126_v63 = vpop.f32.mrf.mxu0 }
 0x1d5   : > { %v1219_v1 = vpop.f32.mrf.mxu1  ;;  %v1127_v16 = vadd.f32 %v1126_v63, %v4077_v43  ;;  %v1352_v58 = vpop.f32.mrf.mxu2 }
 0x1d6   : > { %v4215_v59 = vadd.f32 %v1219_v1, %v1123_v15  ;;  %v1541_v37 = vpop.f32.mrf.mxu3 }
 0x1d7   : > { %v4217_v48 = vadd.f32 %v1541_v37, %v1352_v58  ;;  %1667 = vmatmul.f32.gmra.mxu0 %v4878_v57 }
 0x1d8   : > { %1784 = vmatmul.f32.gmra.mxu1 %v4879_v49  ;;  %v4765_v63 = vmax.f32 %v4215_v59, 0.0 }
 0x1d9   : > { %2028 = vmatmul.f32.gmra.mxu3 %v4856_v13 }
 0x1da   : > { %1931 = vmatmul.f32.gmra.mxu2 %v4856_v13 }
 0x1dc   : > { %v1130_v4 = vpop.f32.mrf.mxu0 }
 0x1dd   : > { %v1223_v39 = vpop.f32.mrf.mxu1  ;;  %v1131_v61 = vadd.f32 %v1130_v4, %v4083_v9  ;;  %v1360_v43 = vpop.f32.mrf.mxu2 }
 0x1de   : > { %v4224_v5 = vadd.f32 %v1223_v39, %v1127_v16  ;;  %v1545_v15 = vpop.f32.mrf.mxu3  ;;  %v2095_v16 = vadd.f32 %v2094_v30, %v4765_v63 }
 0x1df   : > { %v4226_v26 = vadd.f32 %v1545_v15, %v1360_v43  ;;  %1672 = vmatmul.f32.gmra.mxu0 %v4880_v54  ;;  %v4882_v43 = vld [vmem:[#allocation51_spill] sm:$0xff]  ;;  %v4883_v15 = vld [vmem:[#allocation50_spill] sm:$0xff] }
 0x1e0   : > { %1790 = vmatmul.f32.gmra.mxu1 %v4881_v28  ;;  %v4764_v13 = vmax.f32 %v4224_v5, 0.0 }
 0x1e1   : > { %2032 = vmatmul.f32.gmra.mxu3 %v4858_v44 }
 0x1e2   : > { %1935 = vmatmul.f32.gmra.mxu2 %v4858_v44  ;;  %v2096_v39 = vadd.f32 %v2095_v16, %v4764_v13 }
 0x1e4   : > { %v1134_v1 = vpop.f32.mrf.mxu0 }
 0x1e5   : > { %v1227_v9 = vpop.f32.mrf.mxu1  ;;  %v1135_v58 = vadd.f32 %v1134_v1, %v4089_v40  ;;  %v1368_v57 = vpop.f32.mrf.mxu2 }
 0x1e6   : > { %v4237_v37 = vadd.f32 %v1227_v9, %v1131_v61  ;;  %v1549_v49 = vpop.f32.mrf.mxu3 }
 0x1e7   : > { %v4239_v4 = vadd.f32 %v1549_v49, %v1368_v57  ;;  %1677 = vmatmul.f32.gmra.mxu0 %v4882_v43  ;;  %v4884_v49 = vld [vmem:[#allocation52_spill] sm:$0xff] }
 0x1e8   : > { %v2076_v44 = vmax.f32 %v4237_v37, 0.0  ;;  %1796 = vmatmul.f32.gmra.mxu1 %v4883_v15 }
 0x1e9   : > { %2036 = vmatmul.f32.gmra.mxu3 %v3817_v12 }
 0x1ea   : > { %v2097_v30 = vadd.f32 %v2096_v39, %v2076_v44  ;;  %1939 = vmatmul.f32.gmra.mxu2 %v3817_v12 }
 0x1ec   : > { %v1138_v40 = vpop.f32.mrf.mxu0 }
 0x1ed   : > { %v1231_v61 = vpop.f32.mrf.mxu1  ;;  %v1139_v54 = vadd.f32 %v1138_v40, %v4095_v42  ;;  %v1376_v1 = vpop.f32.mrf.mxu2 }
 0x1ee   : > { %v4251_v28 = vadd.f32 %v1231_v61, %v1135_v58  ;;  %v1553_v9 = vpop.f32.mrf.mxu3 }
 0x1ef   : > { %v4253_v16 = vadd.f32 %v1553_v9, %v1376_v1  ;;  %1682 = vmatmul.f32.gmra.mxu0 %v3869_v11 }
 0x1f0   : > { %v2078_v57 = vmax.f32 %v4251_v28, 0.0  ;;  %1802 = vmatmul.f32.gmra.mxu1 %v4884_v49 }
 0x1f1   : > { %2040 = vmatmul.f32.gmra.mxu3 %v3855_v32 }
 0x1f2   : > { %v2098_v39 = vadd.f32 %v2097_v30, %v2078_v57  ;;  %1943 = vmatmul.f32.gmra.mxu2 %v3855_v32 }
 0x1f4   : > { %v1142_v12 = vpop.f32.mrf.mxu0 }
 0x1f5   : > { %v1235_v42 = vpop.f32.mrf.mxu1  ;;  %v1143_v58 = vadd.f32 %v1142_v12, %v4101_v27  ;;  %v1384_v15 = vpop.f32.mrf.mxu2 }
 0x1f6   : > { %v4263_v43 = vadd.f32 %v1235_v42, %v1139_v54  ;;  %v1557_v40 = vpop.f32.mrf.mxu3 }
 0x1f7   : > { %v4265_v61 = vadd.f32 %v1557_v40, %v1384_v15  ;;  %1687 = vmatmul.f32.gmra.mxu0 %v3898_v56 }
 0x1f8   : > { %v2080_v11 = vmax.f32 %v4263_v43, 0.0  ;;  %1808 = vmatmul.f32.gmra.mxu1 %v3882_v51 }
 0x1f9   : > { %2044 = vmatmul.f32.gmra.mxu3 %v3884_v47 }
 0x1fa   : > { %v2099_v30 = vadd.f32 %v2098_v39, %v2080_v11  ;;  %1947 = vmatmul.f32.gmra.mxu2 %v3884_v47 }
 0x1fc   : > { %v1146_v32 = vpop.f32.mrf.mxu0 }
 0x1fd   : > { %v1239_v27 = vpop.f32.mrf.mxu1  ;;  %v1147_v54 = vadd.f32 %v1146_v32, %v4107_v55  ;;  %v1392_v9 = vpop.f32.mrf.mxu2 }
 0x1fe   : > { %v4275_v1 = vadd.f32 %v1239_v27, %v1143_v58  ;;  %v1561_v49 = vpop.f32.mrf.mxu3 }
 0x1ff   : > { %v4277_v12 = vadd.f32 %v1561_v49, %v1392_v9  ;;  %1692 = vmatmul.f32.gmra.mxu0 %v3936_v25 }
 0x200   : > { %v2082_v56 = vmax.f32 %v4275_v1, 0.0  ;;  %1814 = vmatmul.f32.gmra.mxu1 %v3917_v8 }
 0x201   : > { %2048 = vmatmul.f32.gmra.mxu3 %v3919_v23 }
 0x202   : > { %v2100_v51 = vadd.f32 %v2099_v30, %v2082_v56  ;;  %1951 = vmatmul.f32.gmra.mxu2 %v3919_v23 }
 0x204   : > { %v1150_v47 = vpop.f32.mrf.mxu0 }
 0x205   : > { %v1243_v39 = vpop.f32.mrf.mxu1  ;;  %v1151_v55 = vadd.f32 %v1150_v47, %v4113_v53  ;;  %v1400_v58 = vpop.f32.mrf.mxu2 }
 0x206   : > { %v1244_v42 = vadd.f32 %v1243_v39, %v1147_v54  ;;  %v1565_v15 = vpop.f32.mrf.mxu3 }
 0x207   : > { %v4285_v40 = vadd.f32 %v1565_v15, %v1400_v58  ;;  %1697 = vmatmul.f32.gmra.mxu0 %v3960_v24 }
 0x208   : > { %v2084_v32 = vmax.f32 %v1244_v42, 0.0  ;;  %1820 = vmatmul.f32.gmra.mxu1 %v3945_v0 }
 0x209   : > { %2052 = vmatmul.f32.gmra.mxu3 %v3947_v2 }
 0x20a   : > { %v2101_v8 = vadd.f32 %v2100_v51, %v2084_v32  ;;  %1955 = vmatmul.f32.gmra.mxu2 %v3947_v2 }
 0x20c   : > { %v1623_v25 = vpop.f32.mrf.mxu0 }
 0x20d   : > { %v1247_v23 = vpop.f32.mrf.mxu1  ;;  %v1624_v53 = vadd.f32 %v1623_v25, %v4117_v50  ;;  %v1408_v27 = vpop.f32.mrf.mxu2 }
 0x20e   : > { %v1248_v30 = vadd.f32 %v1247_v23, %v1151_v55  ;;  %v1569_v54 = vpop.f32.mrf.mxu3 }
 0x20f   : > { %v4292_v1 = vadd.f32 %v1569_v54, %v1408_v27 }
 0x210   : > { %v2086_v9 = vmax.f32 %v1248_v30, 0.0  ;;  %1826 = vmatmul.f32.gmra.mxu1 %v3971_v29 }
 0x212   : > { %v2102_v24 = vadd.f32 %v2101_v8, %v2086_v9 }
 0x214   : > { %v2103_v49 = vrot.slane %v2102_v24, 4  ;;  %v1628_v0 = vpop.f32.mrf.mxu0 }
 0x215   : > { %v1737_v51 = vpop.f32.mrf.mxu1  ;;  %v1629_v39 = vadd.f32 %v1628_v0, %v4129_v31  ;;  %v1896_v42 = vpop.f32.mrf.mxu2 }
 0x216   : > { %v2104_v47 = vadd.f32 %v2103_v49, %v2102_v24  ;;  %v1738_v2 = vadd.f32 %v1737_v51, %v1624_v53  ;;  %v1993_v58 = vpop.f32.mrf.mxu3 }
 0x218   : > { %v2105_v55 = vrot.slane %v2104_v47, 2  ;;  %v1897_v15 = vadd.f32 %v1896_v42, %v1738_v2 }
 0x21a   : > { %v2106_v50 = vadd.f32 %v2105_v55, %v2104_v47  ;;  %v4296_v23 = vadd.f32 %v1993_v58, %v1897_v15 }
 0x21c   : > { %v2107_v25 = vrot.slane %v2106_v50, 1  ;;  %v1633_v27 = vpop.f32.mrf.mxu0  ;;  %v2057_v43 = vmax.f32 %v4296_v23, 0.0 }
 0x21d   : > { %v1743_v30 = vpop.f32.mrf.mxu1  ;;  %v1634_v29 = vadd.f32 %v1633_v27, %v4144_v36  ;;  %v1900_v13 = vpop.f32.mrf.mxu2 }
 0x21e   : > { %v2108_v54 = vadd.f32 %v2107_v25, %v2106_v50  ;;  %v1744_v8 = vadd.f32 %v1743_v30, %v1629_v39  ;;  %v1997_v63 = vpop.f32.mrf.mxu3 }
 0x220   : > { %v4299_v24 = vmul.f32 0.015625, %v2108_v54  ;;  %v1901_v31 = vadd.f32 %v1900_v13, %v1744_v8 }
 0x222   : > { %v4304_v53 = vsub.f32 %v2056_v62, %v4299_v24  ;;  %v4309_v49 = vsub.f32 %v2058_v35, %v4299_v24  ;;  %v4314_v36 = vsub.f32 %v2060_v46, %v4299_v24  ;;  %v4319_v0 = vsub.f32 %v2062_v21, %v4299_v24 }
 0x223   : > { %v4324_v3 = vsub.f32 %v2064_v7, %v4299_v24  ;;  %v4329_v14 = vsub.f32 %v2066_v22, %v4299_v24  ;;  %v4334_v62 = vsub.f32 %v2068_v45, %v4299_v24  ;;  %v4339_v35 = vsub.f32 %v2070_v52, %v4299_v24 }
 0x224   : > { %v4344_v18 = vsub.f32 %v2076_v44, %v4299_v24  ;;  %v4349_v46 = vsub.f32 %v2078_v57, %v4299_v24  ;;  %v4354_v6 = vsub.f32 %v2080_v11, %v4299_v24  ;;  %v4357_v21 = vsub.f32 %v2082_v56, %v4299_v24  ;;  %v1638_v19 = vpop.f32.mrf.mxu0 }
 0x225   : > { %v4360_v17 = vsub.f32 %v2084_v32, %v4299_v24  ;;  %v4363_v7 = vsub.f32 %v2086_v9, %v4299_v24  ;;  %v1749_v22 = vpop.f32.mrf.mxu1  ;;  %v2229_v34 = vmul.f32 %v4304_v53, %v4304_v53  ;;  %v2231_v45 = vmul.f32 %v4309_v49, %v4309_v49  ;;  %v1904_v41 = vpop.f32.mrf.mxu2 }
 0x226   : > { %v2001_v52 = vpop.f32.mrf.mxu3  ;;  %v2233_v13 = vmul.f32 %v4314_v36, %v4314_v36  ;;  %v4371_v44 = vadd.f32 %v1997_v63, %v1901_v31  ;;  %v1639_v28 = vadd.f32 %v1638_v19, %v4156_v38  ;;  %v1750_v57 = vadd.f32 %v1749_v22, %v1634_v29 }
 0x227   : > { %v2261_v37 = vadd.f32 %v2231_v45, %v2229_v34  ;;  %v2235_v11 = vmul.f32 %v4319_v0, %v4319_v0  ;;  %v2237_v51 = vmul.f32 %v4324_v3, %v4324_v3  ;;  %v2239_v39 = vmul.f32 %v4329_v14, %v4329_v14 }
 0x228   : > { %v2059_v32 = vmax.f32 %v4371_v44, 0.0  ;;  %v1905_v9 = vadd.f32 %v1904_v41, %v1750_v57  ;;  %v2241_v30 = vmul.f32 %v4334_v62, %v4334_v62  ;;  %v2243_v31 = vmul.f32 %v4339_v35, %v4339_v35 }
 0x229   : > { %v2262_v56 = vadd.f32 %v2261_v37, %v2233_v13 }
 0x22a   : > { %v2109_v63 = vadd.f32 %v2059_v32, %v2057_v43  ;;  %v4384_v38 = vadd.f32 %v2001_v52, %v1905_v9 }
 0x22b   : > { %v2263_v47 = vadd.f32 %v2262_v56, %v2235_v11 }
 0x22c   : > { %v1643_v2 = vpop.f32.mrf.mxu0  ;;  %v2061_v55 = vmax.f32 %v4384_v38, 0.0 }
 0x22d   : > { %v1755_v42 = vpop.f32.mrf.mxu1  ;;  %v2264_v58 = vadd.f32 %v2263_v47, %v2237_v51  ;;  %v1644_v15 = vadd.f32 %v1643_v2, %v4168_v10  ;;  %v1908_v25 = vpop.f32.mrf.mxu2 }
 0x22e   : > { %v1756_v50 = vadd.f32 %v1755_v42, %v1639_v28  ;;  %v2005_v27 = vpop.f32.mrf.mxu3  ;;  %v2110_v29 = vadd.f32 %v2109_v63, %v2061_v55 }
 0x22f   : > { %v2265_v54 = vadd.f32 %v2264_v58, %v2239_v39 }
 0x230   : > { %v1909_v8 = vadd.f32 %v1908_v25, %v1756_v50 }
 0x231   : > { %v2266_v19 = vadd.f32 %v2265_v54, %v2241_v30 }
 0x232   : > { %v4396_v22 = vadd.f32 %v2005_v27, %v1909_v8 }
 0x233   : > { %v4398_v34 = vadd.f32 %v2266_v19, %v2243_v31 }
 0x234   : > { %v2063_v10 = vmax.f32 %v4396_v22, 0.0  ;;  %v1648_v45 = vpop.f32.mrf.mxu0 }
 0x235   : > { %v1761_v41 = vpop.f32.mrf.mxu1  ;;  %v1912_v37 = vpop.f32.mrf.mxu2  ;;  %v1649_v56 = vadd.f32 %v1648_v45, %v4180_v60 }
 0x236   : > { %v2111_v52 = vadd.f32 %v2110_v29, %v2063_v10  ;;  %v1762_v13 = vadd.f32 %v1761_v41, %v1644_v15  ;;  %v2009_v28 = vpop.f32.mrf.mxu3 }
 0x238   : > { %v1913_v57 = vadd.f32 %v1912_v37, %v1762_v13 }
 0x23a   : > { %v4403_v11 = vadd.f32 %v2009_v28, %v1913_v57 }
 0x23c   : > { %v2065_v9 = vmax.f32 %v4403_v11, 0.0  ;;  %v1653_v51 = vpop.f32.mrf.mxu0 }
 0x23d   : > { %v1767_v47 = vpop.f32.mrf.mxu1  ;;  %v1916_v2 = vpop.f32.mrf.mxu2  ;;  %v1654_v15 = vadd.f32 %v1653_v51, %v4192_v20 }
 0x23e   : > { %v2112_v63 = vadd.f32 %v2111_v52, %v2065_v9  ;;  %v1768_v39 = vadd.f32 %v1767_v47, %v1649_v56  ;;  %v2013_v42 = vpop.f32.mrf.mxu3 }
 0x240   : > { %v1917_v58 = vadd.f32 %v1916_v2, %v1768_v39 }
 0x242   : > { %v4409_v50 = vadd.f32 %v2013_v42, %v1917_v58 }
 0x244   : > { %v2067_v25 = vmax.f32 %v4409_v50, 0.0  ;;  %v1658_v27 = vpop.f32.mrf.mxu0 }
 0x245   : > { %v1773_v30 = vpop.f32.mrf.mxu1  ;;  %v1920_v29 = vpop.f32.mrf.mxu2  ;;  %v1659_v45 = vadd.f32 %v1658_v27, %v4205_v33 }
 0x246   : > { %v2113_v60 = vadd.f32 %v2112_v63, %v2067_v25  ;;  %v1774_v54 = vadd.f32 %v1773_v30, %v1654_v15  ;;  %v2017_v8 = vpop.f32.mrf.mxu3 }
 0x248   : > { %v1921_v31 = vadd.f32 %v1920_v29, %v1774_v54 }
 0x24a   : > { %v4415_v19 = vadd.f32 %v2017_v8, %v1921_v31 }
 0x24c   : > { %v2069_v41 = vmax.f32 %v4415_v19, 0.0  ;;  %v1663_v52 = vpop.f32.mrf.mxu0 }
 0x24d   : > { %v1779_v13 = vpop.f32.mrf.mxu1  ;;  %v1924_v28 = vpop.f32.mrf.mxu2  ;;  %v1664_v58 = vadd.f32 %v1663_v52, %v4217_v48 }
 0x24e   : > { %v2114_v20 = vadd.f32 %v2113_v60, %v2069_v41  ;;  %v1780_v37 = vadd.f32 %v1779_v13, %v1659_v45  ;;  %v2021_v57 = vpop.f32.mrf.mxu3 }
 0x250   : > { %v1925_v56 = vadd.f32 %v1924_v28, %v1780_v37 }
 0x252   : > { %v4421_v51 = vadd.f32 %v2021_v57, %v1925_v56 }
 0x254   : > { %v2071_v47 = vmax.f32 %v4421_v51, 0.0  ;;  %v1668_v63 = vpop.f32.mrf.mxu0 }
 0x255   : > { %v1785_v39 = vpop.f32.mrf.mxu1  ;;  %v1928_v2 = vpop.f32.mrf.mxu2  ;;  %v1669_v27 = vadd.f32 %v1668_v63, %v4226_v26 }
 0x256   : > { %v2115_v33 = vadd.f32 %v2114_v20, %v2071_v47  ;;  %v2025_v42 = vpop.f32.mrf.mxu3  ;;  %v1786_v15 = vadd.f32 %v1785_v39, %v1664_v58 }
 0x258   : > { %v1929_v54 = vadd.f32 %v1928_v2, %v1786_v15 }
 0x25a   : > { %v4428_v13 = vadd.f32 %v2025_v42, %v1929_v54 }
 0x25c   : > { %v1673_v30 = vpop.f32.mrf.mxu0  ;;  %v4767_v48 = vmax.f32 %v4428_v13, 0.0 }
 0x25d   : > { %v1791_v60 = vpop.f32.mrf.mxu1  ;;  %v1932_v8 = vpop.f32.mrf.mxu2  ;;  %v1674_v37 = vadd.f32 %v1673_v30, %v4239_v4 }
 0x25e   : > { %v1792_v29 = vadd.f32 %v1791_v60, %v1669_v27  ;;  %v2029_v31 = vpop.f32.mrf.mxu3  ;;  %v2116_v2 = vadd.f32 %v2115_v33, %v4767_v48 }
 0x260   : > { %v1933_v45 = vadd.f32 %v1932_v8, %v1792_v29 }
 0x262   : > { %v4431_v28 = vadd.f32 %v2029_v31, %v1933_v45 }
 0x264   : > { %v1678_v20 = vpop.f32.mrf.mxu0  ;;  %v4766_v63 = vmax.f32 %v4431_v28, 0.0 }
 0x265   : > { %v1797_v57 = vpop.f32.mrf.mxu1  ;;  %v1936_v56 = vpop.f32.mrf.mxu2  ;;  %v1679_v42 = vadd.f32 %v1678_v20, %v4253_v16 }
 0x266   : > { %v1798_v52 = vadd.f32 %v1797_v57, %v1674_v37  ;;  %v2033_v26 = vpop.f32.mrf.mxu3  ;;  %v2117_v4 = vadd.f32 %v2116_v2, %v4766_v63 }
 0x268   : > { %v1937_v39 = vadd.f32 %v1936_v56, %v1798_v52 }
 0x26a   : > { %v4437_v58 = vadd.f32 %v2033_v26, %v1937_v39 }
 0x26c   : > { %v4768_v15 = vmax.f32 %v4437_v58, 0.0  ;;  %v1683_v27 = vpop.f32.mrf.mxu0 }
 0x26d   : > { %v1803_v30 = vpop.f32.mrf.mxu1  ;;  %v1940_v29 = vpop.f32.mrf.mxu2  ;;  %v1684_v33 = vadd.f32 %v1683_v27, %v4265_v61 }
 0x26e   : > { %v2118_v60 = vadd.f32 %v2117_v4, %v4768_v15  ;;  %v1804_v54 = vadd.f32 %v1803_v30, %v1679_v42  ;;  %v2037_v8 = vpop.f32.mrf.mxu3 }
 0x270   : > { %v1941_v31 = vadd.f32 %v1940_v29, %v1804_v54 }
 0x272   : > { %v2038_v45 = vadd.f32 %v2037_v8, %v1941_v31 }
 0x274   : > { %v2079_v37 = vmax.f32 %v2038_v45, 0.0  ;;  %v1688_v57 = vpop.f32.mrf.mxu0 }
 0x275   : > { %v1809_v52 = vpop.f32.mrf.mxu1  ;;  %v1944_v16 = vpop.f32.mrf.mxu2  ;;  %v1689_v63 = vadd.f32 %v1688_v57, %v4277_v12 }
 0x276   : > { %v2119_v56 = vadd.f32 %v2118_v60, %v2079_v37  ;;  %v1810_v26 = vadd.f32 %v1809_v52, %v1684_v33  ;;  %v2041_v20 = vpop.f32.mrf.mxu3 }
 0x278   : > { %v1945_v39 = vadd.f32 %v1944_v16, %v1810_v26 }
 0x27a   : > { %v2042_v2 = vadd.f32 %v2041_v20, %v1945_v39 }
 0x27c   : > { %v2081_v48 = vmax.f32 %v2042_v2, 0.0  ;;  %v1693_v29 = vpop.f32.mrf.mxu0 }
 0x27d   : > { %v1815_v4 = vpop.f32.mrf.mxu1  ;;  %v1948_v15 = vpop.f32.mrf.mxu2  ;;  %v1694_v27 = vadd.f32 %v1693_v29, %v4285_v40 }
 0x27e   : > { %v2120_v42 = vadd.f32 %v2119_v56, %v2081_v48  ;;  %v1816_v30 = vadd.f32 %v1815_v4, %v1689_v63  ;;  %v2045_v54 = vpop.f32.mrf.mxu3 }
 0x280   : > { %v1949_v8 = vadd.f32 %v1948_v15, %v1816_v30 }
 0x282   : > { %v2046_v61 = vadd.f32 %v2045_v54, %v1949_v8 }
 0x284   : > { %v2083_v31 = vmax.f32 %v2046_v61, 0.0  ;;  %v1698_v20 = vpop.f32.mrf.mxu0 }
 0x285   : > { %v1821_v60 = vpop.f32.mrf.mxu1  ;;  %v1952_v52 = vpop.f32.mrf.mxu2  ;;  %v1699_v57 = vadd.f32 %v1698_v20, %v4292_v1 }
 0x286   : > { %v2121_v45 = vadd.f32 %v2120_v42, %v2083_v31  ;;  %v1822_v33 = vadd.f32 %v1821_v60, %v1694_v27  ;;  %v2049_v26 = vpop.f32.mrf.mxu3  ;;  %v2276_v60 = vrot.slane %v4398_v34, 4 }
 0x288   : > { %v1953_v16 = vadd.f32 %v1952_v52, %v1822_v33  ;;  %v2277_v1 = vadd.f32 %v2276_v60, %v4398_v34 }
 0x28a   : > { %v2050_v12 = vadd.f32 %v2049_v26, %v1953_v16  ;;  %v2278_v38 = vrot.slane %v2277_v1, 2 }
 0x28c   : > { %v2085_v56 = vmax.f32 %v2050_v12, 0.0  ;;  %v2279_v51 = vadd.f32 %v2278_v38, %v2277_v1 }
 0x28d   : > { %v1827_v63 = vpop.f32.mrf.mxu1  ;;  %v1956_v4 = vpop.f32.mrf.mxu2 }
 0x28e   : > { %v2122_v39 = vadd.f32 %v2121_v45, %v2085_v56  ;;  %v1828_v2 = vadd.f32 %v1827_v63, %v1699_v57  ;;  %v2053_v15 = vpop.f32.mrf.mxu3 }
 0x290   : > { %v1957_v30 = vadd.f32 %v1956_v4, %v1828_v2 }
 0x292   : > { %v2054_v54 = vadd.f32 %v2053_v15, %v1957_v30 }
 0x294   : > { %v2087_v40 = vmax.f32 %v2054_v54, 0.0 }
 0x296   : > { %v2123_v29 = vadd.f32 %v2122_v39, %v2087_v40 }
 0x298   : > { %v2124_v8 = vrot.slane %v2123_v29, 4 }
 0x29a   : > { %v2125_v42 = vadd.f32 %v2124_v8, %v2123_v29 }
 0x29c   : > { %v2126_v61 = vrot.slane %v2125_v42, 2 }
 0x29e   : > { %v2127_v27 = vadd.f32 %v2126_v61, %v2125_v42 }
 0x2a0   : > { %v2128_v33 = vrot.slane %v2127_v27, 1 }
 0x2a2   : > { %v2129_v52 = vadd.f32 %v2128_v33, %v2127_v27 }
 0x2a4   : > { %v4451_v26 = vmul.f32 0.015625, %v2129_v52 }
 0x2a6   : > { %v4456_v45 = vsub.f32 %v2057_v43, %v4451_v26  ;;  %v4461_v16 = vsub.f32 %v2059_v32, %v4451_v26  ;;  %v4466_v20 = vsub.f32 %v2061_v55, %v4451_v26  ;;  %v4471_v34 = vsub.f32 %v2063_v10, %v4451_v26 }
 0x2a7   : > { %v4476_v23 = vsub.f32 %v2065_v9, %v4451_v26  ;;  %v4481_v44 = vsub.f32 %v2067_v25, %v4451_v26  ;;  %v4486_v43 = vsub.f32 %v2069_v41, %v4451_v26  ;;  %v4491_v32 = vsub.f32 %v2071_v47, %v4451_v26 }
 0x2a8   : > { %v4885_v55 = vmax.f32 %v4437_v58, 0.0  ;;  %v4499_v10 = vsub.f32 %v2079_v37, %v4451_v26  ;;  %v4502_v11 = vsub.f32 %v2081_v48, %v4451_v26  ;;  %v4505_v9 = vsub.f32 %v2083_v31, %v4451_v26 }
 0x2a9   : > { %v4508_v50 = vsub.f32 %v2085_v56, %v4451_v26  ;;  %v4511_v25 = vsub.f32 %v2087_v40, %v4451_v26  ;;  %v2230_v19 = vmul.f32 %v4456_v45, %v4456_v45  ;;  %v2232_v41 = vmul.f32 %v4461_v16, %v4461_v16 }
 0x2aa   : > { %v4496_v22 = vsub.f32 %v4885_v55, %v4451_v26  ;;  %v2234_v47 = vmul.f32 %v4466_v20, %v4466_v20  ;;  %v2236_v58 = vmul.f32 %v4471_v34, %v4471_v34  ;;  %v2280_v31 = vrot.slane %v2279_v51, 1 }
 0x2ab   : > { %v2282_v48 = vadd.f32 %v2232_v41, %v2230_v19  ;;  %v2238_v12 = vmul.f32 %v4476_v23, %v4476_v23  ;;  %v2240_v56 = vmul.f32 %v4481_v44, %v4481_v44  ;;  %v2242_v39 = vmul.f32 %v4486_v43, %v4486_v43 }
 0x2ac   : > { %v2281_v2 = vadd.f32 %v2280_v31, %v2279_v51  ;;  %v2244_v15 = vmul.f32 %v4491_v32, %v4491_v32 }
 0x2ad   : > { %v2283_v37 = vadd.f32 %v2282_v48, %v2234_v47 }
 0x2ae   : > { %v2303_v40 = vmul.f32 0.015625, %v2281_v2 }
 0x2af   : > { %v2284_v57 = vadd.f32 %v2283_v37, %v2236_v58 }
 0x2b0   : > { %v2316_v42 = vadd.f32 1e-05, %v2303_v40 }
 0x2b1   : > { %v2285_v63 = vadd.f32 %v2284_v57, %v2238_v12 }
 0x2b2   : > { %2752 = vrsqrt.f32 %v2316_v42  ;;  %vm2324_vm4 = vweird.f32 %v2316_v42 }
 0x2b3   : > { %v2286_v4 = vadd.f32 %v2285_v63, %v2240_v56  ;;  %v2313_v63 = vld [vmem:[%s2312_s12] ss:$4 sm:$0x3] }
 0x2b5   : > { %v2287_v30 = vadd.f32 %v2286_v4, %v2242_v39 }
 0x2b7   : > { %v2288_v54 = vadd.f32 %v2287_v30, %v2244_v15  ;;  %v2315_v15 = vld [vmem:[%s2314_s25] ss:$4 sm:$0x3] }
 0x2b8   : > { %v2753_v52 = vpop.eup %2752 }
 0x2b9   : > { %v2297_v29 = vrot.slane %v2288_v54, 4  ;;  %v2319_v55 = vmul.f32 %v2753_v52, %v2316_v42  ;;  %vm2325_vm1 = vweird.f32 %v2753_v52 }
 0x2ba   : > { %vm2326_vm6 = vmor %vm2324_vm4, %vm2325_vm1 }
 0x2bb   : > { %v2298_v8 = vadd.f32 %v2297_v29, %v2288_v54  ;;  %v2320_v19 = vmul.f32 %v2753_v52, %v2319_v55  ;;  %v4886_v54 = vmax.f32 %v4215_v59, 0.0  ;;  %v4887_v29 = vmax.f32 %v4224_v5, 0.0 }
 0x2bd   : > { %v2299_v61 = vrot.slane %v2298_v8, 2  ;;  %v2321_v51 = vmul.f32 0.5, %v2320_v19  ;;  %v2148_v40 = vsub.f32 %v4886_v54, %v4299_v24 }
 0x2bf   : > { %v2300_v27 = vadd.f32 %v2299_v61, %v2298_v8  ;;  %v2322_v58 = vsub.f32 1.5, %v2321_v51  ;;  %v2150_v8 = vsub.f32 %v4887_v29, %v4299_v24 }
 0x2c1   : > { %v2301_v60 = vrot.slane %v2300_v27, 1  ;;  %v2323_v12 = vmul.f32 %v2753_v52, %v2322_v58 }
 0x2c3   : > { %v2302_v33 = vadd.f32 %v2301_v60, %v2300_v27  ;;  %v2327_v2 = vsel %vm2326_vm6, %v2753_v52, %v2323_v12  ;;  %v4888_v27 = vmax.f32 %v4428_v13, 0.0 }
 0x2c5   : > { %v2304_v1 = vmul.f32 0.015625, %v2302_v33  ;;  %v2149_v60 = vsub.f32 %v4888_v27, %v4451_v26  ;;  %v4889_v33 = vmax.f32 %v4431_v28, 0.0 }
 0x2c7   : > { %v2317_v38 = vadd.f32 1e-05, %v2304_v1  ;;  %v2151_v52 = vsub.f32 %v4889_v33, %v4451_v26  ;;  %v4545_v1 = vperm.slane %v2315_v15, 0 }
 0x2c9   : > { %2754 = vrsqrt.f32 %v2317_v38  ;;  %vm2334_vm2 = vweird.f32 %v2317_v38 }
 0x2cf   : > { %v2755_v41 = vpop.eup %2754 }
 0x2d0   : > { %v2329_v47 = vmul.f32 %v2755_v41, %v2317_v38  ;;  %vm2335_vm0 = vweird.f32 %v2755_v41  ;;  %v4547_v38 = vperm.slane %v2315_v15, 1 }
 0x2d1   : > { %vm2336_vm3 = vmor %vm2334_vm2, %vm2335_vm0 }
 0x2d2   : > { %v2330_v48 = vmul.f32 %v2755_v41, %v2329_v47 }
 0x2d4   : > { %v2331_v37 = vmul.f32 0.5, %v2330_v48 }
 0x2d6   : > { %v2332_v31 = vsub.f32 1.5, %v2331_v37 }
 0x2d8   : > { %v2333_v57 = vmul.f32 %v2755_v41, %v2332_v31 }
 0x2da   : > { %v2337_v56 = vsel %vm2336_vm3, %v2755_v41, %v2333_v57 }
 0x2db   : > { %v2340_v39 = vrot.slane %v2337_v56, 7 }
 0x2dd   : > { %v2342_v4 = vsel %vm2341_vm5, %v2327_v2, %v2340_v39 }
 0x2de   : > { %v2344_v30 = vmul.f32 %v2342_v4, %v2313_v63 }
 0x2e0   : > { %v2346_v61 = vperm.slane %v2344_v30, 0  ;;  %v2347_v42 = vperm.slane %v2344_v30, 1 }
 0x2e2   : > { %v2350_v59 = vmul.f32 %v2346_v61, %v4304_v53  ;;  %v2351_v55 = vmul.f32 %v2347_v42, %v4456_v45  ;;  %v2352_v5 = vmul.f32 %v2346_v61, %v4309_v49  ;;  %v2353_v24 = vmul.f32 %v2347_v42, %v4461_v16 }
 0x2e3   : > { %v2354_v19 = vmul.f32 %v2346_v61, %v4314_v36  ;;  %v2355_v13 = vmul.f32 %v2347_v42, %v4466_v20  ;;  %v2356_v41 = vmul.f32 %v2346_v61, %v4319_v0  ;;  %v2357_v28 = vmul.f32 %v2347_v42, %v4471_v34 }
 0x2e4   : > { %v2358_v26 = vmul.f32 %v2346_v61, %v4324_v3  ;;  %v2359_v51 = vmul.f32 %v2347_v42, %v4476_v23  ;;  %v2360_v53 = vmul.f32 %v2346_v61, %v4329_v14  ;;  %v2361_v45 = vmul.f32 %v2347_v42, %v4481_v44 }
 0x2e5   : > { %v2362_v49 = vmul.f32 %v2346_v61, %v4334_v62  ;;  %v2363_v16 = vmul.f32 %v2347_v42, %v4486_v43  ;;  %v2364_v36 = vmul.f32 %v2346_v61, %v4339_v35  ;;  %v2365_v20 = vmul.f32 %v2347_v42, %v4491_v32 }
 0x2e6   : > { %v2366_v47 = vmul.f32 %v2346_v61, %v2148_v40  ;;  %v2367_v0 = vmul.f32 %v2347_v42, %v2149_v60  ;;  %v2368_v48 = vmul.f32 %v2346_v61, %v2150_v8  ;;  %v2369_v34 = vmul.f32 %v2347_v42, %v2151_v52 }
 0x2e7   : > { %v2370_v3 = vmul.f32 %v2346_v61, %v4344_v18  ;;  %v2371_v23 = vmul.f32 %v2347_v42, %v4496_v22  ;;  %v2372_v14 = vmul.f32 %v2346_v61, %v4349_v46  ;;  %v2373_v44 = vmul.f32 %v2347_v42, %v4499_v10 }
 0x2e8   : > { %v2374_v62 = vmul.f32 %v2346_v61, %v4354_v6  ;;  %v2375_v35 = vmul.f32 %v2347_v42, %v4502_v11  ;;  %v2376_v43 = vmul.f32 %v2346_v61, %v4357_v21  ;;  %v2377_v32 = vmul.f32 %v2347_v42, %v4505_v9 }
 0x2e9   : > { %v2378_v18 = vmul.f32 %v2346_v61, %v4360_v17  ;;  %v2379_v22 = vmul.f32 %v2347_v42, %v4508_v50  ;;  %v2380_v46 = vmul.f32 %v2346_v61, %v4363_v7  ;;  %v4577_v10 = vmul.f32 %v2347_v42, %v4511_v25 }
 0x2ea   : > { %v2387_v6 = vadd.f32 %v4545_v1, %v2350_v59  ;;  %v2388_v11 = vadd.f32 %v4547_v38, %v2351_v55  ;;  %v2389_v21 = vadd.f32 %v4545_v1, %v2352_v5  ;;  %v2390_v9 = vadd.f32 %v4547_v38, %v2353_v24 }
 0x2eb   : > { %v2391_v17 = vadd.f32 %v4545_v1, %v2354_v19  ;;  %v2392_v7 = vadd.f32 %v4547_v38, %v2355_v13  ;;  %v2393_v50 = vadd.f32 %v4545_v1, %v2356_v41  ;;  %v2394_v25 = vadd.f32 %v4547_v38, %v2357_v28 }
 0x2ec   : > { %2419 = vst [vmem:[%s3183_s14] sm:$0xff] %v2387_v6  ;;  %v2395_v58 = vadd.f32 %v4545_v1, %v2358_v26  ;;  %v2396_v37 = vadd.f32 %v4547_v38, %v2359_v51  ;;  %v2397_v31 = vadd.f32 %v4545_v1, %v2360_v53  ;;  %v2398_v12 = vadd.f32 %v4547_v38, %v2361_v45 }
 0x2ed   : > { %2420 = vst [vmem:[%s3183_s14 + $0x8] sm:$0xff] %v2388_v11  ;;  %v2399_v57 = vadd.f32 %v4545_v1, %v2362_v49  ;;  %v2400_v56 = vadd.f32 %v4547_v38, %v2363_v16  ;;  %v2401_v63 = vadd.f32 %v4545_v1, %v2364_v36  ;;  %v2402_v39 = vadd.f32 %v4547_v38, %v2365_v20 }
 0x2ee   : > { %2421 = vst [vmem:[%s3183_s14 + $0x10] sm:$0xff] %v2389_v21  ;;  %v2403_v2 = vadd.f32 %v4545_v1, %v2366_v47  ;;  %v2404_v4 = vadd.f32 %v4547_v38, %v2367_v0  ;;  %v2405_v15 = vadd.f32 %v4545_v1, %v2368_v48  ;;  %v2406_v30 = vadd.f32 %v4547_v38, %v2369_v34 }
 0x2ef   : > { %2422 = vst [vmem:[%s3183_s14 + $0x18] sm:$0xff] %v2390_v9  ;;  %v2407_v54 = vadd.f32 %v4545_v1, %v2370_v3  ;;  %v2408_v40 = vadd.f32 %v4547_v38, %v2371_v23  ;;  %v2409_v29 = vadd.f32 %v4545_v1, %v2372_v14  ;;  %v2410_v8 = vadd.f32 %v4547_v38, %v2373_v44 }
 0x2f0   : > { %2423 = vst [vmem:[%s3183_s14 + $0x20] sm:$0xff] %v2391_v17  ;;  %v2411_v61 = vadd.f32 %v4545_v1, %v2374_v62  ;;  %v2412_v42 = vadd.f32 %v4547_v38, %v2375_v35  ;;  %v2413_v27 = vadd.f32 %v4545_v1, %v2376_v43  ;;  %v2414_v60 = vadd.f32 %v4547_v38, %v2377_v32 }
 0x2f1   : > { %2424 = vst [vmem:[%s3183_s14 + $0x28] sm:$0xff] %v2392_v7  ;;  %v2415_v33 = vadd.f32 %v4545_v1, %v2378_v18  ;;  %v2416_v52 = vadd.f32 %v4547_v38, %v2379_v22  ;;  %v2417_v59 = vadd.f32 %v4545_v1, %v2380_v46  ;;  %v2418_v55 = vadd.f32 %v4547_v38, %v4577_v10 }
 0x2f2   : > { %2425 = vst [vmem:[%s3183_s14 + $0x30] sm:$0xff] %v2393_v50 }
 0x2f3   : > { %2426 = vst [vmem:[%s3183_s14 + $0x38] sm:$0xff] %v2394_v25 }
 0x2f4   : > { %2427 = vst [vmem:[%s3183_s14 + $0x40] sm:$0xff] %v2395_v58 }
 0x2f5   : > { %2428 = vst [vmem:[%s3183_s14 + $0x48] sm:$0xff] %v2396_v37 }
 0x2f6   : > { %2429 = vst [vmem:[%s3183_s14 + $0x50] sm:$0xff] %v2397_v31 }
 0x2f7   : > { %2430 = vst [vmem:[%s3183_s14 + $0x58] sm:$0xff] %v2398_v12 }
 0x2f8   : > { %2431 = vst [vmem:[%s3183_s14 + $0x60] sm:$0xff] %v2399_v57 }
 0x2f9   : > { %2432 = vst [vmem:[%s3183_s14 + $0x68] sm:$0xff] %v2400_v56 }
 0x2fa   : > { %2433 = vst [vmem:[%s3183_s14 + $0x70] sm:$0xff] %v2401_v63 }
 0x2fb   : > { %2434 = vst [vmem:[%s3183_s14 + $0x78] sm:$0xff] %v2402_v39 }
 0x2fc   : > { %2435 = vst [vmem:[%s3183_s14 + $0x80] sm:$0xff] %v2403_v2 }
 0x2fd   : > { %2436 = vst [vmem:[%s3183_s14 + $0x88] sm:$0xff] %v2404_v4 }
 0x2fe   : > { %2437 = vst [vmem:[%s3183_s14 + $0x90] sm:$0xff] %v2405_v15 }
 0x2ff   : > { %2438 = vst [vmem:[%s3183_s14 + $0x98] sm:$0xff] %v2406_v30 }
 0x300   : > { %2439 = vst [vmem:[%s3183_s14 + $0xa0] sm:$0xff] %v2407_v54 }
 0x301   : > { %2440 = vst [vmem:[%s3183_s14 + $0xa8] sm:$0xff] %v2408_v40 }
 0x302   : > { %2441 = vst [vmem:[%s3183_s14 + $0xb0] sm:$0xff] %v2409_v29 }
 0x303   : > { %2442 = vst [vmem:[%s3183_s14 + $0xb8] sm:$0xff] %v2410_v8 }
 0x304   : > { %2443 = vst [vmem:[%s3183_s14 + $0xc0] sm:$0xff] %v2411_v61 }
 0x305   : > { %2444 = vst [vmem:[%s3183_s14 + $0xc8] sm:$0xff] %v2412_v42 }
 0x306   : > { %2445 = vst [vmem:[%s3183_s14 + $0xd0] sm:$0xff] %v2413_v27 }
 0x307   : > { %2446 = vst [vmem:[%s3183_s14 + $0xd8] sm:$0xff] %v2414_v60 }
 0x308   : > { %2447 = vst [vmem:[%s3183_s14 + $0xe0] sm:$0xff] %v2415_v33 }
 0x309   : > { %2448 = vst [vmem:[%s3183_s14 + $0xe8] sm:$0xff] %v2416_v52 }
 0x30a   : > { %2449 = vst [vmem:[%s3183_s14 + $0xf0] sm:$0xff] %v2417_v59 }
 0x30b   : > { %2450 = vst [vmem:[%s3183_s14 + $0xf8] sm:$0xff] %v2418_v55 }
 0x30c   : > { %2903 = shalt.err (!%p2900_p13)
}
 0x30d   : > { %s2990_s20 = smov 256   ;;  %s2991_s28 = smov 512  }
 0x30e   : > { %s2992_s11 = smov 16  }
 0x30f   : > { %2655 = dma.vmem_to_hbm [thread:$0]  (%p3122_p0), %s2465_s19, 4096, %s2467_s9, %s2452_s29, %s2990_s20, %s2991_s28, %s2992_s11  }
 0x310 PF: > { %s4890_s13 = sld [smem:[#allocation15_spill]]  ;;  %p2678_p3 = scmp.ge.s32.totalorder %s2982_s22, 2 }
 0x312   : > { %p2672_p4 = pnand %p2678_p3, %p3126_p2 }
 0x314   : > { %p2673_p1 = pneg %p2672_p4 }
 0x316   : > { %s2481_s5 = sand.u32 1, %s4890_s13  }
 0x317   : > { %s2482_s27 = scalar_lea.sflag [#allocation4], %s2481_s5 }
 0x318   : > { %2949 = dma.done.wait (%p2673_p1), %s2482_s27, 4096  }
 0x319   : > { %2951 = vsyncadd (%p2673_p1), %s2482_s27, 4294963200  ;;  %s24_s22 = sadd.s32 1, %s2982_s22   ;;  %s4892_s7 = sld [smem:[#allocation16_spill]] }
 0x31a   : > { %p21_p5 = scmp.ge.s32.totalorder %s24_s22, 8   ;;  %s4893_s17 = sld [smem:[#allocation21_spill]] }
 0x31b   : > { %s4894_s18 = sld [smem:[#allocation17_spill]]  ;;  %s4898_s15 = smov %s2958_s16 }
 0x31c   : > { %s4895_s19 = sld [smem:[#allocation18_spill]]  ;;  %23 = sbr.rel (!%p21_p5) target bundleno = 13 (0xd), region = 116 }
 0x31d   : > { %s4896_s20 = sld [smem:[#allocation19_spill]] }
 0x31e   : > { %s4897_s21 = sld [smem:[#allocation20_spill]] }
 0x31f   : > { %s4899_s16 = smov %s4892_s7 }
 0x321   :  { %2488 = vsyncpa [#allocation3], 1 }
 0x322   :  { %2490 = vsyncpa [#allocation3 + $0x1], 1 }
 0x323   :  { %2491 = vsyncpa [#allocation6], 1 }
 0x324   :  { %2493 = vsyncpa [#allocation6 + $0x1], 1 }
 0x325   :  { %2494 = vsyncpa [#allocation9], 1 }
 0x326   :  { %2496 = vsyncpa [#allocation9 + $0x1], 1 }
 0x327   :  { %2497 = vsyncpa [#allocation4], 1 }
 0x328   :  { %2499 = vsyncpa [#allocation4 + $0x1], 1 }

</bundles_post_ra>
